<compile_context>
chip_gen: v5e
topology: v5e:2x2
jax: 0.10.0
libtpu: 0.0.40
codegen_flags: <defaults>
</compile_context>

<pallas_src>
import math
import functools

import jax
import jax.numpy as jnp
from jax.experimental import pallas as pl
from jax.experimental.pallas import tpu as pltpu

PAD = 0


# ----------------------------------------------------------------------------
# hardware-derived budgets
# ----------------------------------------------------------------------------
def _query_vmem_capacity():
    try:
        return int(pltpu.get_tpu_info().vmem_capacity_bytes)
    except Exception:
        return 64 * 1024 * 1024            # conservative fallback (v7x)


_VMEM_CAP = _query_vmem_capacity()
VMEM_LIMIT = min((_VMEM_CAP * 3) // 4, 96 * 1024 * 1024)
_BIG_VMEM = _VMEM_CAP >= 96 * 1024 * 1024   # v5e / v6e (128 MiB) vs v7x (64 MiB)

# tile targets (clamped to actual dims by _pick_tile)
LIN_TM = 512 if _BIG_VMEM else 256
LIN_TN = 1024 if _BIG_VMEM else 512
LIN_TK = 512
FFN_TI = 1024 if _BIG_VMEM else 512
MHA_TQ = 128
MHA_TKV = 512 if _BIG_VMEM else 256


# ----------------------------------------------------------------------------
# helpers
# ----------------------------------------------------------------------------
def _pick_tile(dim, target, quantum):
    """Largest power-of-two-ish tile <= target dividing dim (multiple of quantum);
    falls back to the full dim (always a legal block shape)."""
    if dim <= target:
        return dim
    t = target
    while t >= quantum:
        if dim % t == 0:
            return t
        t //= 2
    return dim


def _cparams(semantics):
    return pltpu.CompilerParams(dimension_semantics=semantics,
                                vmem_limit_bytes=VMEM_LIMIT)


# ----------------------------------------------------------------------------
# Linear kernels
# ----------------------------------------------------------------------------
def _linear_kernel(x_ref, w_ref, b_ref, o_ref, acc_ref, *, activation):
    k = pl.program_id(2)

    @pl.when(k == 0)
    def _():
        acc_ref[...] = jnp.zeros_like(acc_ref)

    acc_ref[...] += jnp.dot(x_ref[...].astype(jnp.bfloat16),
                            w_ref[...].astype(jnp.bfloat16),
                            preferred_element_type=jnp.float32)

    @pl.when(k == pl.num_programs(2) - 1)
    def _():
        y = acc_ref[...] + b_ref[...]
        if activation == "relu":
            y = jnp.maximum(y, 0.0)
        o_ref[...] = y.astype(o_ref.dtype)


def pallas_linear(x, w, b, activation=None, out_dtype=jnp.float32,
                  tm=LIN_TM, tn=LIN_TN, tk=LIN_TK):
    """x: (M, K), w: (K, N) bf16, b: (1, N) f32 -> (M, N) out_dtype."""
    M, K = x.shape
    N = w.shape[1]
    tm = _pick_tile(M, tm, 16)          # 16-quantum: legal for bf16 & f32 tiles
    tn = _pick_tile(N, tn, 128)
    tk = _pick_tile(K, tk, 128)
    grid = (M // tm, N // tn, K // tk)
    return pl.pallas_call(
        functools.partial(_linear_kernel, activation=activation),
        grid=grid,
        in_specs=[
            pl.BlockSpec((tm, tk), lambda i, j, k: (i, k)),
            pl.BlockSpec((tk, tn), lambda i, j, k: (k, j)),
            pl.BlockSpec((1, tn), lambda i, j, k: (0, j)),
        ],
        out_specs=pl.BlockSpec((tm, tn), lambda i, j, k: (i, j)),
        out_shape=jax.ShapeDtypeStruct((M, N), out_dtype),
        scratch_shapes=[pltpu.VMEM((tm, tn), jnp.float32)],
        compiler_params=_cparams(("parallel", "parallel", "arbitrary")),
    )(x, w, b)


def _linear_res_ln_kernel(x_ref, w_ref, b_ref, res_ref, g_ref, bb_ref,
                          o_ref, acc_ref, *, eps):
    """Tiled matmul + (bias + residual + LayerNorm) epilogue on last K block."""
    k = pl.program_id(1)

    @pl.when(k == 0)
    def _():
        acc_ref[...] = jnp.zeros_like(acc_ref)

    acc_ref[...] += jnp.dot(x_ref[...].astype(jnp.bfloat16),
                            w_ref[...].astype(jnp.bfloat16),
                            preferred_element_type=jnp.float32)

    @pl.when(k == pl.num_programs(1) - 1)
    def _():
        y = acc_ref[...] + b_ref[...] + res_ref[...]
        mu = jnp.mean(y, axis=-1, keepdims=True)
        var = jnp.mean((y - mu) ** 2, axis=-1, keepdims=True)
        o_ref[...] = (y - mu) * jax.lax.rsqrt(var + eps) * g_ref[...] + bb_ref[...]


def pallas_linear_res_ln(x, w, b, residual, gamma, beta, eps=1e-5,
                         tm=LIN_TM, tk=LIN_TK):
    """(x @ w + b + residual) -> LayerNorm over full N (= d_model).  x may be bf16."""
    M, K = x.shape
    N = w.shape[1]
    tm = _pick_tile(M, tm, 16)
    tk = _pick_tile(K, tk, 128)
    grid = (M // tm, K // tk)
    return pl.pallas_call(
        functools.partial(_linear_res_ln_kernel, eps=eps),
        grid=grid,
        in_specs=[
            pl.BlockSpec((tm, tk), lambda i, k: (i, k)),
            pl.BlockSpec((tk, N), lambda i, k: (k, 0)),
            pl.BlockSpec((1, N), lambda i, k: (0, 0)),
            pl.BlockSpec((tm, N), lambda i, k: (i, 0)),
            pl.BlockSpec((1, N), lambda i, k: (0, 0)),
            pl.BlockSpec((1, N), lambda i, k: (0, 0)),
        ],
        out_specs=pl.BlockSpec((tm, N), lambda i, k: (i, 0)),
        out_shape=jax.ShapeDtypeStruct((M, N), jnp.float32),
        scratch_shapes=[pltpu.VMEM((tm, N), jnp.float32)],
        compiler_params=_cparams(("parallel", "arbitrary")),
    )(x, w, b, residual, gamma, beta)


def _ffn_kernel(x_ref, w1_ref, b1_ref, w2_ref, b2_ref, g_ref, bb_ref,
                o_ref, acc_ref, *, eps):
    """Fused FFN: relu(x@w1+b1)@w2 blocked over d_inner; (+b2 + x residual) -> LN."""
    j = pl.program_id(1)

    @pl.when(j == 0)
    def _():
        acc_ref[...] = jnp.zeros_like(acc_ref)

    h = jnp.dot(x_ref[...].astype(jnp.bfloat16), w1_ref[...].astype(jnp.bfloat16),
                preferred_element_type=jnp.float32) + b1_ref[...]
    h = jnp.maximum(h, 0.0)
    acc_ref[...] += jnp.dot(h.astype(jnp.bfloat16), w2_ref[...].astype(jnp.bfloat16),
                            preferred_element_type=jnp.float32)

    @pl.when(j == pl.num_programs(1) - 1)
    def _():
        y = acc_ref[...] + b2_ref[...] + x_ref[...]          # x is the residual
        mu = jnp.mean(y, axis=-1, keepdims=True)
        var = jnp.mean((y - mu) ** 2, axis=-1, keepdims=True)
        o_ref[...] = (y - mu) * jax.lax.rsqrt(var + eps) * g_ref[...] + bb_ref[...]


def pallas_ffn(x2, p, eps=1e-5, tm=LIN_TM, ti=FFN_TI):
    """x2: (M, D) f32. Fused position-wise FFN + residual + LayerNorm."""
    M, D = x2.shape
    d_inner = p["w1"].shape[1]
    tm = _pick_tile(M, tm, 16)
    ti = _pick_tile(d_inner, ti, 128)
    grid = (M // tm, d_inner // ti)
    return pl.pallas_call(
        functools.partial(_ffn_kernel, eps=eps),
        grid=grid,
        in_specs=[
            pl.BlockSpec((tm, D), lambda i, j: (i, 0)),   # x (also residual)
            pl.BlockSpec((D, ti), lambda i, j: (0, j)),   # w1
            pl.BlockSpec((1, ti), lambda i, j: (0, j)),   # b1
            pl.BlockSpec((ti, D), lambda i, j: (j, 0)),   # w2
            pl.BlockSpec((1, D), lambda i, j: (0, 0)),    # b2
            pl.BlockSpec((1, D), lambda i, j: (0, 0)),    # ln_g
            pl.BlockSpec((1, D), lambda i, j: (0, 0)),    # ln_b
        ],
        out_specs=pl.BlockSpec((tm, D), lambda i, j: (i, 0)),
        out_shape=jax.ShapeDtypeStruct((M, D), jnp.float32),
        scratch_shapes=[pltpu.VMEM((tm, D), jnp.float32)],
        compiler_params=_cparams(("parallel", "arbitrary")),
    )(x2, p["w1"], p["b1"], p["w2"], p["b2"], p["ln_g"], p["ln_b"])


# ----------------------------------------------------------------------------
# Flash-style multi-head attention (all heads of one (q-tile, k-tile) per step)
# ----------------------------------------------------------------------------
def _flash_mha_kernel(*refs, scale, n_head, d_k, d_v, has_mask, out_probs):
    idx = 0
    q_ref = refs[idx]; idx += 1          # (tq, H*dk)   bf16
    k_ref = refs[idx]; idx += 1          # (tkv, H*dk)  bf16
    v_ref = refs[idx]; idx += 1          # (tkv, H*dv)  bf16
    mask_ref = None
    if has_mask:
        mask_ref = refs[idx]; idx += 1   # (1, tkv)     f32 (1.0 where PAD key)
    o_ref = refs[idx]; idx += 1          # (tq, H*dv)   bf16
    p_ref = None
    if out_probs:
        p_ref = refs[idx]; idx += 1      # (n_head, tq, Lk)
    m_sc, l_sc, acc_sc = refs[idx], refs[idx + 1], refs[idx + 2]

    ki = pl.program_id(2)

    @pl.when(ki == 0)
    def _():
        m_sc[...] = jnp.full(m_sc.shape, -jnp.inf, m_sc.dtype)
        l_sc[...] = jnp.zeros_like(l_sc)
        acc_sc[...] = jnp.zeros_like(acc_sc)

    if has_mask:
        neg = jnp.where(mask_ref[...] > 0.5, jnp.float32(-1e9), jnp.float32(0.0))

    for h in range(n_head):              # static offsets -> ref-view slices
        qh = q_ref[:, h * d_k:(h + 1) * d_k].astype(jnp.bfloat16)
        kh = k_ref[:, h * d_k:(h + 1) * d_k].astype(jnp.bfloat16)
        vh = v_ref[:, h * d_v:(h + 1) * d_v].astype(jnp.bfloat16)
        s = jax.lax.dot_general(qh, kh, (((1,), (1,)), ((), ())),
                                preferred_element_type=jnp.float32) * scale
        if has_mask:
            s = s + neg                                    # key-only pad mask
        m_prev = m_sc[h]                                   # (tq, 1)
        m_new = jnp.maximum(m_prev, jnp.max(s, axis=-1, keepdims=True))
        alpha = jnp.exp(m_prev - m_new)
        p = jnp.exp(s - m_new)
        l_new = alpha * l_sc[h] + jnp.sum(p, axis=-1, keepdims=True)
        l_sc[h] = l_new
        m_sc[h] = m_new
        pv = jnp.dot(p.astype(jnp.bfloat16), vh, preferred_element_type=jnp.float32)
        acc_sc[:, h * d_v:(h + 1) * d_v] = (
            alpha * acc_sc[:, h * d_v:(h + 1) * d_v] + pv)
        if out_probs:
            # wrapper guarantees a single Lk block in this mode
            p_ref[h] = (p * pl.reciprocal(l_new, approx=True)).astype(p_ref.dtype)

    @pl.when(ki == pl.num_programs(2) - 1)
    def _():
        for h in range(n_head):
            acc_sc[:, h * d_v:(h + 1) * d_v] = (
                acc_sc[:, h * d_v:(h + 1) * d_v]
                * pl.reciprocal(l_sc[h], approx=True))
        o_ref[...] = acc_sc[...].astype(o_ref.dtype)        # one lane-dense store


def pallas_flash_mha(q, k, v, key_pad_mask, n_head, d_k, d_v, *,
                     q_col=0, k_col=0, v_col=0, return_probs=False,
                     out_dtype=jnp.bfloat16, tq=MHA_TQ, tkv=MHA_TKV):
    """q: (B, Lq, *), k: (B, Lk, *), v: (B, Lk, *).  The *_col arguments select the
    block-column (in units of H*dk / H*dv) inside a fused projection output; 0 when
    the arrays are already exactly H*dk / H*dv wide."""
    B, Lq = q.shape[0], q.shape[1]
    Lk = k.shape[1]
    HD, HDv = n_head * d_k, n_head * d_v
    scale = 1.0 / math.sqrt(d_k)

    tq = _pick_tile(Lq, tq, 16)
    tkv = Lk if return_probs else _pick_tile(Lk, tkv, 128)
    grid = (B, Lq // tq, Lk // tkv)

    inputs = [q, k, v]
    in_specs = [
        pl.BlockSpec((None, tq, HD), lambda b, qi, ki, c=q_col: (b, qi, c)),
        pl.BlockSpec((None, tkv, HD), lambda b, qi, ki, c=k_col: (b, ki, c)),
        pl.BlockSpec((None, tkv, HDv), lambda b, qi, ki, c=v_col: (b, ki, c)),
    ]
    has_mask = key_pad_mask is not None
    if has_mask:
        inputs.append(key_pad_mask)                         # (B, 1, Lk) f32
        in_specs.append(pl.BlockSpec((None, 1, tkv), lambda b, qi, ki: (b, 0, ki)))

    out_shapes = [jax.ShapeDtypeStruct((B, Lq, HDv), out_dtype)]
    out_specs = [pl.BlockSpec((None, tq, HDv), lambda b, qi, ki: (b, qi, 0))]
    if return_probs:
        out_shapes.append(jax.ShapeDtypeStruct((B, n_head, Lq, Lk), jnp.bfloat16))
        out_specs.append(
            pl.BlockSpec((None, n_head, tq, Lk), lambda b, qi, ki: (b, 0, qi, 0)))

    kernel = functools.partial(_flash_mha_kernel, scale=scale, n_head=n_head,
                               d_k=d_k, d_v=d_v, has_mask=has_mask,
                               out_probs=return_probs)
    res = pl.pallas_call(
        kernel,
        grid=grid,
        in_specs=in_specs,
        out_specs=out_specs,
        out_shape=out_shapes,
        scratch_shapes=[pltpu.VMEM((n_head, tq, 1), jnp.float32),   # running max
                        pltpu.VMEM((n_head, tq, 1), jnp.float32),   # running sum
                        pltpu.VMEM((tq, HDv), jnp.float32)],        # output acc
        compiler_params=_cparams(("parallel", "parallel", "arbitrary")),
    )(*inputs)
    if return_probs:
        return res[0], res[1]
    return res[0], None


# ----------------------------------------------------------------------------
# Model glue (embedding gathers / masks in plain JAX)
# ----------------------------------------------------------------------------
def make_sinusoid_encoding_table(max_position_num, d_model, padding_idx=None):
    half = d_model / 2
    magic = math.log(10000.0) / half
    freqs = jnp.exp(jnp.arange(half, dtype=jnp.float32) * (-magic))
    ang = jnp.arange(max_position_num, dtype=jnp.float32)[:, None] * freqs[None, :]
    tab = jnp.stack([jnp.sin(ang), jnp.cos(ang)], axis=2).reshape(max_position_num, -1)
    if padding_idx is not None:
        tab = tab.at[padding_idx].set(0.0)
    return tab


def make_key_pad_mask(K_seq):
    """Key-only pad mask, (B, 1, Lk) float32, 1.0 where key is PAD."""
    return (K_seq == PAD).astype(jnp.float32)[:, None, :]


def self_attention_block(p, x, key_pad_mask, n_head, d_k, d_v, return_attns):
    B, L, D = x.shape
    HD, HDv = n_head * d_k, n_head * d_v
    x2 = x.reshape(B * L, D)
    qkv = pallas_linear(x2, p["w_qkv"], p["b_qkv"],
                        out_dtype=jnp.bfloat16).reshape(B, L, -1)
    fused_ok = (HD % 128 == 0) and (HDv % 128 == 0) and ((2 * HD) % HDv == 0)
    if fused_ok:
        # zero-copy: pass the fused array thrice with column-sliced BlockSpecs
        q_a = k_a = v_a = qkv
        cols = (0, 1, (2 * HD) // HDv)
    else:
        # toy / unaligned shapes: cheap XLA split keeps block shapes legal
        q_a = qkv[..., :HD]
        k_a = qkv[..., HD:2 * HD]
        v_a = qkv[..., 2 * HD:]
        cols = (0, 0, 0)
    ctx, attn = pallas_flash_mha(q_a, k_a, v_a, key_pad_mask, n_head, d_k, d_v,
                                 q_col=cols[0], k_col=cols[1], v_col=cols[2],
                                 return_probs=return_attns)
    out = pallas_linear_res_ln(ctx.reshape(B * L, HDv),
                               p["wo"], p["bo"], x2, p["ln_g"], p["ln_b"])
    return out.reshape(B, L, D), attn


def cross_attention_block(p, x, img, n_head, d_k, d_v, return_attns):
    B, Lq, D = x.shape
    Lk = img.shape[1]
    HD, HDv = n_head * d_k, n_head * d_v
    x2 = x.reshape(B * Lq, D)
    q = pallas_linear(x2, p["wq"], p["bq"],
                      out_dtype=jnp.bfloat16).reshape(B, Lq, HD)
    kv = pallas_linear(img.reshape(B * Lk, D), p["w_kv"], p["b_kv"],
                       out_dtype=jnp.bfloat16).reshape(B, Lk, -1)
    fused_ok = (HD % 128 == 0) and (HDv % 128 == 0) and (HD % HDv == 0)
    if fused_ok:
        k_a = v_a = kv
        k_col, v_col = 0, HD // HDv
    else:
        k_a = kv[..., :HD]
        v_a = kv[..., HD:]
        k_col, v_col = 0, 0
    # cross-attention mask is all zeros (no image padding) -> skip masking.
    ctx, attn = pallas_flash_mha(q, k_a, v_a, None, n_head, d_k, d_v,
                                 k_col=k_col, v_col=v_col,
                                 return_probs=return_attns)
    out = pallas_linear_res_ln(ctx.reshape(B * Lq, HDv),
                               p["wo"], p["bo"], x2, p["ln_g"], p["ln_b"])
    return out.reshape(B, Lq, D), attn


def feed_forward(p, x):
    B, L, D = x.shape
    out = pallas_ffn(x.reshape(B * L, D), p)
    return out.reshape(B, L, D)


def text_encoder_layer(p, x, img_enc_output, key_pad_mask, n_head, d_k, d_v,
                       return_attns):
    x, self_attn = self_attention_block(p["self"], x, key_pad_mask,
                                        n_head, d_k, d_v, return_attns)
    x, img_attn = cross_attention_block(p["cross"], x, img_enc_output,
                                        n_head, d_k, d_v, return_attns)
    x = feed_forward(p["ffn"], x)
    return x, self_attn, img_attn


def text_encoder_forward(params, src_seq, src_pos, img_enc_output,
                         n_head, d_k, d_v, return_attns=False):
    d_model = params["emb"].shape[1]
    sqrt_d_model = d_model ** 0.5

    key_pad_mask = make_key_pad_mask(src_seq)                 # (B, 1, L)
    # TODO(synk): embedding / positional gathers done in plain XLA (no Pallas gather).
    enc_output = params["emb"][src_seq] * sqrt_d_model + params["pos_table"][src_pos]
    # TODO(synk): dropout(p=0.1) omitted — eval-mode identity.

    self_list, img_list = [], []
    for lp in params["layers"]:
        enc_output, sa, ia = text_encoder_layer(lp, enc_output, img_enc_output,
                                                key_pad_mask, n_head, d_k, d_v,
                                                return_attns)
        if return_attns:
            self_list.append(sa)
            img_list.append(ia)
    if return_attns:
        return enc_output, self_list, img_list
    return (enc_output,)


# ----------------------------------------------------------------------------
# Deterministic parameter init (matmul weights stored bf16, LN/bias in f32)
# ----------------------------------------------------------------------------
def init_params(key, vocab, max_pos, d_model, n_head, d_k, d_v, d_inner, n_layers):
    keys = iter(jax.random.split(key, 1024))

    def dense(fan_in, fan_out):
        return (jax.random.normal(next(keys), (fan_in, fan_out), jnp.float32)
                / jnp.sqrt(float(fan_in)))

    def zeros(n):
        return jnp.zeros((1, n), jnp.float32)

    def bf(a):
        return a.astype(jnp.bfloat16)

    emb = jax.random.normal(next(keys), (vocab, d_model), jnp.float32) * 0.02
    emb = emb.at[PAD].set(0.0)

    def ln():
        return jnp.ones((1, d_model), jnp.float32), jnp.zeros((1, d_model), jnp.float32)

    def self_mha():
        wq = dense(d_model, n_head * d_k)
        wk = dense(d_model, n_head * d_k)
        wv = dense(d_model, n_head * d_v)
        g, b = ln()
        return {
            "w_qkv": bf(jnp.concatenate([wq, wk, wv], axis=1)),
            "b_qkv": zeros(2 * n_head * d_k + n_head * d_v),
            "wo": bf(dense(n_head * d_v, d_model)), "bo": zeros(d_model),
            "ln_g": g, "ln_b": b,
        }

    def cross_mha():
        wk = dense(d_model, n_head * d_k)
        wv = dense(d_model, n_head * d_v)
        g, b = ln()
        return {
            "wq": bf(dense(d_model, n_head * d_k)), "bq": zeros(n_head * d_k),
            "w_kv": bf(jnp.concatenate([wk, wv], axis=1)),
            "b_kv": zeros(n_head * d_k + n_head * d_v),
            "wo": bf(dense(n_head * d_v, d_model)), "bo": zeros(d_model),
            "ln_g": g, "ln_b": b,
        }

    def ffn():
        g, b = ln()
        return {
            "w1": bf(dense(d_model, d_inner)), "b1": zeros(d_inner),
            "w2": bf(dense(d_inner, d_model)), "b2": zeros(d_model),
            "ln_g": g, "ln_b": b,
        }

    layers = [{"self": self_mha(), "cross": cross_mha(), "ffn": ffn()}
              for _ in range(n_layers)]

    return {
        "emb": emb,
        "pos_table": make_sinusoid_encoding_table(max_pos, d_model, padding_idx=PAD),
        "layers": layers,
    }


# ----------------------------------------------------------------------------
if __name__ == "__main__":
    B, L, L_img = 2, 8, 16
    d_model, n_head, d_k, d_v, d_inner, n_layers = 32, 4, 8, 8, 64, 2
    vocab, max_pos = 50, 32

    key = jax.random.PRNGKey(0)
    k_param, k_seq, k_img = jax.random.split(key, 3)

    params = init_params(k_param, vocab, max_pos, d_model, n_head, d_k, d_v,
                         d_inner, n_layers)

    src_seq = jax.random.randint(k_seq, (B, L), 1, vocab)
    src_seq = src_seq.at[1, -3:].set(PAD)                       # some padding in batch 1
    positions = jnp.broadcast_to(jnp.arange(1, L + 1), (B, L))
    src_pos = jnp.where(src_seq != PAD, positions, PAD)
    img_enc_output = jax.random.normal(k_img, (B, L_img, d_model), jnp.float32)

    fwd = jax.jit(functools.partial(text_encoder_forward,
                                    n_head=n_head, d_k=d_k, d_v=d_v))
    (enc_output,) = fwd(params, src_seq, src_pos, img_enc_output)
    enc_output = jax.block_until_ready(enc_output)
    assert enc_output.shape == (B, L, d_model)
    assert bool(jnp.all(jnp.isfinite(enc_output)))
    print("KERNEL_OK")
</pallas_src>

<mosaic_0001>
module attributes {stable_mosaic.version = 11 : i64} {
  func.func @_linear_kernel(%arg0: i32, %arg1: i32, %arg2: i32, %arg3: memref<16x32xf32, #tpu.memory_space<vmem>>, %arg4: memref<32x96xbf16, #tpu.memory_space<vmem>>, %arg5: memref<1x96xf32, #tpu.memory_space<vmem>>, %arg6: memref<16x96xbf16, #tpu.memory_space<vmem>>, %arg7: memref<16x96xf32, #tpu.memory_space<vmem>>) attributes {dimension_semantics = [#tpu.dimension_semantics<parallel>, #tpu.dimension_semantics<parallel>, #tpu.dimension_semantics<arbitrary>], iteration_bounds = array<i64: 1, 1, 1>, scalar_prefetch = 0 : i64, scratch_operands = 1 : i64, tpu.core_type = #tpu.core_type<tc>, window_params = [{transform_indices = @transform_0, window_bounds = array<i64: 16, 32>}, {transform_indices = @transform_1, window_bounds = array<i64: 32, 96>}, {transform_indices = @transform_2, window_bounds = array<i64: 1, 96>}, {transform_indices = @transform_3, window_bounds = array<i64: 16, 96>}]} {
    %c0_i32 = arith.constant 0 : i32
    %0 = arith.cmpi eq, %arg2, %c0_i32 : i32
    %1 = arith.extui %0 : i1 to i32
    %c0_i32_0 = arith.constant 0 : i32
    %2 = arith.cmpi ne, %1, %c0_i32_0 : i32
    scf.if %2 {
      %cst_10 = arith.constant 0.000000e+00 : f32
      %13 = vector.broadcast %cst_10 : f32 to vector<16x96xf32>
      %c0_11 = arith.constant 0 : index
      %c0_12 = arith.constant 0 : index
      %14 = vector.load %arg7[%c0_11, %c0_12] : memref<16x96xf32, #tpu.memory_space<vmem>>, vector<16x96xf32>
      tpu.vector_store %arg7[%c0_11, %c0_12], %13 {strides = array<i32>} : memref<16x96xf32, #tpu.memory_space<vmem>>, vector<16x96xf32>,
    } else {
    }
    %c0 = arith.constant 0 : index
    %c0_1 = arith.constant 0 : index
    %3 = vector.load %arg7[%c0, %c0_1] : memref<16x96xf32, #tpu.memory_space<vmem>>, vector<16x96xf32>
    %c0_2 = arith.constant 0 : index
    %c0_3 = arith.constant 0 : index
    %4 = vector.load %arg3[%c0_2, %c0_3] : memref<16x32xf32, #tpu.memory_space<vmem>>, vector<16x32xf32>
    %5 = arith.truncf %4 : vector<16x32xf32> to vector<16x32xbf16>
    %c0_4 = arith.constant 0 : index
    %c0_5 = arith.constant 0 : index
    %6 = vector.load %arg4[%c0_4, %c0_5] : memref<32x96xbf16, #tpu.memory_space<vmem>>, vector<32x96xbf16>
    %cst = arith.constant dense<0.000000e+00> : vector<16x96xf32>
    %7 = tpu.matmul %5, %6, %cst {dimension_numbers = #tpu.dot_dimension_numbers<[1], [0], [0], [1], [0, 0, 1, 1], [], []>} : vector<16x32xbf16>, vector<32x96xbf16>, vector<16x96xf32> -> vector<16x96xf32>
    %8 = arith.addf %3, %7 : vector<16x96xf32>
    %c0_6 = arith.constant 0 : index
    %c0_7 = arith.constant 0 : index
    %9 = vector.load %arg7[%c0_6, %c0_7] : memref<16x96xf32, #tpu.memory_space<vmem>>, vector<16x96xf32>
    tpu.vector_store %arg7[%c0_6, %c0_7], %8 {strides = array<i32>} : memref<16x96xf32, #tpu.memory_space<vmem>>, vector<16x96xf32>,
    %c0_i32_8 = arith.constant 0 : i32
    %10 = arith.cmpi eq, %arg2, %c0_i32_8 : i32
    %11 = arith.extui %10 : i1 to i32
    %c0_i32_9 = arith.constant 0 : i32
    %12 = arith.cmpi ne, %11, %c0_i32_9 : i32
    scf.if %12 {
      %c0_10 = arith.constant 0 : index
      %c0_11 = arith.constant 0 : index
      %13 = vector.load %arg7[%c0_10, %c0_11] : memref<16x96xf32, #tpu.memory_space<vmem>>, vector<16x96xf32>
      %c0_12 = arith.constant 0 : index
      %c0_13 = arith.constant 0 : index
      %14 = vector.load %arg5[%c0_12, %c0_13] : memref<1x96xf32, #tpu.memory_space<vmem>>, vector<1x96xf32>
      %15 = vector.broadcast %14 : vector<1x96xf32> to vector<16x96xf32>
      %16 = arith.addf %13, %15 : vector<16x96xf32>
      %17 = arith.truncf %16 : vector<16x96xf32> to vector<16x96xbf16>
      %c0_14 = arith.constant 0 : index
      %c0_15 = arith.constant 0 : index
      %18 = vector.load %arg6[%c0_14, %c0_15] : memref<16x96xbf16, #tpu.memory_space<vmem>>, vector<16x96xbf16>
      tpu.vector_store %arg6[%c0_14, %c0_15], %17 {strides = array<i32>} : memref<16x96xbf16, #tpu.memory_space<vmem>>, vector<16x96xbf16>,
    } else {
    }
    return
  }
  func.func @transform_0(%arg0: i32, %arg1: i32, %arg2: i32) -> (i32, i32) {
    %c0_i32 = arith.constant 0 : i32
    return %arg0, %arg2 : i32, i32
  }
  func.func @transform_1(%arg0: i32, %arg1: i32, %arg2: i32) -> (i32, i32) {
    %c0_i32 = arith.constant 0 : i32
    return %arg2, %arg1 : i32, i32
  }
  func.func @transform_2(%arg0: i32, %arg1: i32, %arg2: i32) -> (i32, i32) {
    %c0_i32 = arith.constant 0 : i32
    %c0_i32_0 = arith.constant 0 : i32
    return %c0_i32, %arg1 : i32, i32
  }
  func.func @transform_3(%arg0: i32, %arg1: i32, %arg2: i32) -> (i32, i32) {
    %c0_i32 = arith.constant 0 : i32
    return %arg0, %arg1 : i32, i32
  }
}

module attributes {stable_mosaic.version = 11 : i64} {
  func.func @_linear_kernel(%arg0: i32, %arg1: i32, %arg2: i32, %arg3: memref<16x32xf32, #tpu.memory_space<vmem>>, %arg4: memref<32x32xbf16, #tpu.memory_space<vmem>>, %arg5: memref<1x32xf32, #tpu.memory_space<vmem>>, %arg6: memref<16x32xbf16, #tpu.memory_space<vmem>>, %arg7: memref<16x32xf32, #tpu.memory_space<vmem>>) attributes {dimension_semantics = [#tpu.dimension_semantics<parallel>, #tpu.dimension_semantics<parallel>, #tpu.dimension_semantics<arbitrary>], iteration_bounds = array<i64: 1, 1, 1>, scalar_prefetch = 0 : i64, scratch_operands = 1 : i64, tpu.core_type = #tpu.core_type<tc>, window_params = [{transform_indices = @transform_0, window_bounds = array<i64: 16, 32>}, {transform_indices = @transform_1, window_bounds = array<i64: 32, 32>}, {transform_indices = @transform_2, window_bounds = array<i64: 1, 32>}, {transform_indices = @transform_3, window_bounds = array<i64: 16, 32>}]} {
    %c0_i32 = arith.constant 0 : i32
    %0 = arith.cmpi eq, %arg2, %c0_i32 : i32
    %1 = arith.extui %0 : i1 to i32
    %c0_i32_0 = arith.constant 0 : i32
    %2 = arith.cmpi ne, %1, %c0_i32_0 : i32
    scf.if %2 {
      %cst_10 = arith.constant 0.000000e+00 : f32
      %13 = vector.broadcast %cst_10 : f32 to vector<16x32xf32>
      %c0_11 = arith.constant 0 : index
      %c0_12 = arith.constant 0 : index
      %14 = vector.load %arg7[%c0_11, %c0_12] : memref<16x32xf32, #tpu.memory_space<vmem>>, vector<16x32xf32>
      tpu.vector_store %arg7[%c0_11, %c0_12], %13 {strides = array<i32>} : memref<16x32xf32, #tpu.memory_space<vmem>>, vector<16x32xf32>,
    } else {
    }
    %c0 = arith.constant 0 : index
    %c0_1 = arith.constant 0 : index
    %3 = vector.load %arg7[%c0, %c0_1] : memref<16x32xf32, #tpu.memory_space<vmem>>, vector<16x32xf32>
    %c0_2 = arith.constant 0 : index
    %c0_3 = arith.constant 0 : index
    %4 = vector.load %arg3[%c0_2, %c0_3] : memref<16x32xf32, #tpu.memory_space<vmem>>, vector<16x32xf32>
    %5 = arith.truncf %4 : vector<16x32xf32> to vector<16x32xbf16>
    %c0_4 = arith.constant 0 : index
    %c0_5 = arith.constant 0 : index
    %6 = vector.load %arg4[%c0_4, %c0_5] : memref<32x32xbf16, #tpu.memory_space<vmem>>, vector<32x32xbf16>
    %cst = arith.constant dense<0.000000e+00> : vector<16x32xf32>
    %7 = tpu.matmul %5, %6, %cst {dimension_numbers = #tpu.dot_dimension_numbers<[1], [0], [0], [1], [0, 0, 1, 1], [], []>} : vector<16x32xbf16>, vector<32x32xbf16>, vector<16x32xf32> -> vector<16x32xf32>
    %8 = arith.addf %3, %7 : vector<16x32xf32>
    %c0_6 = arith.constant 0 : index
    %c0_7 = arith.constant 0 : index
    %9 = vector.load %arg7[%c0_6, %c0_7] : memref<16x32xf32, #tpu.memory_space<vmem>>, vector<16x32xf32>
    tpu.vector_store %arg7[%c0_6, %c0_7], %8 {strides = array<i32>} : memref<16x32xf32, #tpu.memory_space<vmem>>, vector<16x32xf32>,
    %c0_i32_8 = arith.constant 0 : i32
    %10 = arith.cmpi eq, %arg2, %c0_i32_8 : i32
    %11 = arith.extui %10 : i1 to i32
    %c0_i32_9 = arith.constant 0 : i32
    %12 = arith.cmpi ne, %11, %c0_i32_9 : i32
    scf.if %12 {
      %c0_10 = arith.constant 0 : index
      %c0_11 = arith.constant 0 : index
      %13 = vector.load %arg7[%c0_10, %c0_11] : memref<16x32xf32, #tpu.memory_space<vmem>>, vector<16x32xf32>
      %c0_12 = arith.constant 0 : index
      %c0_13 = arith.constant 0 : index
      %14 = vector.load %arg5[%c0_12, %c0_13] : memref<1x32xf32, #tpu.memory_space<vmem>>, vector<1x32xf32>
      %15 = vector.broadcast %14 : vector<1x32xf32> to vector<16x32xf32>
      %16 = arith.addf %13, %15 : vector<16x32xf32>
      %17 = arith.truncf %16 : vector<16x32xf32> to vector<16x32xbf16>
      %c0_14 = arith.constant 0 : index
      %c0_15 = arith.constant 0 : index
      %18 = vector.load %arg6[%c0_14, %c0_15] : memref<16x32xbf16, #tpu.memory_space<vmem>>, vector<16x32xbf16>
      tpu.vector_store %arg6[%c0_14, %c0_15], %17 {strides = array<i32>} : memref<16x32xbf16, #tpu.memory_space<vmem>>, vector<16x32xbf16>,
    } else {
    }
    return
  }
  func.func @transform_0(%arg0: i32, %arg1: i32, %arg2: i32) -> (i32, i32) {
    %c0_i32 = arith.constant 0 : i32
    return %arg0, %arg2 : i32, i32
  }
  func.func @transform_1(%arg0: i32, %arg1: i32, %arg2: i32) -> (i32, i32) {
    %c0_i32 = arith.constant 0 : i32
    return %arg2, %arg1 : i32, i32
  }
  func.func @transform_2(%arg0: i32, %arg1: i32, %arg2: i32) -> (i32, i32) {
    %c0_i32 = arith.constant 0 : i32
    %c0_i32_0 = arith.constant 0 : i32
    return %c0_i32, %arg1 : i32, i32
  }
  func.func @transform_3(%arg0: i32, %arg1: i32, %arg2: i32) -> (i32, i32) {
    %c0_i32 = arith.constant 0 : i32
    return %arg0, %arg1 : i32, i32
  }
}

module attributes {stable_mosaic.version = 11 : i64} {
  func.func @_linear_res_ln_kernel(%arg0: i32, %arg1: i32, %arg2: memref<16x32xbf16, #tpu.memory_space<vmem>>, %arg3: memref<32x32xbf16, #tpu.memory_space<vmem>>, %arg4: memref<1x32xf32, #tpu.memory_space<vmem>>, %arg5: memref<16x32xf32, #tpu.memory_space<vmem>>, %arg6: memref<1x32xf32, #tpu.memory_space<vmem>>, %arg7: memref<1x32xf32, #tpu.memory_space<vmem>>, %arg8: memref<16x32xf32, #tpu.memory_space<vmem>>, %arg9: memref<16x32xf32, #tpu.memory_space<vmem>>) attributes {dimension_semantics = [#tpu.dimension_semantics<parallel>, #tpu.dimension_semantics<arbitrary>], iteration_bounds = array<i64: 1, 1>, scalar_prefetch = 0 : i64, scratch_operands = 1 : i64, tpu.core_type = #tpu.core_type<tc>, window_params = [{transform_indices = @transform_0, window_bounds = array<i64: 16, 32>}, {transform_indices = @transform_1, window_bounds = array<i64: 32, 32>}, {pipeline_mode = #tpu.pipeline_mode<synchronous>, transform_indices = @transform_2, window_bounds = array<i64: 1, 32>}, {transform_indices = @transform_3, window_bounds = array<i64: 16, 32>}, {pipeline_mode = #tpu.pipeline_mode<synchronous>, transform_indices = @transform_4, window_bounds = array<i64: 1, 32>}, {pipeline_mode = #tpu.pipeline_mode<synchronous>, transform_indices = @transform_5, window_bounds = array<i64: 1, 32>}, {transform_indices = @transform_6, window_bounds = array<i64: 16, 32>}]} {
    %c0_i32 = arith.constant 0 : i32
    %0 = arith.cmpi eq, %arg1, %c0_i32 : i32
    %1 = arith.extui %0 : i1 to i32
    %c0_i32_0 = arith.constant 0 : i32
    %2 = arith.cmpi ne, %1, %c0_i32_0 : i32
    scf.if %2 {
      %cst_10 = arith.constant 0.000000e+00 : f32
      %12 = vector.broadcast %cst_10 : f32 to vector<16x32xf32>
      %c0_11 = arith.constant 0 : index
      %c0_12 = arith.constant 0 : index
      %13 = vector.load %arg9[%c0_11, %c0_12] : memref<16x32xf32, #tpu.memory_space<vmem>>, vector<16x32xf32>
      tpu.vector_store %arg9[%c0_11, %c0_12], %12 {strides = array<i32>} : memref<16x32xf32, #tpu.memory_space<vmem>>, vector<16x32xf32>,
    } else {
    }
    %c0 = arith.constant 0 : index
    %c0_1 = arith.constant 0 : index
    %3 = vector.load %arg9[%c0, %c0_1] : memref<16x32xf32, #tpu.memory_space<vmem>>, vector<16x32xf32>
    %c0_2 = arith.constant 0 : index
    %c0_3 = arith.constant 0 : index
    %4 = vector.load %arg2[%c0_2, %c0_3] : memref<16x32xbf16, #tpu.memory_space<vmem>>, vector<16x32xbf16>
    %c0_4 = arith.constant 0 : index
    %c0_5 = arith.constant 0 : index
    %5 = vector.load %arg3[%c0_4, %c0_5] : memref<32x32xbf16, #tpu.memory_space<vmem>>, vector<32x32xbf16>
    %cst = arith.constant dense<0.000000e+00> : vector<16x32xf32>
    %6 = tpu.matmul %4, %5, %cst {dimension_numbers = #tpu.dot_dimension_numbers<[1], [0], [0], [1], [0, 0, 1, 1], [], []>} : vector<16x32xbf16>, vector<32x32xbf16>, vector<16x32xf32> -> vector<16x32xf32>
    %7 = arith.addf %3, %6 : vector<16x32xf32>
    %c0_6 = arith.constant 0 : index
    %c0_7 = arith.constant 0 : index
    %8 = vector.load %arg9[%c0_6, %c0_7] : memref<16x32xf32, #tpu.memory_space<vmem>>, vector<16x32xf32>
    tpu.vector_store %arg9[%c0_6, %c0_7], %7 {strides = array<i32>} : memref<16x32xf32, #tpu.memory_space<vmem>>, vector<16x32xf32>,
    %c0_i32_8 = arith.constant 0 : i32
    %9 = arith.cmpi eq, %arg1, %c0_i32_8 : i32
    %10 = arith.extui %9 : i1 to i32
    %c0_i32_9 = arith.constant 0 : i32
    %11 = arith.cmpi ne, %10, %c0_i32_9 : i32
    scf.if %11 {
      %c0_10 = arith.constant 0 : index
      %c0_11 = arith.constant 0 : index
      %12 = vector.load %arg9[%c0_10, %c0_11] : memref<16x32xf32, #tpu.memory_space<vmem>>, vector<16x32xf32>
      %c0_12 = arith.constant 0 : index
      %c0_13 = arith.constant 0 : index
      %13 = vector.load %arg4[%c0_12, %c0_13] : memref<1x32xf32, #tpu.memory_space<vmem>>, vector<1x32xf32>
      %14 = vector.broadcast %13 : vector<1x32xf32> to vector<16x32xf32>
      %15 = arith.addf %12, %14 : vector<16x32xf32>
      %c0_14 = arith.constant 0 : index
      %c0_15 = arith.constant 0 : index
      %16 = vector.load %arg5[%c0_14, %c0_15] : memref<16x32xf32, #tpu.memory_space<vmem>>, vector<16x32xf32>
      %17 = arith.addf %15, %16 : vector<16x32xf32>
      %cst_16 = arith.constant dense<0.000000e+00> : vector<16xf32>
      %18 = vector.multi_reduction <add>, %17, %cst_16 [1] : vector<16x32xf32> to vector<16xf32>
      %19 = vector.shape_cast %18 : vector<16xf32> to vector<16x1xf32>
      %cst_17 = arith.constant 3.200000e+01 : f32
      %20 = vector.broadcast %cst_17 : f32 to vector<16x1xf32>
      %21 = arith.divf %19, %20 : vector<16x1xf32>
      %22 = vector.broadcast %21 : vector<16x1xf32> to vector<16x32xf32>
      %23 = arith.subf %17, %22 : vector<16x32xf32>
      %24 = arith.mulf %23, %23 : vector<16x32xf32>
      %cst_18 = arith.constant dense<0.000000e+00> : vector<16xf32>
      %25 = vector.multi_reduction <add>, %24, %cst_18 [1] : vector<16x32xf32> to vector<16xf32>
      %26 = vector.shape_cast %25 : vector<16xf32> to vector<16x1xf32>
      %cst_19 = arith.constant 3.200000e+01 : f32
      %27 = vector.broadcast %cst_19 : f32 to vector<16x1xf32>
      %28 = arith.divf %26, %27 : vector<16x1xf32>
      %29 = vector.broadcast %21 : vector<16x1xf32> to vector<16x32xf32>
      %30 = arith.subf %17, %29 : vector<16x32xf32>
      %cst_20 = arith.constant 9.99999974E-6 : f32
      %31 = vector.broadcast %cst_20 : f32 to vector<16x1xf32>
      %32 = arith.addf %28, %31 : vector<16x1xf32>
      %33 = math.rsqrt %32 : vector<16x1xf32>
      %34 = vector.broadcast %33 : vector<16x1xf32> to vector<16x32xf32>
      %35 = arith.mulf %30, %34 : vector<16x32xf32>
      %c0_21 = arith.constant 0 : index
      %c0_22 = arith.constant 0 : index
      %36 = vector.load %arg6[%c0_21, %c0_22] : memref<1x32xf32, #tpu.memory_space<vmem>>, vector<1x32xf32>
      %37 = vector.broadcast %36 : vector<1x32xf32> to vector<16x32xf32>
      %38 = arith.mulf %35, %37 : vector<16x32xf32>
      %c0_23 = arith.constant 0 : index
      %c0_24 = arith.constant 0 : index
      %39 = vector.load %arg7[%c0_23, %c0_24] : memref<1x32xf32, #tpu.memory_space<vmem>>, vector<1x32xf32>
      %40 = vector.broadcast %39 : vector<1x32xf32> to vector<16x32xf32>
      %41 = arith.addf %38, %40 : vector<16x32xf32>
      %c0_25 = arith.constant 0 : index
      %c0_26 = arith.constant 0 : index
      %42 = vector.load %arg8[%c0_25, %c0_26] : memref<16x32xf32, #tpu.memory_space<vmem>>, vector<16x32xf32>
      tpu.vector_store %arg8[%c0_25, %c0_26], %41 {strides = array<i32>} : memref<16x32xf32, #tpu.memory_space<vmem>>, vector<16x32xf32>,
    } else {
    }
    return
  }
  func.func @transform_0(%arg0: i32, %arg1: i32) -> (i32, i32) {
    %c0_i32 = arith.constant 0 : i32
    return %arg0, %arg1 : i32, i32
  }
  func.func @transform_1(%arg0: i32, %arg1: i32) -> (i32, i32) {
    %c0_i32 = arith.constant 0 : i32
    %c0_i32_0 = arith.constant 0 : i32
    return %arg1, %c0_i32 : i32, i32
  }
  func.func @transform_2(%arg0: i32, %arg1: i32) -> (i32, i32) {
    %c0_i32 = arith.constant 0 : i32
    %c0_i32_0 = arith.constant 0 : i32
    %c0_i32_1 = arith.constant 0 : i32
    return %c0_i32, %c0_i32_0 : i32, i32
  }
  func.func @transform_3(%arg0: i32, %arg1: i32) -> (i32, i32) {
    %c0_i32 = arith.constant 0 : i32
    %c0_i32_0 = arith.constant 0 : i32
    return %arg0, %c0_i32 : i32, i32
  }
  func.func @transform_4(%arg0: i32, %arg1: i32) -> (i32, i32) {
    %c0_i32 = arith.constant 0 : i32
    %c0_i32_0 = arith.constant 0 : i32
    %c0_i32_1 = arith.constant 0 : i32
    return %c0_i32, %c0_i32_0 : i32, i32
  }
  func.func @transform_5(%arg0: i32, %arg1: i32) -> (i32, i32) {
    %c0_i32 = arith.constant 0 : i32
    %c0_i32_0 = arith.constant 0 : i32
    %c0_i32_1 = arith.constant 0 : i32
    return %c0_i32, %c0_i32_0 : i32, i32
  }
  func.func @transform_6(%arg0: i32, %arg1: i32) -> (i32, i32) {
    %c0_i32 = arith.constant 0 : i32
    %c0_i32_0 = arith.constant 0 : i32
    return %arg0, %c0_i32 : i32, i32
  }
}

module attributes {stable_mosaic.version = 11 : i64} {
  func.func @_flash_mha_kernel(%arg0: i32, %arg1: i32, %arg2: i32, %arg3: memref<1x8x32xbf16, #tpu.memory_space<vmem>>, %arg4: memref<1x8x32xbf16, #tpu.memory_space<vmem>>, %arg5: memref<1x8x32xbf16, #tpu.memory_space<vmem>>, %arg6: memref<1x1x8xf32, #tpu.memory_space<vmem>>, %arg7: memref<1x8x32xbf16, #tpu.memory_space<vmem>>, %arg8: memref<4x8x1xf32, #tpu.memory_space<vmem>>, %arg9: memref<4x8x1xf32, #tpu.memory_space<vmem>>, %arg10: memref<8x32xf32, #tpu.memory_space<vmem>>) attributes {dimension_semantics = [#tpu.dimension_semantics<parallel>, #tpu.dimension_semantics<parallel>, #tpu.dimension_semantics<arbitrary>], iteration_bounds = array<i64: 2, 1, 1>, scalar_prefetch = 0 : i64, scratch_operands = 3 : i64, tpu.core_type = #tpu.core_type<tc>, window_params = [{transform_indices = @transform_0, window_bounds = array<i64: 1, 8, 32>}, {transform_indices = @transform_1, window_bounds = array<i64: 1, 8, 32>}, {transform_indices = @transform_2, window_bounds = array<i64: 1, 8, 32>}, {transform_indices = @transform_3, window_bounds = array<i64: 1, 1, 8>}, {transform_indices = @transform_4, window_bounds = array<i64: 1, 8, 32>}]} {
    %c0_i32 = arith.constant 0 : i32
    %0 = arith.cmpi eq, %arg2, %c0_i32 : i32
    %1 = arith.extui %0 : i1 to i32
    %c0_i32_0 = arith.constant 0 : i32
    %2 = arith.cmpi ne, %1, %c0_i32_0 : i32
    scf.if %2 {
      %cst_121 = arith.constant 0xFF800000 : f32
      %173 = vector.broadcast %cst_121 : f32 to vector<4x8x1xf32>
      %c0_122 = arith.constant 0 : index
      %c0_123 = arith.constant 0 : index
      %c0_124 = arith.constant 0 : index
      %174 = vector.load %arg8[%c0_122, %c0_123, %c0_124] : memref<4x8x1xf32, #tpu.memory_space<vmem>>, vector<4x8x1xf32>
      tpu.vector_store %arg8[%c0_122, %c0_123, %c0_124], %173 {strides = array<i32>} : memref<4x8x1xf32, #tpu.memory_space<vmem>>, vector<4x8x1xf32>,
      %cst_125 = arith.constant 0.000000e+00 : f32
      %175 = vector.broadcast %cst_125 : f32 to vector<4x8x1xf32>
      %c0_126 = arith.constant 0 : index
      %c0_127 = arith.constant 0 : index
      %c0_128 = arith.constant 0 : index
      %176 = vector.load %arg9[%c0_126, %c0_127, %c0_128] : memref<4x8x1xf32, #tpu.memory_space<vmem>>, vector<4x8x1xf32>
      tpu.vector_store %arg9[%c0_126, %c0_127, %c0_128], %175 {strides = array<i32>} : memref<4x8x1xf32, #tpu.memory_space<vmem>>, vector<4x8x1xf32>,
      %cst_129 = arith.constant 0.000000e+00 : f32
      %177 = vector.broadcast %cst_129 : f32 to vector<8x32xf32>
      %c0_130 = arith.constant 0 : index
      %c0_131 = arith.constant 0 : index
      %178 = vector.load %arg10[%c0_130, %c0_131] : memref<8x32xf32, #tpu.memory_space<vmem>>, vector<8x32xf32>
      tpu.vector_store %arg10[%c0_130, %c0_131], %177 {strides = array<i32>} : memref<8x32xf32, #tpu.memory_space<vmem>>, vector<8x32xf32>,
    } else {
    }
    %c0 = arith.constant 0 : index
    %c0_1 = arith.constant 0 : index
    %c0_2 = arith.constant 0 : index
    %3 = vector.load %arg6[%c0, %c0_1, %c0_2] : memref<1x1x8xf32, #tpu.memory_space<vmem>>, vector<1x1x8xf32>
    %4 = vector.shape_cast %3 : vector<1x1x8xf32> to vector<1x8xf32>
    %cst = arith.constant 5.000000e-01 : f32
    %5 = vector.broadcast %cst : f32 to vector<1x8xf32>
    %6 = arith.cmpf ogt, %4, %5 : vector<1x8xf32>
    %cst_3 = arith.constant -1.000000e+09 : f32
    %cst_4 = arith.constant 0.000000e+00 : f32
    %7 = vector.broadcast %cst_3 : f32 to vector<1x8xf32>
    %8 = vector.broadcast %cst_4 : f32 to vector<1x8xf32>
    %9 = arith.select %6, %7, %8 : vector<1x8xi1>, vector<1x8xf32>
    %c0_5 = arith.constant 0 : index
    %c0_6 = arith.constant 0 : index
    %c0_7 = arith.constant 0 : index
    %10 = vector.load %arg3[%c0_5, %c0_6, %c0_7] : memref<1x8x32xbf16, #tpu.memory_space<vmem>>, vector<1x8x8xbf16>
    %11 = vector.shape_cast %10 : vector<1x8x8xbf16> to vector<8x8xbf16>
    %c0_8 = arith.constant 0 : index
    %c0_9 = arith.constant 0 : index
    %c0_10 = arith.constant 0 : index
    %12 = vector.load %arg4[%c0_8, %c0_9, %c0_10] : memref<1x8x32xbf16, #tpu.memory_space<vmem>>, vector<1x8x8xbf16>
    %13 = vector.shape_cast %12 : vector<1x8x8xbf16> to vector<8x8xbf16>
    %c0_11 = arith.constant 0 : index
    %c0_12 = arith.constant 0 : index
    %c0_13 = arith.constant 0 : index
    %14 = vector.load %arg5[%c0_11, %c0_12, %c0_13] : memref<1x8x32xbf16, #tpu.memory_space<vmem>>, vector<1x8x8xbf16>
    %15 = vector.shape_cast %14 : vector<1x8x8xbf16> to vector<8x8xbf16>
    %cst_14 = arith.constant dense<0.000000e+00> : vector<8x8xf32>
    %16 = tpu.matmul %11, %13, %cst_14 {dimension_numbers = #tpu.dot_dimension_numbers<[1], [1], [0], [0], [0, 0, 1, 0], [], []>} : vector<8x8xbf16>, vector<8x8xbf16>, vector<8x8xf32> -> vector<8x8xf32>
    %cst_15 = arith.constant 0.353553385 : f32
    %17 = vector.broadcast %cst_15 : f32 to vector<8x8xf32>
    %18 = arith.mulf %16, %17 : vector<8x8xf32>
    %19 = vector.broadcast %9 : vector<1x8xf32> to vector<8x8xf32>
    %20 = arith.addf %18, %19 : vector<8x8xf32>
    %c0_16 = arith.constant 0 : index
    %c0_17 = arith.constant 0 : index
    %c0_18 = arith.constant 0 : index
    %21 = vector.load %arg8[%c0_16, %c0_17, %c0_18] : memref<4x8x1xf32, #tpu.memory_space<vmem>>, vector<1x8x1xf32>
    %22 = vector.shape_cast %21 : vector<1x8x1xf32> to vector<8x1xf32>
    %cst_19 = arith.constant dense<0xFF800000> : vector<8xf32>
    %23 = vector.multi_reduction <maximumf>, %20, %cst_19 [1] : vector<8x8xf32> to vector<8xf32>
    %24 = vector.shape_cast %23 : vector<8xf32> to vector<8x1xf32>
    %25 = arith.maximumf %22, %24 : vector<8x1xf32>
    %26 = arith.subf %22, %25 : vector<8x1xf32>
    %27 = math.exp %26 : vector<8x1xf32>
    %28 = vector.broadcast %25 : vector<8x1xf32> to vector<8x8xf32>
    %29 = arith.subf %20, %28 : vector<8x8xf32>
    %30 = math.exp %29 : vector<8x8xf32>
    %c0_20 = arith.constant 0 : index
    %c0_21 = arith.constant 0 : index
    %c0_22 = arith.constant 0 : index
    %31 = vector.load %arg9[%c0_20, %c0_21, %c0_22] : memref<4x8x1xf32, #tpu.memory_space<vmem>>, vector<1x8x1xf32>
    %32 = vector.shape_cast %31 : vector<1x8x1xf32> to vector<8x1xf32>
    %33 = arith.mulf %27, %32 : vector<8x1xf32>
    %cst_23 = arith.constant dense<0.000000e+00> : vector<8xf32>
    %34 = vector.multi_reduction <add>, %30, %cst_23 [1] : vector<8x8xf32> to vector<8xf32>
    %35 = vector.shape_cast %34 : vector<8xf32> to vector<8x1xf32>
    %36 = arith.addf %33, %35 : vector<8x1xf32>
    %c0_24 = arith.constant 0 : index
    %c0_25 = arith.constant 0 : index
    %c0_26 = arith.constant 0 : index
    %37 = vector.load %arg9[%c0_24, %c0_25, %c0_26] : memref<4x8x1xf32, #tpu.memory_space<vmem>>, vector<1x8x1xf32>
    %38 = vector.shape_cast %37 : vector<1x8x1xf32> to vector<8x1xf32>
    %39 = vector.shape_cast %36 : vector<8x1xf32> to vector<1x8x1xf32>
    tpu.vector_store %arg9[%c0_24, %c0_25, %c0_26], %39 {strides = array<i32>} : memref<4x8x1xf32, #tpu.memory_space<vmem>>, vector<1x8x1xf32>,
    %c0_27 = arith.constant 0 : index
    %c0_28 = arith.constant 0 : index
    %c0_29 = arith.constant 0 : index
    %40 = vector.load %arg8[%c0_27, %c0_28, %c0_29] : memref<4x8x1xf32, #tpu.memory_space<vmem>>, vector<1x8x1xf32>
    %41 = vector.shape_cast %40 : vector<1x8x1xf32> to vector<8x1xf32>
    %42 = vector.shape_cast %25 : vector<8x1xf32> to vector<1x8x1xf32>
    tpu.vector_store %arg8[%c0_27, %c0_28, %c0_29], %42 {strides = array<i32>} : memref<4x8x1xf32, #tpu.memory_space<vmem>>, vector<1x8x1xf32>,
    %43 = arith.truncf %30 : vector<8x8xf32> to vector<8x8xbf16>
    %cst_30 = arith.constant dense<0.000000e+00> : vector<8x8xf32>
    %44 = tpu.matmul %43, %15, %cst_30 {dimension_numbers = #tpu.dot_dimension_numbers<[1], [0], [0], [1], [0, 0, 1, 1], [], []>} : vector<8x8xbf16>, vector<8x8xbf16>, vector<8x8xf32> -> vector<8x8xf32>
    %c0_31 = arith.constant 0 : index
    %c0_32 = arith.constant 0 : index
    %45 = vector.load %arg10[%c0_31, %c0_32] : memref<8x32xf32, #tpu.memory_space<vmem>>, vector<8x8xf32>
    %46 = vector.broadcast %27 : vector<8x1xf32> to vector<8x8xf32>
    %47 = arith.mulf %46, %45 : vector<8x8xf32>
    %48 = arith.addf %47, %44 : vector<8x8xf32>
    %c0_33 = arith.constant 0 : index
    %c0_34 = arith.constant 0 : index
    %49 = vector.load %arg10[%c0_33, %c0_34] : memref<8x32xf32, #tpu.memory_space<vmem>>, vector<8x8xf32>
    tpu.vector_store %arg10[%c0_33, %c0_34], %48 {strides = array<i32>} : memref<8x32xf32, #tpu.memory_space<vmem>>, vector<8x8xf32>,
    %c0_35 = arith.constant 0 : index
    %c0_36 = arith.constant 0 : index
    %c8 = arith.constant 8 : index
    %50 = vector.load %arg3[%c0_35, %c0_36, %c8] : memref<1x8x32xbf16, #tpu.memory_space<vmem>>, vector<1x8x8xbf16>
    %51 = vector.shape_cast %50 : vector<1x8x8xbf16> to vector<8x8xbf16>
    %c0_37 = arith.constant 0 : index
    %c0_38 = arith.constant 0 : index
    %c8_39 = arith.constant 8 : index
    %52 = vector.load %arg4[%c0_37, %c0_38, %c8_39] : memref<1x8x32xbf16, #tpu.memory_space<vmem>>, vector<1x8x8xbf16>
    %53 = vector.shape_cast %52 : vector<1x8x8xbf16> to vector<8x8xbf16>
    %c0_40 = arith.constant 0 : index
    %c0_41 = arith.constant 0 : index
    %c8_42 = arith.constant 8 : index
    %54 = vector.load %arg5[%c0_40, %c0_41, %c8_42] : memref<1x8x32xbf16, #tpu.memory_space<vmem>>, vector<1x8x8xbf16>
    %55 = vector.shape_cast %54 : vector<1x8x8xbf16> to vector<8x8xbf16>
    %cst_43 = arith.constant dense<0.000000e+00> : vector<8x8xf32>
    %56 = tpu.matmul %51, %53, %cst_43 {dimension_numbers = #tpu.dot_dimension_numbers<[1], [1], [0], [0], [0, 0, 1, 0], [], []>} : vector<8x8xbf16>, vector<8x8xbf16>, vector<8x8xf32> -> vector<8x8xf32>
    %cst_44 = arith.constant 0.353553385 : f32
    %57 = vector.broadcast %cst_44 : f32 to vector<8x8xf32>
    %58 = arith.mulf %56, %57 : vector<8x8xf32>
    %59 = vector.broadcast %9 : vector<1x8xf32> to vector<8x8xf32>
    %60 = arith.addf %58, %59 : vector<8x8xf32>
    %c1 = arith.constant 1 : index
    %c0_45 = arith.constant 0 : index
    %c0_46 = arith.constant 0 : index
    %61 = vector.load %arg8[%c1, %c0_45, %c0_46] : memref<4x8x1xf32, #tpu.memory_space<vmem>>, vector<1x8x1xf32>
    %62 = vector.shape_cast %61 : vector<1x8x1xf32> to vector<8x1xf32>
    %cst_47 = arith.constant dense<0xFF800000> : vector<8xf32>
    %63 = vector.multi_reduction <maximumf>, %60, %cst_47 [1] : vector<8x8xf32> to vector<8xf32>
    %64 = vector.shape_cast %63 : vector<8xf32> to vector<8x1xf32>
    %65 = arith.maximumf %62, %64 : vector<8x1xf32>
    %66 = arith.subf %62, %65 : vector<8x1xf32>
    %67 = math.exp %66 : vector<8x1xf32>
    %68 = vector.broadcast %65 : vector<8x1xf32> to vector<8x8xf32>
    %69 = arith.subf %60, %68 : vector<8x8xf32>
    %70 = math.exp %69 : vector<8x8xf32>
    %c1_48 = arith.constant 1 : index
    %c0_49 = arith.constant 0 : index
    %c0_50 = arith.constant 0 : index
    %71 = vector.load %arg9[%c1_48, %c0_49, %c0_50] : memref<4x8x1xf32, #tpu.memory_space<vmem>>, vector<1x8x1xf32>
    %72 = vector.shape_cast %71 : vector<1x8x1xf32> to vector<8x1xf32>
    %73 = arith.mulf %67, %72 : vector<8x1xf32>
    %cst_51 = arith.constant dense<0.000000e+00> : vector<8xf32>
    %74 = vector.multi_reduction <add>, %70, %cst_51 [1] : vector<8x8xf32> to vector<8xf32>
    %75 = vector.shape_cast %74 : vector<8xf32> to vector<8x1xf32>
    %76 = arith.addf %73, %75 : vector<8x1xf32>
    %c1_52 = arith.constant 1 : index
    %c0_53 = arith.constant 0 : index
    %c0_54 = arith.constant 0 : index
    %77 = vector.load %arg9[%c1_52, %c0_53, %c0_54] : memref<4x8x1xf32, #tpu.memory_space<vmem>>, vector<1x8x1xf32>
    %78 = vector.shape_cast %77 : vector<1x8x1xf32> to vector<8x1xf32>
    %79 = vector.shape_cast %76 : vector<8x1xf32> to vector<1x8x1xf32>
    tpu.vector_store %arg9[%c1_52, %c0_53, %c0_54], %79 {strides = array<i32>} : memref<4x8x1xf32, #tpu.memory_space<vmem>>, vector<1x8x1xf32>,
    %c1_55 = arith.constant 1 : index
    %c0_56 = arith.constant 0 : index
    %c0_57 = arith.constant 0 : index
    %80 = vector.load %arg8[%c1_55, %c0_56, %c0_57] : memref<4x8x1xf32, #tpu.memory_space<vmem>>, vector<1x8x1xf32>
    %81 = vector.shape_cast %80 : vector<1x8x1xf32> to vector<8x1xf32>
    %82 = vector.shape_cast %65 : vector<8x1xf32> to vector<1x8x1xf32>
    tpu.vector_store %arg8[%c1_55, %c0_56, %c0_57], %82 {strides = array<i32>} : memref<4x8x1xf32, #tpu.memory_space<vmem>>, vector<1x8x1xf32>,
    %83 = arith.truncf %70 : vector<8x8xf32> to vector<8x8xbf16>
    %cst_58 = arith.constant dense<0.000000e+00> : vector<8x8xf32>
    %84 = tpu.matmul %83, %55, %cst_58 {dimension_numbers = #tpu.dot_dimension_numbers<[1], [0], [0], [1], [0, 0, 1, 1], [], []>} : vector<8x8xbf16>, vector<8x8xbf16>, vector<8x8xf32> -> vector<8x8xf32>
    %c0_59 = arith.constant 0 : index
    %c8_60 = arith.constant 8 : index
    %85 = vector.load %arg10[%c0_59, %c8_60] : memref<8x32xf32, #tpu.memory_space<vmem>>, vector<8x8xf32>
    %86 = vector.broadcast %67 : vector<8x1xf32> to vector<8x8xf32>
    %87 = arith.mulf %86, %85 : vector<8x8xf32>
    %88 = arith.addf %87, %84 : vector<8x8xf32>
    %c0_61 = arith.constant 0 : index
    %c8_62 = arith.constant 8 : index
    %89 = vector.load %arg10[%c0_61, %c8_62] : memref<8x32xf32, #tpu.memory_space<vmem>>, vector<8x8xf32>
    tpu.vector_store %arg10[%c0_61, %c8_62], %88 {strides = array<i32>} : memref<8x32xf32, #tpu.memory_space<vmem>>, vector<8x8xf32>,
    %c0_63 = arith.constant 0 : index
    %c0_64 = arith.constant 0 : index
    %c16 = arith.constant 16 : index
    %90 = vector.load %arg3[%c0_63, %c0_64, %c16] : memref<1x8x32xbf16, #tpu.memory_space<vmem>>, vector<1x8x8xbf16>
    %91 = vector.shape_cast %90 : vector<1x8x8xbf16> to vector<8x8xbf16>
    %c0_65 = arith.constant 0 : index
    %c0_66 = arith.constant 0 : index
    %c16_67 = arith.constant 16 : index
    %92 = vector.load %arg4[%c0_65, %c0_66, %c16_67] : memref<1x8x32xbf16, #tpu.memory_space<vmem>>, vector<1x8x8xbf16>
    %93 = vector.shape_cast %92 : vector<1x8x8xbf16> to vector<8x8xbf16>
    %c0_68 = arith.constant 0 : index
    %c0_69 = arith.constant 0 : index
    %c16_70 = arith.constant 16 : index
    %94 = vector.load %arg5[%c0_68, %c0_69, %c16_70] : memref<1x8x32xbf16, #tpu.memory_space<vmem>>, vector<1x8x8xbf16>
    %95 = vector.shape_cast %94 : vector<1x8x8xbf16> to vector<8x8xbf16>
    %cst_71 = arith.constant dense<0.000000e+00> : vector<8x8xf32>
    %96 = tpu.matmul %91, %93, %cst_71 {dimension_numbers = #tpu.dot_dimension_numbers<[1], [1], [0], [0], [0, 0, 1, 0], [], []>} : vector<8x8xbf16>, vector<8x8xbf16>, vector<8x8xf32> -> vector<8x8xf32>
    %cst_72 = arith.constant 0.353553385 : f32
    %97 = vector.broadcast %cst_72 : f32 to vector<8x8xf32>
    %98 = arith.mulf %96, %97 : vector<8x8xf32>
    %99 = vector.broadcast %9 : vector<1x8xf32> to vector<8x8xf32>
    %100 = arith.addf %98, %99 : vector<8x8xf32>
    %c2 = arith.constant 2 : index
    %c0_73 = arith.constant 0 : index
    %c0_74 = arith.constant 0 : index
    %101 = vector.load %arg8[%c2, %c0_73, %c0_74] : memref<4x8x1xf32, #tpu.memory_space<vmem>>, vector<1x8x1xf32>
    %102 = vector.shape_cast %101 : vector<1x8x1xf32> to vector<8x1xf32>
    %cst_75 = arith.constant dense<0xFF800000> : vector<8xf32>
    %103 = vector.multi_reduction <maximumf>, %100, %cst_75 [1] : vector<8x8xf32> to vector<8xf32>
    %104 = vector.shape_cast %103 : vector<8xf32> to vector<8x1xf32>
    %105 = arith.maximumf %102, %104 : vector<8x1xf32>
    %106 = arith.subf %102, %105 : vector<8x1xf32>
    %107 = math.exp %106 : vector<8x1xf32>
    %108 = vector.broadcast %105 : vector<8x1xf32> to vector<8x8xf32>
    %109 = arith.subf %100, %108 : vector<8x8xf32>
    %110 = math.exp %109 : vector<8x8xf32>
    %c2_76 = arith.constant 2 : index
    %c0_77 = arith.constant 0 : index
    %c0_78 = arith.constant 0 : index
    %111 = vector.load %arg9[%c2_76, %c0_77, %c0_78] : memref<4x8x1xf32, #tpu.memory_space<vmem>>, vector<1x8x1xf32>
    %112 = vector.shape_cast %111 : vector<1x8x1xf32> to vector<8x1xf32>
    %113 = arith.mulf %107, %112 : vector<8x1xf32>
    %cst_79 = arith.constant dense<0.000000e+00> : vector<8xf32>
    %114 = vector.multi_reduction <add>, %110, %cst_79 [1] : vector<8x8xf32> to vector<8xf32>
    %115 = vector.shape_cast %114 : vector<8xf32> to vector<8x1xf32>
    %116 = arith.addf %113, %115 : vector<8x1xf32>
    %c2_80 = arith.constant 2 : index
    %c0_81 = arith.constant 0 : index
    %c0_82 = arith.constant 0 : index
    %117 = vector.load %arg9[%c2_80, %c0_81, %c0_82] : memref<4x8x1xf32, #tpu.memory_space<vmem>>, vector<1x8x1xf32>
    %118 = vector.shape_cast %117 : vector<1x8x1xf32> to vector<8x1xf32>
    %119 = vector.shape_cast %116 : vector<8x1xf32> to vector<1x8x1xf32>
    tpu.vector_store %arg9[%c2_80, %c0_81, %c0_82], %119 {strides = array<i32>} : memref<4x8x1xf32, #tpu.memory_space<vmem>>, vector<1x8x1xf32>,
    %c2_83 = arith.constant 2 : index
    %c0_84 = arith.constant 0 : index
    %c0_85 = arith.constant 0 : index
    %120 = vector.load %arg8[%c2_83, %c0_84, %c0_85] : memref<4x8x1xf32, #tpu.memory_space<vmem>>, vector<1x8x1xf32>
    %121 = vector.shape_cast %120 : vector<1x8x1xf32> to vector<8x1xf32>
    %122 = vector.shape_cast %105 : vector<8x1xf32> to vector<1x8x1xf32>
    tpu.vector_store %arg8[%c2_83, %c0_84, %c0_85], %122 {strides = array<i32>} : memref<4x8x1xf32, #tpu.memory_space<vmem>>, vector<1x8x1xf32>,
    %123 = arith.truncf %110 : vector<8x8xf32> to vector<8x8xbf16>
    %cst_86 = arith.constant dense<0.000000e+00> : vector<8x8xf32>
    %124 = tpu.matmul %123, %95, %cst_86 {dimension_numbers = #tpu.dot_dimension_numbers<[1], [0], [0], [1], [0, 0, 1, 1], [], []>} : vector<8x8xbf16>, vector<8x8xbf16>, vector<8x8xf32> -> vector<8x8xf32>
    %c0_87 = arith.constant 0 : index
    %c16_88 = arith.constant 16 : index
    %125 = vector.load %arg10[%c0_87, %c16_88] : memref<8x32xf32, #tpu.memory_space<vmem>>, vector<8x8xf32>
    %126 = vector.broadcast %107 : vector<8x1xf32> to vector<8x8xf32>
    %127 = arith.mulf %126, %125 : vector<8x8xf32>
    %128 = arith.addf %127, %124 : vector<8x8xf32>
    %c0_89 = arith.constant 0 : index
    %c16_90 = arith.constant 16 : index
    %129 = vector.load %arg10[%c0_89, %c16_90] : memref<8x32xf32, #tpu.memory_space<vmem>>, vector<8x8xf32>
    tpu.vector_store %arg10[%c0_89, %c16_90], %128 {strides = array<i32>} : memref<8x32xf32, #tpu.memory_space<vmem>>, vector<8x8xf32>,
    %c0_91 = arith.constant 0 : index
    %c0_92 = arith.constant 0 : index
    %c24 = arith.constant 24 : index
    %130 = vector.load %arg3[%c0_91, %c0_92, %c24] : memref<1x8x32xbf16, #tpu.memory_space<vmem>>, vector<1x8x8xbf16>
    %131 = vector.shape_cast %130 : vector<1x8x8xbf16> to vector<8x8xbf16>
    %c0_93 = arith.constant 0 : index
    %c0_94 = arith.constant 0 : index
    %c24_95 = arith.constant 24 : index
    %132 = vector.load %arg4[%c0_93, %c0_94, %c24_95] : memref<1x8x32xbf16, #tpu.memory_space<vmem>>, vector<1x8x8xbf16>
    %133 = vector.shape_cast %132 : vector<1x8x8xbf16> to vector<8x8xbf16>
    %c0_96 = arith.constant 0 : index
    %c0_97 = arith.constant 0 : index
    %c24_98 = arith.constant 24 : index
    %134 = vector.load %arg5[%c0_96, %c0_97, %c24_98] : memref<1x8x32xbf16, #tpu.memory_space<vmem>>, vector<1x8x8xbf16>
    %135 = vector.shape_cast %134 : vector<1x8x8xbf16> to vector<8x8xbf16>
    %cst_99 = arith.constant dense<0.000000e+00> : vector<8x8xf32>
    %136 = tpu.matmul %131, %133, %cst_99 {dimension_numbers = #tpu.dot_dimension_numbers<[1], [1], [0], [0], [0, 0, 1, 0], [], []>} : vector<8x8xbf16>, vector<8x8xbf16>, vector<8x8xf32> -> vector<8x8xf32>
    %cst_100 = arith.constant 0.353553385 : f32
    %137 = vector.broadcast %cst_100 : f32 to vector<8x8xf32>
    %138 = arith.mulf %136, %137 : vector<8x8xf32>
    %139 = vector.broadcast %9 : vector<1x8xf32> to vector<8x8xf32>
    %140 = arith.addf %138, %139 : vector<8x8xf32>
    %c3 = arith.constant 3 : index
    %c0_101 = arith.constant 0 : index
    %c0_102 = arith.constant 0 : index
    %141 = vector.load %arg8[%c3, %c0_101, %c0_102] : memref<4x8x1xf32, #tpu.memory_space<vmem>>, vector<1x8x1xf32>
    %142 = vector.shape_cast %141 : vector<1x8x1xf32> to vector<8x1xf32>
    %cst_103 = arith.constant dense<0xFF800000> : vector<8xf32>
    %143 = vector.multi_reduction <maximumf>, %140, %cst_103 [1] : vector<8x8xf32> to vector<8xf32>
    %144 = vector.shape_cast %143 : vector<8xf32> to vector<8x1xf32>
    %145 = arith.maximumf %142, %144 : vector<8x1xf32>
    %146 = arith.subf %142, %145 : vector<8x1xf32>
    %147 = math.exp %146 : vector<8x1xf32>
    %148 = vector.broadcast %145 : vector<8x1xf32> to vector<8x8xf32>
    %149 = arith.subf %140, %148 : vector<8x8xf32>
    %150 = math.exp %149 : vector<8x8xf32>
    %c3_104 = arith.constant 3 : index
    %c0_105 = arith.constant 0 : index
    %c0_106 = arith.constant 0 : index
    %151 = vector.load %arg9[%c3_104, %c0_105, %c0_106] : memref<4x8x1xf32, #tpu.memory_space<vmem>>, vector<1x8x1xf32>
    %152 = vector.shape_cast %151 : vector<1x8x1xf32> to vector<8x1xf32>
    %153 = arith.mulf %147, %152 : vector<8x1xf32>
    %cst_107 = arith.constant dense<0.000000e+00> : vector<8xf32>
    %154 = vector.multi_reduction <add>, %150, %cst_107 [1] : vector<8x8xf32> to vector<8xf32>
    %155 = vector.shape_cast %154 : vector<8xf32> to vector<8x1xf32>
    %156 = arith.addf %153, %155 : vector<8x1xf32>
    %c3_108 = arith.constant 3 : index
    %c0_109 = arith.constant 0 : index
    %c0_110 = arith.constant 0 : index
    %157 = vector.load %arg9[%c3_108, %c0_109, %c0_110] : memref<4x8x1xf32, #tpu.memory_space<vmem>>, vector<1x8x1xf32>
    %158 = vector.shape_cast %157 : vector<1x8x1xf32> to vector<8x1xf32>
    %159 = vector.shape_cast %156 : vector<8x1xf32> to vector<1x8x1xf32>
    tpu.vector_store %arg9[%c3_108, %c0_109, %c0_110], %159 {strides = array<i32>} : memref<4x8x1xf32, #tpu.memory_space<vmem>>, vector<1x8x1xf32>,
    %c3_111 = arith.constant 3 : index
    %c0_112 = arith.constant 0 : index
    %c0_113 = arith.constant 0 : index
    %160 = vector.load %arg8[%c3_111, %c0_112, %c0_113] : memref<4x8x1xf32, #tpu.memory_space<vmem>>, vector<1x8x1xf32>
    %161 = vector.shape_cast %160 : vector<1x8x1xf32> to vector<8x1xf32>
    %162 = vector.shape_cast %145 : vector<8x1xf32> to vector<1x8x1xf32>
    tpu.vector_store %arg8[%c3_111, %c0_112, %c0_113], %162 {strides = array<i32>} : memref<4x8x1xf32, #tpu.memory_space<vmem>>, vector<1x8x1xf32>,
    %163 = arith.truncf %150 : vector<8x8xf32> to vector<8x8xbf16>
    %cst_114 = arith.constant dense<0.000000e+00> : vector<8x8xf32>
    %164 = tpu.matmul %163, %135, %cst_114 {dimension_numbers = #tpu.dot_dimension_numbers<[1], [0], [0], [1], [0, 0, 1, 1], [], []>} : vector<8x8xbf16>, vector<8x8xbf16>, vector<8x8xf32> -> vector<8x8xf32>
    %c0_115 = arith.constant 0 : index
    %c24_116 = arith.constant 24 : index
    %165 = vector.load %arg10[%c0_115, %c24_116] : memref<8x32xf32, #tpu.memory_space<vmem>>, vector<8x8xf32>
    %166 = vector.broadcast %147 : vector<8x1xf32> to vector<8x8xf32>
    %167 = arith.mulf %166, %165 : vector<8x8xf32>
    %168 = arith.addf %167, %164 : vector<8x8xf32>
    %c0_117 = arith.constant 0 : index
    %c24_118 = arith.constant 24 : index
    %169 = vector.load %arg10[%c0_117, %c24_118] : memref<8x32xf32, #tpu.memory_space<vmem>>, vector<8x8xf32>
    tpu.vector_store %arg10[%c0_117, %c24_118], %168 {strides = array<i32>} : memref<8x32xf32, #tpu.memory_space<vmem>>, vector<8x8xf32>,
    %c0_i32_119 = arith.constant 0 : i32
    %170 = arith.cmpi eq, %arg2, %c0_i32_119 : i32
    %171 = arith.extui %170 : i1 to i32
    %c0_i32_120 = arith.constant 0 : i32
    %172 = arith.cmpi ne, %171, %c0_i32_120 : i32
    scf.if %172 {
      %c0_121 = arith.constant 0 : index
      %c0_122 = arith.constant 0 : index
      %173 = vector.load %arg10[%c0_121, %c0_122] : memref<8x32xf32, #tpu.memory_space<vmem>>, vector<8x8xf32>
      %c0_123 = arith.constant 0 : index
      %c0_124 = arith.constant 0 : index
      %c0_125 = arith.constant 0 : index
      %174 = vector.load %arg9[%c0_123, %c0_124, %c0_125] : memref<4x8x1xf32, #tpu.memory_space<vmem>>, vector<1x8x1xf32>
      %175 = vector.shape_cast %174 : vector<1x8x1xf32> to vector<8x1xf32>
      %176 = tpu.reciprocal %175 {approx = true} : vector<8x1xf32> -> vector<8x1xf32>
      %177 = vector.broadcast %176 : vector<8x1xf32> to vector<8x8xf32>
      %178 = arith.mulf %173, %177 : vector<8x8xf32>
      %c0_126 = arith.constant 0 : index
      %c0_127 = arith.constant 0 : index
      %179 = vector.load %arg10[%c0_126, %c0_127] : memref<8x32xf32, #tpu.memory_space<vmem>>, vector<8x8xf32>
      tpu.vector_store %arg10[%c0_126, %c0_127], %178 {strides = array<i32>} : memref<8x32xf32, #tpu.memory_space<vmem>>, vector<8x8xf32>,
      %c0_128 = arith.constant 0 : index
      %c8_129 = arith.constant 8 : index
      %180 = vector.load %arg10[%c0_128, %c8_129] : memref<8x32xf32, #tpu.memory_space<vmem>>, vector<8x8xf32>
      %c1_130 = arith.constant 1 : index
      %c0_131 = arith.constant 0 : index
      %c0_132 = arith.constant 0 : index
      %181 = vector.load %arg9[%c1_130, %c0_131, %c0_132] : memref<4x8x1xf32, #tpu.memory_space<vmem>>, vector<1x8x1xf32>
      %182 = vector.shape_cast %181 : vector<1x8x1xf32> to vector<8x1xf32>
      %183 = tpu.reciprocal %182 {approx = true} : vector<8x1xf32> -> vector<8x1xf32>
      %184 = vector.broadcast %183 : vector<8x1xf32> to vector<8x8xf32>
      %185 = arith.mulf %180, %184 : vector<8x8xf32>
      %c0_133 = arith.constant 0 : index
      %c8_134 = arith.constant 8 : index
      %186 = vector.load %arg10[%c0_133, %c8_134] : memref<8x32xf32, #tpu.memory_space<vmem>>, vector<8x8xf32>
      tpu.vector_store %arg10[%c0_133, %c8_134], %185 {strides = array<i32>} : memref<8x32xf32, #tpu.memory_space<vmem>>, vector<8x8xf32>,
      %c0_135 = arith.constant 0 : index
      %c16_136 = arith.constant 16 : index
      %187 = vector.load %arg10[%c0_135, %c16_136] : memref<8x32xf32, #tpu.memory_space<vmem>>, vector<8x8xf32>
      %c2_137 = arith.constant 2 : index
      %c0_138 = arith.constant 0 : index
      %c0_139 = arith.constant 0 : index
      %188 = vector.load %arg9[%c2_137, %c0_138, %c0_139] : memref<4x8x1xf32, #tpu.memory_space<vmem>>, vector<1x8x1xf32>
      %189 = vector.shape_cast %188 : vector<1x8x1xf32> to vector<8x1xf32>
      %190 = tpu.reciprocal %189 {approx = true} : vector<8x1xf32> -> vector<8x1xf32>
      %191 = vector.broadcast %190 : vector<8x1xf32> to vector<8x8xf32>
      %192 = arith.mulf %187, %191 : vector<8x8xf32>
      %c0_140 = arith.constant 0 : index
      %c16_141 = arith.constant 16 : index
      %193 = vector.load %arg10[%c0_140, %c16_141] : memref<8x32xf32, #tpu.memory_space<vmem>>, vector<8x8xf32>
      tpu.vector_store %arg10[%c0_140, %c16_141], %192 {strides = array<i32>} : memref<8x32xf32, #tpu.memory_space<vmem>>, vector<8x8xf32>,
      %c0_142 = arith.constant 0 : index
      %c24_143 = arith.constant 24 : index
      %194 = vector.load %arg10[%c0_142, %c24_143] : memref<8x32xf32, #tpu.memory_space<vmem>>, vector<8x8xf32>
      %c3_144 = arith.constant 3 : index
      %c0_145 = arith.constant 0 : index
      %c0_146 = arith.constant 0 : index
      %195 = vector.load %arg9[%c3_144, %c0_145, %c0_146] : memref<4x8x1xf32, #tpu.memory_space<vmem>>, vector<1x8x1xf32>
      %196 = vector.shape_cast %195 : vector<1x8x1xf32> to vector<8x1xf32>
      %197 = tpu.reciprocal %196 {approx = true} : vector<8x1xf32> -> vector<8x1xf32>
      %198 = vector.broadcast %197 : vector<8x1xf32> to vector<8x8xf32>
      %199 = arith.mulf %194, %198 : vector<8x8xf32>
      %c0_147 = arith.constant 0 : index
      %c24_148 = arith.constant 24 : index
      %200 = vector.load %arg10[%c0_147, %c24_148] : memref<8x32xf32, #tpu.memory_space<vmem>>, vector<8x8xf32>
      tpu.vector_store %arg10[%c0_147, %c24_148], %199 {strides = array<i32>} : memref<8x32xf32, #tpu.memory_space<vmem>>, vector<8x8xf32>,
      %c0_149 = arith.constant 0 : index
      %c0_150 = arith.constant 0 : index
      %201 = vector.load %arg10[%c0_149, %c0_150] : memref<8x32xf32, #tpu.memory_space<vmem>>, vector<8x32xf32>
      %202 = arith.truncf %201 : vector<8x32xf32> to vector<8x32xbf16>
      %c0_151 = arith.constant 0 : index
      %c0_152 = arith.constant 0 : index
      %c0_153 = arith.constant 0 : index
      %203 = vector.load %arg7[%c0_151, %c0_152, %c0_153] : memref<1x8x32xbf16, #tpu.memory_space<vmem>>, vector<1x8x32xbf16>
      %204 = vector.shape_cast %203 : vector<1x8x32xbf16> to vector<8x32xbf16>
      %205 = vector.shape_cast %202 : vector<8x32xbf16> to vector<1x8x32xbf16>
      tpu.vector_store %arg7[%c0_151, %c0_152, %c0_153], %205 {strides = array<i32>} : memref<1x8x32xbf16, #tpu.memory_space<vmem>>, vector<1x8x32xbf16>,
    } else {
    }
    return
  }
  func.func @transform_0(%arg0: i32, %arg1: i32, %arg2: i32) -> (i32, i32, i32) {
    %c0_i32 = arith.constant 0 : i32
    %c0_i32_0 = arith.constant 0 : i32
    return %arg0, %arg1, %c0_i32 : i32, i32, i32
  }
  func.func @transform_1(%arg0: i32, %arg1: i32, %arg2: i32) -> (i32, i32, i32) {
    %c0_i32 = arith.constant 0 : i32
    %c0_i32_0 = arith.constant 0 : i32
    return %arg0, %arg2, %c0_i32 : i32, i32, i32
  }
  func.func @transform_2(%arg0: i32, %arg1: i32, %arg2: i32) -> (i32, i32, i32) {
    %c0_i32 = arith.constant 0 : i32
    %c0_i32_0 = arith.constant 0 : i32
    return %arg0, %arg2, %c0_i32 : i32, i32, i32
  }
  func.func @transform_3(%arg0: i32, %arg1: i32, %arg2: i32) -> (i32, i32, i32) {
    %c0_i32 = arith.constant 0 : i32
    %c0_i32_0 = arith.constant 0 : i32
    return %arg0, %c0_i32, %arg2 : i32, i32, i32
  }
  func.func @transform_4(%arg0: i32, %arg1: i32, %arg2: i32) -> (i32, i32, i32) {
    %c0_i32 = arith.constant 0 : i32
    %c0_i32_0 = arith.constant 0 : i32
    return %arg0, %arg1, %c0_i32 : i32, i32, i32
  }
}

module attributes {stable_mosaic.version = 11 : i64} {
  func.func @_flash_mha_kernel(%arg0: i32, %arg1: i32, %arg2: i32, %arg3: memref<1x8x32xbf16, #tpu.memory_space<vmem>>, %arg4: memref<1x16x32xbf16, #tpu.memory_space<vmem>>, %arg5: memref<1x16x32xbf16, #tpu.memory_space<vmem>>, %arg6: memref<1x8x32xbf16, #tpu.memory_space<vmem>>, %arg7: memref<4x8x1xf32, #tpu.memory_space<vmem>>, %arg8: memref<4x8x1xf32, #tpu.memory_space<vmem>>, %arg9: memref<8x32xf32, #tpu.memory_space<vmem>>) attributes {dimension_semantics = [#tpu.dimension_semantics<parallel>, #tpu.dimension_semantics<parallel>, #tpu.dimension_semantics<arbitrary>], iteration_bounds = array<i64: 2, 1, 1>, scalar_prefetch = 0 : i64, scratch_operands = 3 : i64, tpu.core_type = #tpu.core_type<tc>, window_params = [{transform_indices = @transform_0, window_bounds = array<i64: 1, 8, 32>}, {transform_indices = @transform_1, window_bounds = array<i64: 1, 16, 32>}, {transform_indices = @transform_2, window_bounds = array<i64: 1, 16, 32>}, {transform_indices = @transform_3, window_bounds = array<i64: 1, 8, 32>}]} {
    %c0_i32 = arith.constant 0 : i32
    %0 = arith.cmpi eq, %arg2, %c0_i32 : i32
    %1 = arith.extui %0 : i1 to i32
    %c0_i32_0 = arith.constant 0 : i32
    %2 = arith.cmpi ne, %1, %c0_i32_0 : i32
    scf.if %2 {
      %cst_115 = arith.constant 0xFF800000 : f32
      %158 = vector.broadcast %cst_115 : f32 to vector<4x8x1xf32>
      %c0_116 = arith.constant 0 : index
      %c0_117 = arith.constant 0 : index
      %c0_118 = arith.constant 0 : index
      %159 = vector.load %arg7[%c0_116, %c0_117, %c0_118] : memref<4x8x1xf32, #tpu.memory_space<vmem>>, vector<4x8x1xf32>
      tpu.vector_store %arg7[%c0_116, %c0_117, %c0_118], %158 {strides = array<i32>} : memref<4x8x1xf32, #tpu.memory_space<vmem>>, vector<4x8x1xf32>,
      %cst_119 = arith.constant 0.000000e+00 : f32
      %160 = vector.broadcast %cst_119 : f32 to vector<4x8x1xf32>
      %c0_120 = arith.constant 0 : index
      %c0_121 = arith.constant 0 : index
      %c0_122 = arith.constant 0 : index
      %161 = vector.load %arg8[%c0_120, %c0_121, %c0_122] : memref<4x8x1xf32, #tpu.memory_space<vmem>>, vector<4x8x1xf32>
      tpu.vector_store %arg8[%c0_120, %c0_121, %c0_122], %160 {strides = array<i32>} : memref<4x8x1xf32, #tpu.memory_space<vmem>>, vector<4x8x1xf32>,
      %cst_123 = arith.constant 0.000000e+00 : f32
      %162 = vector.broadcast %cst_123 : f32 to vector<8x32xf32>
      %c0_124 = arith.constant 0 : index
      %c0_125 = arith.constant 0 : index
      %163 = vector.load %arg9[%c0_124, %c0_125] : memref<8x32xf32, #tpu.memory_space<vmem>>, vector<8x32xf32>
      tpu.vector_store %arg9[%c0_124, %c0_125], %162 {strides = array<i32>} : memref<8x32xf32, #tpu.memory_space<vmem>>, vector<8x32xf32>,
    } else {
    }
    %c0 = arith.constant 0 : index
    %c0_1 = arith.constant 0 : index
    %c0_2 = arith.constant 0 : index
    %3 = vector.load %arg3[%c0, %c0_1, %c0_2] : memref<1x8x32xbf16, #tpu.memory_space<vmem>>, vector<1x8x8xbf16>
    %4 = vector.shape_cast %3 : vector<1x8x8xbf16> to vector<8x8xbf16>
    %c0_3 = arith.constant 0 : index
    %c0_4 = arith.constant 0 : index
    %c0_5 = arith.constant 0 : index
    %5 = vector.load %arg4[%c0_3, %c0_4, %c0_5] : memref<1x16x32xbf16, #tpu.memory_space<vmem>>, vector<1x16x8xbf16>
    %6 = vector.shape_cast %5 : vector<1x16x8xbf16> to vector<16x8xbf16>
    %c0_6 = arith.constant 0 : index
    %c0_7 = arith.constant 0 : index
    %c0_8 = arith.constant 0 : index
    %7 = vector.load %arg5[%c0_6, %c0_7, %c0_8] : memref<1x16x32xbf16, #tpu.memory_space<vmem>>, vector<1x16x8xbf16>
    %8 = vector.shape_cast %7 : vector<1x16x8xbf16> to vector<16x8xbf16>
    %cst = arith.constant dense<0.000000e+00> : vector<8x16xf32>
    %9 = tpu.matmul %4, %6, %cst {dimension_numbers = #tpu.dot_dimension_numbers<[1], [1], [0], [0], [0, 0, 1, 0], [], []>} : vector<8x8xbf16>, vector<16x8xbf16>, vector<8x16xf32> -> vector<8x16xf32>
    %cst_9 = arith.constant 0.353553385 : f32
    %10 = vector.broadcast %cst_9 : f32 to vector<8x16xf32>
    %11 = arith.mulf %9, %10 : vector<8x16xf32>
    %c0_10 = arith.constant 0 : index
    %c0_11 = arith.constant 0 : index
    %c0_12 = arith.constant 0 : index
    %12 = vector.load %arg7[%c0_10, %c0_11, %c0_12] : memref<4x8x1xf32, #tpu.memory_space<vmem>>, vector<1x8x1xf32>
    %13 = vector.shape_cast %12 : vector<1x8x1xf32> to vector<8x1xf32>
    %cst_13 = arith.constant dense<0xFF800000> : vector<8xf32>
    %14 = vector.multi_reduction <maximumf>, %11, %cst_13 [1] : vector<8x16xf32> to vector<8xf32>
    %15 = vector.shape_cast %14 : vector<8xf32> to vector<8x1xf32>
    %16 = arith.maximumf %13, %15 : vector<8x1xf32>
    %17 = arith.subf %13, %16 : vector<8x1xf32>
    %18 = math.exp %17 : vector<8x1xf32>
    %19 = vector.broadcast %16 : vector<8x1xf32> to vector<8x16xf32>
    %20 = arith.subf %11, %19 : vector<8x16xf32>
    %21 = math.exp %20 : vector<8x16xf32>
    %c0_14 = arith.constant 0 : index
    %c0_15 = arith.constant 0 : index
    %c0_16 = arith.constant 0 : index
    %22 = vector.load %arg8[%c0_14, %c0_15, %c0_16] : memref<4x8x1xf32, #tpu.memory_space<vmem>>, vector<1x8x1xf32>
    %23 = vector.shape_cast %22 : vector<1x8x1xf32> to vector<8x1xf32>
    %24 = arith.mulf %18, %23 : vector<8x1xf32>
    %cst_17 = arith.constant dense<0.000000e+00> : vector<8xf32>
    %25 = vector.multi_reduction <add>, %21, %cst_17 [1] : vector<8x16xf32> to vector<8xf32>
    %26 = vector.shape_cast %25 : vector<8xf32> to vector<8x1xf32>
    %27 = arith.addf %24, %26 : vector<8x1xf32>
    %c0_18 = arith.constant 0 : index
    %c0_19 = arith.constant 0 : index
    %c0_20 = arith.constant 0 : index
    %28 = vector.load %arg8[%c0_18, %c0_19, %c0_20] : memref<4x8x1xf32, #tpu.memory_space<vmem>>, vector<1x8x1xf32>
    %29 = vector.shape_cast %28 : vector<1x8x1xf32> to vector<8x1xf32>
    %30 = vector.shape_cast %27 : vector<8x1xf32> to vector<1x8x1xf32>
    tpu.vector_store %arg8[%c0_18, %c0_19, %c0_20], %30 {strides = array<i32>} : memref<4x8x1xf32, #tpu.memory_space<vmem>>, vector<1x8x1xf32>,
    %c0_21 = arith.constant 0 : index
    %c0_22 = arith.constant 0 : index
    %c0_23 = arith.constant 0 : index
    %31 = vector.load %arg7[%c0_21, %c0_22, %c0_23] : memref<4x8x1xf32, #tpu.memory_space<vmem>>, vector<1x8x1xf32>
    %32 = vector.shape_cast %31 : vector<1x8x1xf32> to vector<8x1xf32>
    %33 = vector.shape_cast %16 : vector<8x1xf32> to vector<1x8x1xf32>
    tpu.vector_store %arg7[%c0_21, %c0_22, %c0_23], %33 {strides = array<i32>} : memref<4x8x1xf32, #tpu.memory_space<vmem>>, vector<1x8x1xf32>,
    %34 = arith.truncf %21 : vector<8x16xf32> to vector<8x16xbf16>
    %cst_24 = arith.constant dense<0.000000e+00> : vector<8x8xf32>
    %35 = tpu.matmul %34, %8, %cst_24 {dimension_numbers = #tpu.dot_dimension_numbers<[1], [0], [0], [1], [0, 0, 1, 1], [], []>} : vector<8x16xbf16>, vector<16x8xbf16>, vector<8x8xf32> -> vector<8x8xf32>
    %c0_25 = arith.constant 0 : index
    %c0_26 = arith.constant 0 : index
    %36 = vector.load %arg9[%c0_25, %c0_26] : memref<8x32xf32, #tpu.memory_space<vmem>>, vector<8x8xf32>
    %37 = vector.broadcast %18 : vector<8x1xf32> to vector<8x8xf32>
    %38 = arith.mulf %37, %36 : vector<8x8xf32>
    %39 = arith.addf %38, %35 : vector<8x8xf32>
    %c0_27 = arith.constant 0 : index
    %c0_28 = arith.constant 0 : index
    %40 = vector.load %arg9[%c0_27, %c0_28] : memref<8x32xf32, #tpu.memory_space<vmem>>, vector<8x8xf32>
    tpu.vector_store %arg9[%c0_27, %c0_28], %39 {strides = array<i32>} : memref<8x32xf32, #tpu.memory_space<vmem>>, vector<8x8xf32>,
    %c0_29 = arith.constant 0 : index
    %c0_30 = arith.constant 0 : index
    %c8 = arith.constant 8 : index
    %41 = vector.load %arg3[%c0_29, %c0_30, %c8] : memref<1x8x32xbf16, #tpu.memory_space<vmem>>, vector<1x8x8xbf16>
    %42 = vector.shape_cast %41 : vector<1x8x8xbf16> to vector<8x8xbf16>
    %c0_31 = arith.constant 0 : index
    %c0_32 = arith.constant 0 : index
    %c8_33 = arith.constant 8 : index
    %43 = vector.load %arg4[%c0_31, %c0_32, %c8_33] : memref<1x16x32xbf16, #tpu.memory_space<vmem>>, vector<1x16x8xbf16>
    %44 = vector.shape_cast %43 : vector<1x16x8xbf16> to vector<16x8xbf16>
    %c0_34 = arith.constant 0 : index
    %c0_35 = arith.constant 0 : index
    %c8_36 = arith.constant 8 : index
    %45 = vector.load %arg5[%c0_34, %c0_35, %c8_36] : memref<1x16x32xbf16, #tpu.memory_space<vmem>>, vector<1x16x8xbf16>
    %46 = vector.shape_cast %45 : vector<1x16x8xbf16> to vector<16x8xbf16>
    %cst_37 = arith.constant dense<0.000000e+00> : vector<8x16xf32>
    %47 = tpu.matmul %42, %44, %cst_37 {dimension_numbers = #tpu.dot_dimension_numbers<[1], [1], [0], [0], [0, 0, 1, 0], [], []>} : vector<8x8xbf16>, vector<16x8xbf16>, vector<8x16xf32> -> vector<8x16xf32>
    %cst_38 = arith.constant 0.353553385 : f32
    %48 = vector.broadcast %cst_38 : f32 to vector<8x16xf32>
    %49 = arith.mulf %47, %48 : vector<8x16xf32>
    %c1 = arith.constant 1 : index
    %c0_39 = arith.constant 0 : index
    %c0_40 = arith.constant 0 : index
    %50 = vector.load %arg7[%c1, %c0_39, %c0_40] : memref<4x8x1xf32, #tpu.memory_space<vmem>>, vector<1x8x1xf32>
    %51 = vector.shape_cast %50 : vector<1x8x1xf32> to vector<8x1xf32>
    %cst_41 = arith.constant dense<0xFF800000> : vector<8xf32>
    %52 = vector.multi_reduction <maximumf>, %49, %cst_41 [1] : vector<8x16xf32> to vector<8xf32>
    %53 = vector.shape_cast %52 : vector<8xf32> to vector<8x1xf32>
    %54 = arith.maximumf %51, %53 : vector<8x1xf32>
    %55 = arith.subf %51, %54 : vector<8x1xf32>
    %56 = math.exp %55 : vector<8x1xf32>
    %57 = vector.broadcast %54 : vector<8x1xf32> to vector<8x16xf32>
    %58 = arith.subf %49, %57 : vector<8x16xf32>
    %59 = math.exp %58 : vector<8x16xf32>
    %c1_42 = arith.constant 1 : index
    %c0_43 = arith.constant 0 : index
    %c0_44 = arith.constant 0 : index
    %60 = vector.load %arg8[%c1_42, %c0_43, %c0_44] : memref<4x8x1xf32, #tpu.memory_space<vmem>>, vector<1x8x1xf32>
    %61 = vector.shape_cast %60 : vector<1x8x1xf32> to vector<8x1xf32>
    %62 = arith.mulf %56, %61 : vector<8x1xf32>
    %cst_45 = arith.constant dense<0.000000e+00> : vector<8xf32>
    %63 = vector.multi_reduction <add>, %59, %cst_45 [1] : vector<8x16xf32> to vector<8xf32>
    %64 = vector.shape_cast %63 : vector<8xf32> to vector<8x1xf32>
    %65 = arith.addf %62, %64 : vector<8x1xf32>
    %c1_46 = arith.constant 1 : index
    %c0_47 = arith.constant 0 : index
    %c0_48 = arith.constant 0 : index
    %66 = vector.load %arg8[%c1_46, %c0_47, %c0_48] : memref<4x8x1xf32, #tpu.memory_space<vmem>>, vector<1x8x1xf32>
    %67 = vector.shape_cast %66 : vector<1x8x1xf32> to vector<8x1xf32>
    %68 = vector.shape_cast %65 : vector<8x1xf32> to vector<1x8x1xf32>
    tpu.vector_store %arg8[%c1_46, %c0_47, %c0_48], %68 {strides = array<i32>} : memref<4x8x1xf32, #tpu.memory_space<vmem>>, vector<1x8x1xf32>,
    %c1_49 = arith.constant 1 : index
    %c0_50 = arith.constant 0 : index
    %c0_51 = arith.constant 0 : index
    %69 = vector.load %arg7[%c1_49, %c0_50, %c0_51] : memref<4x8x1xf32, #tpu.memory_space<vmem>>, vector<1x8x1xf32>
    %70 = vector.shape_cast %69 : vector<1x8x1xf32> to vector<8x1xf32>
    %71 = vector.shape_cast %54 : vector<8x1xf32> to vector<1x8x1xf32>
    tpu.vector_store %arg7[%c1_49, %c0_50, %c0_51], %71 {strides = array<i32>} : memref<4x8x1xf32, #tpu.memory_space<vmem>>, vector<1x8x1xf32>,
    %72 = arith.truncf %59 : vector<8x16xf32> to vector<8x16xbf16>
    %cst_52 = arith.constant dense<0.000000e+00> : vector<8x8xf32>
    %73 = tpu.matmul %72, %46, %cst_52 {dimension_numbers = #tpu.dot_dimension_numbers<[1], [0], [0], [1], [0, 0, 1, 1], [], []>} : vector<8x16xbf16>, vector<16x8xbf16>, vector<8x8xf32> -> vector<8x8xf32>
    %c0_53 = arith.constant 0 : index
    %c8_54 = arith.constant 8 : index
    %74 = vector.load %arg9[%c0_53, %c8_54] : memref<8x32xf32, #tpu.memory_space<vmem>>, vector<8x8xf32>
    %75 = vector.broadcast %56 : vector<8x1xf32> to vector<8x8xf32>
    %76 = arith.mulf %75, %74 : vector<8x8xf32>
    %77 = arith.addf %76, %73 : vector<8x8xf32>
    %c0_55 = arith.constant 0 : index
    %c8_56 = arith.constant 8 : index
    %78 = vector.load %arg9[%c0_55, %c8_56] : memref<8x32xf32, #tpu.memory_space<vmem>>, vector<8x8xf32>
    tpu.vector_store %arg9[%c0_55, %c8_56], %77 {strides = array<i32>} : memref<8x32xf32, #tpu.memory_space<vmem>>, vector<8x8xf32>,
    %c0_57 = arith.constant 0 : index
    %c0_58 = arith.constant 0 : index
    %c16 = arith.constant 16 : index
    %79 = vector.load %arg3[%c0_57, %c0_58, %c16] : memref<1x8x32xbf16, #tpu.memory_space<vmem>>, vector<1x8x8xbf16>
    %80 = vector.shape_cast %79 : vector<1x8x8xbf16> to vector<8x8xbf16>
    %c0_59 = arith.constant 0 : index
    %c0_60 = arith.constant 0 : index
    %c16_61 = arith.constant 16 : index
    %81 = vector.load %arg4[%c0_59, %c0_60, %c16_61] : memref<1x16x32xbf16, #tpu.memory_space<vmem>>, vector<1x16x8xbf16>
    %82 = vector.shape_cast %81 : vector<1x16x8xbf16> to vector<16x8xbf16>
    %c0_62 = arith.constant 0 : index
    %c0_63 = arith.constant 0 : index
    %c16_64 = arith.constant 16 : index
    %83 = vector.load %arg5[%c0_62, %c0_63, %c16_64] : memref<1x16x32xbf16, #tpu.memory_space<vmem>>, vector<1x16x8xbf16>
    %84 = vector.shape_cast %83 : vector<1x16x8xbf16> to vector<16x8xbf16>
    %cst_65 = arith.constant dense<0.000000e+00> : vector<8x16xf32>
    %85 = tpu.matmul %80, %82, %cst_65 {dimension_numbers = #tpu.dot_dimension_numbers<[1], [1], [0], [0], [0, 0, 1, 0], [], []>} : vector<8x8xbf16>, vector<16x8xbf16>, vector<8x16xf32> -> vector<8x16xf32>
    %cst_66 = arith.constant 0.353553385 : f32
    %86 = vector.broadcast %cst_66 : f32 to vector<8x16xf32>
    %87 = arith.mulf %85, %86 : vector<8x16xf32>
    %c2 = arith.constant 2 : index
    %c0_67 = arith.constant 0 : index
    %c0_68 = arith.constant 0 : index
    %88 = vector.load %arg7[%c2, %c0_67, %c0_68] : memref<4x8x1xf32, #tpu.memory_space<vmem>>, vector<1x8x1xf32>
    %89 = vector.shape_cast %88 : vector<1x8x1xf32> to vector<8x1xf32>
    %cst_69 = arith.constant dense<0xFF800000> : vector<8xf32>
    %90 = vector.multi_reduction <maximumf>, %87, %cst_69 [1] : vector<8x16xf32> to vector<8xf32>
    %91 = vector.shape_cast %90 : vector<8xf32> to vector<8x1xf32>
    %92 = arith.maximumf %89, %91 : vector<8x1xf32>
    %93 = arith.subf %89, %92 : vector<8x1xf32>
    %94 = math.exp %93 : vector<8x1xf32>
    %95 = vector.broadcast %92 : vector<8x1xf32> to vector<8x16xf32>
    %96 = arith.subf %87, %95 : vector<8x16xf32>
    %97 = math.exp %96 : vector<8x16xf32>
    %c2_70 = arith.constant 2 : index
    %c0_71 = arith.constant 0 : index
    %c0_72 = arith.constant 0 : index
    %98 = vector.load %arg8[%c2_70, %c0_71, %c0_72] : memref<4x8x1xf32, #tpu.memory_space<vmem>>, vector<1x8x1xf32>
    %99 = vector.shape_cast %98 : vector<1x8x1xf32> to vector<8x1xf32>
    %100 = arith.mulf %94, %99 : vector<8x1xf32>
    %cst_73 = arith.constant dense<0.000000e+00> : vector<8xf32>
    %101 = vector.multi_reduction <add>, %97, %cst_73 [1] : vector<8x16xf32> to vector<8xf32>
    %102 = vector.shape_cast %101 : vector<8xf32> to vector<8x1xf32>
    %103 = arith.addf %100, %102 : vector<8x1xf32>
    %c2_74 = arith.constant 2 : index
    %c0_75 = arith.constant 0 : index
    %c0_76 = arith.constant 0 : index
    %104 = vector.load %arg8[%c2_74, %c0_75, %c0_76] : memref<4x8x1xf32, #tpu.memory_space<vmem>>, vector<1x8x1xf32>
    %105 = vector.shape_cast %104 : vector<1x8x1xf32> to vector<8x1xf32>
    %106 = vector.shape_cast %103 : vector<8x1xf32> to vector<1x8x1xf32>
    tpu.vector_store %arg8[%c2_74, %c0_75, %c0_76], %106 {strides = array<i32>} : memref<4x8x1xf32, #tpu.memory_space<vmem>>, vector<1x8x1xf32>,
    %c2_77 = arith.constant 2 : index
    %c0_78 = arith.constant 0 : index
    %c0_79 = arith.constant 0 : index
    %107 = vector.load %arg7[%c2_77, %c0_78, %c0_79] : memref<4x8x1xf32, #tpu.memory_space<vmem>>, vector<1x8x1xf32>
    %108 = vector.shape_cast %107 : vector<1x8x1xf32> to vector<8x1xf32>
    %109 = vector.shape_cast %92 : vector<8x1xf32> to vector<1x8x1xf32>
    tpu.vector_store %arg7[%c2_77, %c0_78, %c0_79], %109 {strides = array<i32>} : memref<4x8x1xf32, #tpu.memory_space<vmem>>, vector<1x8x1xf32>,
    %110 = arith.truncf %97 : vector<8x16xf32> to vector<8x16xbf16>
    %cst_80 = arith.constant dense<0.000000e+00> : vector<8x8xf32>
    %111 = tpu.matmul %110, %84, %cst_80 {dimension_numbers = #tpu.dot_dimension_numbers<[1], [0], [0], [1], [0, 0, 1, 1], [], []>} : vector<8x16xbf16>, vector<16x8xbf16>, vector<8x8xf32> -> vector<8x8xf32>
    %c0_81 = arith.constant 0 : index
    %c16_82 = arith.constant 16 : index
    %112 = vector.load %arg9[%c0_81, %c16_82] : memref<8x32xf32, #tpu.memory_space<vmem>>, vector<8x8xf32>
    %113 = vector.broadcast %94 : vector<8x1xf32> to vector<8x8xf32>
    %114 = arith.mulf %113, %112 : vector<8x8xf32>
    %115 = arith.addf %114, %111 : vector<8x8xf32>
    %c0_83 = arith.constant 0 : index
    %c16_84 = arith.constant 16 : index
    %116 = vector.load %arg9[%c0_83, %c16_84] : memref<8x32xf32, #tpu.memory_space<vmem>>, vector<8x8xf32>
    tpu.vector_store %arg9[%c0_83, %c16_84], %115 {strides = array<i32>} : memref<8x32xf32, #tpu.memory_space<vmem>>, vector<8x8xf32>,
    %c0_85 = arith.constant 0 : index
    %c0_86 = arith.constant 0 : index
    %c24 = arith.constant 24 : index
    %117 = vector.load %arg3[%c0_85, %c0_86, %c24] : memref<1x8x32xbf16, #tpu.memory_space<vmem>>, vector<1x8x8xbf16>
    %118 = vector.shape_cast %117 : vector<1x8x8xbf16> to vector<8x8xbf16>
    %c0_87 = arith.constant 0 : index
    %c0_88 = arith.constant 0 : index
    %c24_89 = arith.constant 24 : index
    %119 = vector.load %arg4[%c0_87, %c0_88, %c24_89] : memref<1x16x32xbf16, #tpu.memory_space<vmem>>, vector<1x16x8xbf16>
    %120 = vector.shape_cast %119 : vector<1x16x8xbf16> to vector<16x8xbf16>
    %c0_90 = arith.constant 0 : index
    %c0_91 = arith.constant 0 : index
    %c24_92 = arith.constant 24 : index
    %121 = vector.load %arg5[%c0_90, %c0_91, %c24_92] : memref<1x16x32xbf16, #tpu.memory_space<vmem>>, vector<1x16x8xbf16>
    %122 = vector.shape_cast %121 : vector<1x16x8xbf16> to vector<16x8xbf16>
    %cst_93 = arith.constant dense<0.000000e+00> : vector<8x16xf32>
    %123 = tpu.matmul %118, %120, %cst_93 {dimension_numbers = #tpu.dot_dimension_numbers<[1], [1], [0], [0], [0, 0, 1, 0], [], []>} : vector<8x8xbf16>, vector<16x8xbf16>, vector<8x16xf32> -> vector<8x16xf32>
    %cst_94 = arith.constant 0.353553385 : f32
    %124 = vector.broadcast %cst_94 : f32 to vector<8x16xf32>
    %125 = arith.mulf %123, %124 : vector<8x16xf32>
    %c3 = arith.constant 3 : index
    %c0_95 = arith.constant 0 : index
    %c0_96 = arith.constant 0 : index
    %126 = vector.load %arg7[%c3, %c0_95, %c0_96] : memref<4x8x1xf32, #tpu.memory_space<vmem>>, vector<1x8x1xf32>
    %127 = vector.shape_cast %126 : vector<1x8x1xf32> to vector<8x1xf32>
    %cst_97 = arith.constant dense<0xFF800000> : vector<8xf32>
    %128 = vector.multi_reduction <maximumf>, %125, %cst_97 [1] : vector<8x16xf32> to vector<8xf32>
    %129 = vector.shape_cast %128 : vector<8xf32> to vector<8x1xf32>
    %130 = arith.maximumf %127, %129 : vector<8x1xf32>
    %131 = arith.subf %127, %130 : vector<8x1xf32>
    %132 = math.exp %131 : vector<8x1xf32>
    %133 = vector.broadcast %130 : vector<8x1xf32> to vector<8x16xf32>
    %134 = arith.subf %125, %133 : vector<8x16xf32>
    %135 = math.exp %134 : vector<8x16xf32>
    %c3_98 = arith.constant 3 : index
    %c0_99 = arith.constant 0 : index
    %c0_100 = arith.constant 0 : index
    %136 = vector.load %arg8[%c3_98, %c0_99, %c0_100] : memref<4x8x1xf32, #tpu.memory_space<vmem>>, vector<1x8x1xf32>
    %137 = vector.shape_cast %136 : vector<1x8x1xf32> to vector<8x1xf32>
    %138 = arith.mulf %132, %137 : vector<8x1xf32>
    %cst_101 = arith.constant dense<0.000000e+00> : vector<8xf32>
    %139 = vector.multi_reduction <add>, %135, %cst_101 [1] : vector<8x16xf32> to vector<8xf32>
    %140 = vector.shape_cast %139 : vector<8xf32> to vector<8x1xf32>
    %141 = arith.addf %138, %140 : vector<8x1xf32>
    %c3_102 = arith.constant 3 : index
    %c0_103 = arith.constant 0 : index
    %c0_104 = arith.constant 0 : index
    %142 = vector.load %arg8[%c3_102, %c0_103, %c0_104] : memref<4x8x1xf32, #tpu.memory_space<vmem>>, vector<1x8x1xf32>
    %143 = vector.shape_cast %142 : vector<1x8x1xf32> to vector<8x1xf32>
    %144 = vector.shape_cast %141 : vector<8x1xf32> to vector<1x8x1xf32>
    tpu.vector_store %arg8[%c3_102, %c0_103, %c0_104], %144 {strides = array<i32>} : memref<4x8x1xf32, #tpu.memory_space<vmem>>, vector<1x8x1xf32>,
    %c3_105 = arith.constant 3 : index
    %c0_106 = arith.constant 0 : index
    %c0_107 = arith.constant 0 : index
    %145 = vector.load %arg7[%c3_105, %c0_106, %c0_107] : memref<4x8x1xf32, #tpu.memory_space<vmem>>, vector<1x8x1xf32>
    %146 = vector.shape_cast %145 : vector<1x8x1xf32> to vector<8x1xf32>
    %147 = vector.shape_cast %130 : vector<8x1xf32> to vector<1x8x1xf32>
    tpu.vector_store %arg7[%c3_105, %c0_106, %c0_107], %147 {strides = array<i32>} : memref<4x8x1xf32, #tpu.memory_space<vmem>>, vector<1x8x1xf32>,
    %148 = arith.truncf %135 : vector<8x16xf32> to vector<8x16xbf16>
    %cst_108 = arith.constant dense<0.000000e+00> : vector<8x8xf32>
    %149 = tpu.matmul %148, %122, %cst_108 {dimension_numbers = #tpu.dot_dimension_numbers<[1], [0], [0], [1], [0, 0, 1, 1], [], []>} : vector<8x16xbf16>, vector<16x8xbf16>, vector<8x8xf32> -> vector<8x8xf32>
    %c0_109 = arith.constant 0 : index
    %c24_110 = arith.constant 24 : index
    %150 = vector.load %arg9[%c0_109, %c24_110] : memref<8x32xf32, #tpu.memory_space<vmem>>, vector<8x8xf32>
    %151 = vector.broadcast %132 : vector<8x1xf32> to vector<8x8xf32>
    %152 = arith.mulf %151, %150 : vector<8x8xf32>
    %153 = arith.addf %152, %149 : vector<8x8xf32>
    %c0_111 = arith.constant 0 : index
    %c24_112 = arith.constant 24 : index
    %154 = vector.load %arg9[%c0_111, %c24_112] : memref<8x32xf32, #tpu.memory_space<vmem>>, vector<8x8xf32>
    tpu.vector_store %arg9[%c0_111, %c24_112], %153 {strides = array<i32>} : memref<8x32xf32, #tpu.memory_space<vmem>>, vector<8x8xf32>,
    %c0_i32_113 = arith.constant 0 : i32
    %155 = arith.cmpi eq, %arg2, %c0_i32_113 : i32
    %156 = arith.extui %155 : i1 to i32
    %c0_i32_114 = arith.constant 0 : i32
    %157 = arith.cmpi ne, %156, %c0_i32_114 : i32
    scf.if %157 {
      %c0_115 = arith.constant 0 : index
      %c0_116 = arith.constant 0 : index
      %158 = vector.load %arg9[%c0_115, %c0_116] : memref<8x32xf32, #tpu.memory_space<vmem>>, vector<8x8xf32>
      %c0_117 = arith.constant 0 : index
      %c0_118 = arith.constant 0 : index
      %c0_119 = arith.constant 0 : index
      %159 = vector.load %arg8[%c0_117, %c0_118, %c0_119] : memref<4x8x1xf32, #tpu.memory_space<vmem>>, vector<1x8x1xf32>
      %160 = vector.shape_cast %159 : vector<1x8x1xf32> to vector<8x1xf32>
      %161 = tpu.reciprocal %160 {approx = true} : vector<8x1xf32> -> vector<8x1xf32>
      %162 = vector.broadcast %161 : vector<8x1xf32> to vector<8x8xf32>
      %163 = arith.mulf %158, %162 : vector<8x8xf32>
      %c0_120 = arith.constant 0 : index
      %c0_121 = arith.constant 0 : index
      %164 = vector.load %arg9[%c0_120, %c0_121] : memref<8x32xf32, #tpu.memory_space<vmem>>, vector<8x8xf32>
      tpu.vector_store %arg9[%c0_120, %c0_121], %163 {strides = array<i32>} : memref<8x32xf32, #tpu.memory_space<vmem>>, vector<8x8xf32>,
      %c0_122 = arith.constant 0 : index
      %c8_123 = arith.constant 8 : index
      %165 = vector.load %arg9[%c0_122, %c8_123] : memref<8x32xf32, #tpu.memory_space<vmem>>, vector<8x8xf32>
      %c1_124 = arith.constant 1 : index
      %c0_125 = arith.constant 0 : index
      %c0_126 = arith.constant 0 : index
      %166 = vector.load %arg8[%c1_124, %c0_125, %c0_126] : memref<4x8x1xf32, #tpu.memory_space<vmem>>, vector<1x8x1xf32>
      %167 = vector.shape_cast %166 : vector<1x8x1xf32> to vector<8x1xf32>
      %168 = tpu.reciprocal %167 {approx = true} : vector<8x1xf32> -> vector<8x1xf32>
      %169 = vector.broadcast %168 : vector<8x1xf32> to vector<8x8xf32>
      %170 = arith.mulf %165, %169 : vector<8x8xf32>
      %c0_127 = arith.constant 0 : index
      %c8_128 = arith.constant 8 : index
      %171 = vector.load %arg9[%c0_127, %c8_128] : memref<8x32xf32, #tpu.memory_space<vmem>>, vector<8x8xf32>
      tpu.vector_store %arg9[%c0_127, %c8_128], %170 {strides = array<i32>} : memref<8x32xf32, #tpu.memory_space<vmem>>, vector<8x8xf32>,
      %c0_129 = arith.constant 0 : index
      %c16_130 = arith.constant 16 : index
      %172 = vector.load %arg9[%c0_129, %c16_130] : memref<8x32xf32, #tpu.memory_space<vmem>>, vector<8x8xf32>
      %c2_131 = arith.constant 2 : index
      %c0_132 = arith.constant 0 : index
      %c0_133 = arith.constant 0 : index
      %173 = vector.load %arg8[%c2_131, %c0_132, %c0_133] : memref<4x8x1xf32, #tpu.memory_space<vmem>>, vector<1x8x1xf32>
      %174 = vector.shape_cast %173 : vector<1x8x1xf32> to vector<8x1xf32>
      %175 = tpu.reciprocal %174 {approx = true} : vector<8x1xf32> -> vector<8x1xf32>
      %176 = vector.broadcast %175 : vector<8x1xf32> to vector<8x8xf32>
      %177 = arith.mulf %172, %176 : vector<8x8xf32>
      %c0_134 = arith.constant 0 : index
      %c16_135 = arith.constant 16 : index
      %178 = vector.load %arg9[%c0_134, %c16_135] : memref<8x32xf32, #tpu.memory_space<vmem>>, vector<8x8xf32>
      tpu.vector_store %arg9[%c0_134, %c16_135], %177 {strides = array<i32>} : memref<8x32xf32, #tpu.memory_space<vmem>>, vector<8x8xf32>,
      %c0_136 = arith.constant 0 : index
      %c24_137 = arith.constant 24 : index
      %179 = vector.load %arg9[%c0_136, %c24_137] : memref<8x32xf32, #tpu.memory_space<vmem>>, vector<8x8xf32>
      %c3_138 = arith.constant 3 : index
      %c0_139 = arith.constant 0 : index
      %c0_140 = arith.constant 0 : index
      %180 = vector.load %arg8[%c3_138, %c0_139, %c0_140] : memref<4x8x1xf32, #tpu.memory_space<vmem>>, vector<1x8x1xf32>
      %181 = vector.shape_cast %180 : vector<1x8x1xf32> to vector<8x1xf32>
      %182 = tpu.reciprocal %181 {approx = true} : vector<8x1xf32> -> vector<8x1xf32>
      %183 = vector.broadcast %182 : vector<8x1xf32> to vector<8x8xf32>
      %184 = arith.mulf %179, %183 : vector<8x8xf32>
      %c0_141 = arith.constant 0 : index
      %c24_142 = arith.constant 24 : index
      %185 = vector.load %arg9[%c0_141, %c24_142] : memref<8x32xf32, #tpu.memory_space<vmem>>, vector<8x8xf32>
      tpu.vector_store %arg9[%c0_141, %c24_142], %184 {strides = array<i32>} : memref<8x32xf32, #tpu.memory_space<vmem>>, vector<8x8xf32>,
      %c0_143 = arith.constant 0 : index
      %c0_144 = arith.constant 0 : index
      %186 = vector.load %arg9[%c0_143, %c0_144] : memref<8x32xf32, #tpu.memory_space<vmem>>, vector<8x32xf32>
      %187 = arith.truncf %186 : vector<8x32xf32> to vector<8x32xbf16>
      %c0_145 = arith.constant 0 : index
      %c0_146 = arith.constant 0 : index
      %c0_147 = arith.constant 0 : index
      %188 = vector.load %arg6[%c0_145, %c0_146, %c0_147] : memref<1x8x32xbf16, #tpu.memory_space<vmem>>, vector<1x8x32xbf16>
      %189 = vector.shape_cast %188 : vector<1x8x32xbf16> to vector<8x32xbf16>
      %190 = vector.shape_cast %187 : vector<8x32xbf16> to vector<1x8x32xbf16>
      tpu.vector_store %arg6[%c0_145, %c0_146, %c0_147], %190 {strides = array<i32>} : memref<1x8x32xbf16, #tpu.memory_space<vmem>>, vector<1x8x32xbf16>,
    } else {
    }
    return
  }
  func.func @transform_0(%arg0: i32, %arg1: i32, %arg2: i32) -> (i32, i32, i32) {
    %c0_i32 = arith.constant 0 : i32
    %c0_i32_0 = arith.constant 0 : i32
    return %arg0, %arg1, %c0_i32 : i32, i32, i32
  }
  func.func @transform_1(%arg0: i32, %arg1: i32, %arg2: i32) -> (i32, i32, i32) {
    %c0_i32 = arith.constant 0 : i32
    %c0_i32_0 = arith.constant 0 : i32
    return %arg0, %arg2, %c0_i32 : i32, i32, i32
  }
  func.func @transform_2(%arg0: i32, %arg1: i32, %arg2: i32) -> (i32, i32, i32) {
    %c0_i32 = arith.constant 0 : i32
    %c0_i32_0 = arith.constant 0 : i32
    return %arg0, %arg2, %c0_i32 : i32, i32, i32
  }
  func.func @transform_3(%arg0: i32, %arg1: i32, %arg2: i32) -> (i32, i32, i32) {
    %c0_i32 = arith.constant 0 : i32
    %c0_i32_0 = arith.constant 0 : i32
    return %arg0, %arg1, %c0_i32 : i32, i32, i32
  }
}

module attributes {stable_mosaic.version = 11 : i64} {
  func.func @_linear_kernel(%arg0: i32, %arg1: i32, %arg2: i32, %arg3: memref<32x32xf32, #tpu.memory_space<vmem>>, %arg4: memref<32x64xbf16, #tpu.memory_space<vmem>>, %arg5: memref<1x64xf32, #tpu.memory_space<vmem>>, %arg6: memref<32x64xbf16, #tpu.memory_space<vmem>>, %arg7: memref<32x64xf32, #tpu.memory_space<vmem>>) attributes {dimension_semantics = [#tpu.dimension_semantics<parallel>, #tpu.dimension_semantics<parallel>, #tpu.dimension_semantics<arbitrary>], iteration_bounds = array<i64: 1, 1, 1>, scalar_prefetch = 0 : i64, scratch_operands = 1 : i64, tpu.core_type = #tpu.core_type<tc>, window_params = [{transform_indices = @transform_0, window_bounds = array<i64: 32, 32>}, {transform_indices = @transform_1, window_bounds = array<i64: 32, 64>}, {transform_indices = @transform_2, window_bounds = array<i64: 1, 64>}, {transform_indices = @transform_3, window_bounds = array<i64: 32, 64>}]} {
    %c0_i32 = arith.constant 0 : i32
    %0 = arith.cmpi eq, %arg2, %c0_i32 : i32
    %1 = arith.extui %0 : i1 to i32
    %c0_i32_0 = arith.constant 0 : i32
    %2 = arith.cmpi ne, %1, %c0_i32_0 : i32
    scf.if %2 {
      %cst_10 = arith.constant 0.000000e+00 : f32
      %13 = vector.broadcast %cst_10 : f32 to vector<32x64xf32>
      %c0_11 = arith.constant 0 : index
      %c0_12 = arith.constant 0 : index
      %14 = vector.load %arg7[%c0_11, %c0_12] : memref<32x64xf32, #tpu.memory_space<vmem>>, vector<32x64xf32>
      tpu.vector_store %arg7[%c0_11, %c0_12], %13 {strides = array<i32>} : memref<32x64xf32, #tpu.memory_space<vmem>>, vector<32x64xf32>,
    } else {
    }
    %c0 = arith.constant 0 : index
    %c0_1 = arith.constant 0 : index
    %3 = vector.load %arg7[%c0, %c0_1] : memref<32x64xf32, #tpu.memory_space<vmem>>, vector<32x64xf32>
    %c0_2 = arith.constant 0 : index
    %c0_3 = arith.constant 0 : index
    %4 = vector.load %arg3[%c0_2, %c0_3] : memref<32x32xf32, #tpu.memory_space<vmem>>, vector<32x32xf32>
    %5 = arith.truncf %4 : vector<32x32xf32> to vector<32x32xbf16>
    %c0_4 = arith.constant 0 : index
    %c0_5 = arith.constant 0 : index
    %6 = vector.load %arg4[%c0_4, %c0_5] : memref<32x64xbf16, #tpu.memory_space<vmem>>, vector<32x64xbf16>
    %cst = arith.constant dense<0.000000e+00> : vector<32x64xf32>
    %7 = tpu.matmul %5, %6, %cst {dimension_numbers = #tpu.dot_dimension_numbers<[1], [0], [0], [1], [0, 0, 1, 1], [], []>} : vector<32x32xbf16>, vector<32x64xbf16>, vector<32x64xf32> -> vector<32x64xf32>
    %8 = arith.addf %3, %7 : vector<32x64xf32>
    %c0_6 = arith.constant 0 : index
    %c0_7 = arith.constant 0 : index
    %9 = vector.load %arg7[%c0_6, %c0_7] : memref<32x64xf32, #tpu.memory_space<vmem>>, vector<32x64xf32>
    tpu.vector_store %arg7[%c0_6, %c0_7], %8 {strides = array<i32>} : memref<32x64xf32, #tpu.memory_space<vmem>>, vector<32x64xf32>,
    %c0_i32_8 = arith.constant 0 : i32
    %10 = arith.cmpi eq, %arg2, %c0_i32_8 : i32
    %11 = arith.extui %10 : i1 to i32
    %c0_i32_9 = arith.constant 0 : i32
    %12 = arith.cmpi ne, %11, %c0_i32_9 : i32
    scf.if %12 {
      %c0_10 = arith.constant 0 : index
      %c0_11 = arith.constant 0 : index
      %13 = vector.load %arg7[%c0_10, %c0_11] : memref<32x64xf32, #tpu.memory_space<vmem>>, vector<32x64xf32>
      %c0_12 = arith.constant 0 : index
      %c0_13 = arith.constant 0 : index
      %14 = vector.load %arg5[%c0_12, %c0_13] : memref<1x64xf32, #tpu.memory_space<vmem>>, vector<1x64xf32>
      %15 = vector.broadcast %14 : vector<1x64xf32> to vector<32x64xf32>
      %16 = arith.addf %13, %15 : vector<32x64xf32>
      %17 = arith.truncf %16 : vector<32x64xf32> to vector<32x64xbf16>
      %c0_14 = arith.constant 0 : index
      %c0_15 = arith.constant 0 : index
      %18 = vector.load %arg6[%c0_14, %c0_15] : memref<32x64xbf16, #tpu.memory_space<vmem>>, vector<32x64xbf16>
      tpu.vector_store %arg6[%c0_14, %c0_15], %17 {strides = array<i32>} : memref<32x64xbf16, #tpu.memory_space<vmem>>, vector<32x64xbf16>,
    } else {
    }
    return
  }
  func.func @transform_0(%arg0: i32, %arg1: i32, %arg2: i32) -> (i32, i32) {
    %c0_i32 = arith.constant 0 : i32
    return %arg0, %arg2 : i32, i32
  }
  func.func @transform_1(%arg0: i32, %arg1: i32, %arg2: i32) -> (i32, i32) {
    %c0_i32 = arith.constant 0 : i32
    return %arg2, %arg1 : i32, i32
  }
  func.func @transform_2(%arg0: i32, %arg1: i32, %arg2: i32) -> (i32, i32) {
    %c0_i32 = arith.constant 0 : i32
    %c0_i32_0 = arith.constant 0 : i32
    return %c0_i32, %arg1 : i32, i32
  }
  func.func @transform_3(%arg0: i32, %arg1: i32, %arg2: i32) -> (i32, i32) {
    %c0_i32 = arith.constant 0 : i32
    return %arg0, %arg1 : i32, i32
  }
}

module attributes {stable_mosaic.version = 11 : i64} {
  func.func @_ffn_kernel(%arg0: i32, %arg1: i32, %arg2: memref<16x32xf32, #tpu.memory_space<vmem>>, %arg3: memref<32x64xbf16, #tpu.memory_space<vmem>>, %arg4: memref<1x64xf32, #tpu.memory_space<vmem>>, %arg5: memref<64x32xbf16, #tpu.memory_space<vmem>>, %arg6: memref<1x32xf32, #tpu.memory_space<vmem>>, %arg7: memref<1x32xf32, #tpu.memory_space<vmem>>, %arg8: memref<1x32xf32, #tpu.memory_space<vmem>>, %arg9: memref<16x32xf32, #tpu.memory_space<vmem>>, %arg10: memref<16x32xf32, #tpu.memory_space<vmem>>) attributes {dimension_semantics = [#tpu.dimension_semantics<parallel>, #tpu.dimension_semantics<arbitrary>], iteration_bounds = array<i64: 1, 1>, scalar_prefetch = 0 : i64, scratch_operands = 1 : i64, tpu.core_type = #tpu.core_type<tc>, window_params = [{transform_indices = @transform_0, window_bounds = array<i64: 16, 32>}, {transform_indices = @transform_1, window_bounds = array<i64: 32, 64>}, {transform_indices = @transform_2, window_bounds = array<i64: 1, 64>}, {transform_indices = @transform_3, window_bounds = array<i64: 64, 32>}, {pipeline_mode = #tpu.pipeline_mode<synchronous>, transform_indices = @transform_4, window_bounds = array<i64: 1, 32>}, {pipeline_mode = #tpu.pipeline_mode<synchronous>, transform_indices = @transform_5, window_bounds = array<i64: 1, 32>}, {pipeline_mode = #tpu.pipeline_mode<synchronous>, transform_indices = @transform_6, window_bounds = array<i64: 1, 32>}, {transform_indices = @transform_7, window_bounds = array<i64: 16, 32>}]} {
    %c0_i32 = arith.constant 0 : i32
    %0 = arith.cmpi eq, %arg1, %c0_i32 : i32
    %1 = arith.extui %0 : i1 to i32
    %c0_i32_0 = arith.constant 0 : i32
    %2 = arith.cmpi ne, %1, %c0_i32_0 : i32
    scf.if %2 {
      %cst_16 = arith.constant 0.000000e+00 : f32
      %21 = vector.broadcast %cst_16 : f32 to vector<16x32xf32>
      %c0_17 = arith.constant 0 : index
      %c0_18 = arith.constant 0 : index
      %22 = vector.load %arg10[%c0_17, %c0_18] : memref<16x32xf32, #tpu.memory_space<vmem>>, vector<16x32xf32>
      tpu.vector_store %arg10[%c0_17, %c0_18], %21 {strides = array<i32>} : memref<16x32xf32, #tpu.memory_space<vmem>>, vector<16x32xf32>,
    } else {
    }
    %c0 = arith.constant 0 : index
    %c0_1 = arith.constant 0 : index
    %3 = vector.load %arg2[%c0, %c0_1] : memref<16x32xf32, #tpu.memory_space<vmem>>, vector<16x32xf32>
    %4 = arith.truncf %3 : vector<16x32xf32> to vector<16x32xbf16>
    %c0_2 = arith.constant 0 : index
    %c0_3 = arith.constant 0 : index
    %5 = vector.load %arg3[%c0_2, %c0_3] : memref<32x64xbf16, #tpu.memory_space<vmem>>, vector<32x64xbf16>
    %cst = arith.constant dense<0.000000e+00> : vector<16x64xf32>
    %6 = tpu.matmul %4, %5, %cst {dimension_numbers = #tpu.dot_dimension_numbers<[1], [0], [0], [1], [0, 0, 1, 1], [], []>} : vector<16x32xbf16>, vector<32x64xbf16>, vector<16x64xf32> -> vector<16x64xf32>
    %c0_4 = arith.constant 0 : index
    %c0_5 = arith.constant 0 : index
    %7 = vector.load %arg4[%c0_4, %c0_5] : memref<1x64xf32, #tpu.memory_space<vmem>>, vector<1x64xf32>
    %8 = vector.broadcast %7 : vector<1x64xf32> to vector<16x64xf32>
    %9 = arith.addf %6, %8 : vector<16x64xf32>
    %cst_6 = arith.constant 0.000000e+00 : f32
    %10 = vector.broadcast %cst_6 : f32 to vector<16x64xf32>
    %11 = arith.maximumf %9, %10 : vector<16x64xf32>
    %c0_7 = arith.constant 0 : index
    %c0_8 = arith.constant 0 : index
    %12 = vector.load %arg10[%c0_7, %c0_8] : memref<16x32xf32, #tpu.memory_space<vmem>>, vector<16x32xf32>
    %13 = arith.truncf %11 : vector<16x64xf32> to vector<16x64xbf16>
    %c0_9 = arith.constant 0 : index
    %c0_10 = arith.constant 0 : index
    %14 = vector.load %arg5[%c0_9, %c0_10] : memref<64x32xbf16, #tpu.memory_space<vmem>>, vector<64x32xbf16>
    %cst_11 = arith.constant dense<0.000000e+00> : vector<16x32xf32>
    %15 = tpu.matmul %13, %14, %cst_11 {dimension_numbers = #tpu.dot_dimension_numbers<[1], [0], [0], [1], [0, 0, 1, 1], [], []>} : vector<16x64xbf16>, vector<64x32xbf16>, vector<16x32xf32> -> vector<16x32xf32>
    %16 = arith.addf %12, %15 : vector<16x32xf32>
    %c0_12 = arith.constant 0 : index
    %c0_13 = arith.constant 0 : index
    %17 = vector.load %arg10[%c0_12, %c0_13] : memref<16x32xf32, #tpu.memory_space<vmem>>, vector<16x32xf32>
    tpu.vector_store %arg10[%c0_12, %c0_13], %16 {strides = array<i32>} : memref<16x32xf32, #tpu.memory_space<vmem>>, vector<16x32xf32>,
    %c0_i32_14 = arith.constant 0 : i32
    %18 = arith.cmpi eq, %arg1, %c0_i32_14 : i32
    %19 = arith.extui %18 : i1 to i32
    %c0_i32_15 = arith.constant 0 : i32
    %20 = arith.cmpi ne, %19, %c0_i32_15 : i32
    scf.if %20 {
      %c0_16 = arith.constant 0 : index
      %c0_17 = arith.constant 0 : index
      %21 = vector.load %arg10[%c0_16, %c0_17] : memref<16x32xf32, #tpu.memory_space<vmem>>, vector<16x32xf32>
      %c0_18 = arith.constant 0 : index
      %c0_19 = arith.constant 0 : index
      %22 = vector.load %arg6[%c0_18, %c0_19] : memref<1x32xf32, #tpu.memory_space<vmem>>, vector<1x32xf32>
      %23 = vector.broadcast %22 : vector<1x32xf32> to vector<16x32xf32>
      %24 = arith.addf %21, %23 : vector<16x32xf32>
      %c0_20 = arith.constant 0 : index
      %c0_21 = arith.constant 0 : index
      %25 = vector.load %arg2[%c0_20, %c0_21] : memref<16x32xf32, #tpu.memory_space<vmem>>, vector<16x32xf32>
      %26 = arith.addf %24, %25 : vector<16x32xf32>
      %cst_22 = arith.constant dense<0.000000e+00> : vector<16xf32>
      %27 = vector.multi_reduction <add>, %26, %cst_22 [1] : vector<16x32xf32> to vector<16xf32>
      %28 = vector.shape_cast %27 : vector<16xf32> to vector<16x1xf32>
      %cst_23 = arith.constant 3.200000e+01 : f32
      %29 = vector.broadcast %cst_23 : f32 to vector<16x1xf32>
      %30 = arith.divf %28, %29 : vector<16x1xf32>
      %31 = vector.broadcast %30 : vector<16x1xf32> to vector<16x32xf32>
      %32 = arith.subf %26, %31 : vector<16x32xf32>
      %33 = arith.mulf %32, %32 : vector<16x32xf32>
      %cst_24 = arith.constant dense<0.000000e+00> : vector<16xf32>
      %34 = vector.multi_reduction <add>, %33, %cst_24 [1] : vector<16x32xf32> to vector<16xf32>
      %35 = vector.shape_cast %34 : vector<16xf32> to vector<16x1xf32>
      %cst_25 = arith.constant 3.200000e+01 : f32
      %36 = vector.broadcast %cst_25 : f32 to vector<16x1xf32>
      %37 = arith.divf %35, %36 : vector<16x1xf32>
      %38 = vector.broadcast %30 : vector<16x1xf32> to vector<16x32xf32>
      %39 = arith.subf %26, %38 : vector<16x32xf32>
      %cst_26 = arith.constant 9.99999974E-6 : f32
      %40 = vector.broadcast %cst_26 : f32 to vector<16x1xf32>
      %41 = arith.addf %37, %40 : vector<16x1xf32>
      %42 = math.rsqrt %41 : vector<16x1xf32>
      %43 = vector.broadcast %42 : vector<16x1xf32> to vector<16x32xf32>
      %44 = arith.mulf %39, %43 : vector<16x32xf32>
      %c0_27 = arith.constant 0 : index
      %c0_28 = arith.constant 0 : index
      %45 = vector.load %arg7[%c0_27, %c0_28] : memref<1x32xf32, #tpu.memory_space<vmem>>, vector<1x32xf32>
      %46 = vector.broadcast %45 : vector<1x32xf32> to vector<16x32xf32>
      %47 = arith.mulf %44, %46 : vector<16x32xf32>
      %c0_29 = arith.constant 0 : index
      %c0_30 = arith.constant 0 : index
      %48 = vector.load %arg8[%c0_29, %c0_30] : memref<1x32xf32, #tpu.memory_space<vmem>>, vector<1x32xf32>
      %49 = vector.broadcast %48 : vector<1x32xf32> to vector<16x32xf32>
      %50 = arith.addf %47, %49 : vector<16x32xf32>
      %c0_31 = arith.constant 0 : index
      %c0_32 = arith.constant 0 : index
      %51 = vector.load %arg9[%c0_31, %c0_32] : memref<16x32xf32, #tpu.memory_space<vmem>>, vector<16x32xf32>
      tpu.vector_store %arg9[%c0_31, %c0_32], %50 {strides = array<i32>} : memref<16x32xf32, #tpu.memory_space<vmem>>, vector<16x32xf32>,
    } else {
    }
    return
  }
  func.func @transform_0(%arg0: i32, %arg1: i32) -> (i32, i32) {
    %c0_i32 = arith.constant 0 : i32
    %c0_i32_0 = arith.constant 0 : i32
    return %arg0, %c0_i32 : i32, i32
  }
  func.func @transform_1(%arg0: i32, %arg1: i32) -> (i32, i32) {
    %c0_i32 = arith.constant 0 : i32
    %c0_i32_0 = arith.constant 0 : i32
    return %c0_i32, %arg1 : i32, i32
  }
  func.func @transform_2(%arg0: i32, %arg1: i32) -> (i32, i32) {
    %c0_i32 = arith.constant 0 : i32
    %c0_i32_0 = arith.constant 0 : i32
    return %c0_i32, %arg1 : i32, i32
  }
  func.func @transform_3(%arg0: i32, %arg1: i32) -> (i32, i32) {
    %c0_i32 = arith.constant 0 : i32
    %c0_i32_0 = arith.constant 0 : i32
    return %arg1, %c0_i32 : i32, i32
  }
  func.func @transform_4(%arg0: i32, %arg1: i32) -> (i32, i32) {
    %c0_i32 = arith.constant 0 : i32
    %c0_i32_0 = arith.constant 0 : i32
    %c0_i32_1 = arith.constant 0 : i32
    return %c0_i32, %c0_i32_0 : i32, i32
  }
  func.func @transform_5(%arg0: i32, %arg1: i32) -> (i32, i32) {
    %c0_i32 = arith.constant 0 : i32
    %c0_i32_0 = arith.constant 0 : i32
    %c0_i32_1 = arith.constant 0 : i32
    return %c0_i32, %c0_i32_0 : i32, i32
  }
  func.func @transform_6(%arg0: i32, %arg1: i32) -> (i32, i32) {
    %c0_i32 = arith.constant 0 : i32
    %c0_i32_0 = arith.constant 0 : i32
    %c0_i32_1 = arith.constant 0 : i32
    return %c0_i32, %c0_i32_0 : i32, i32
  }
  func.func @transform_7(%arg0: i32, %arg1: i32) -> (i32, i32) {
    %c0_i32 = arith.constant 0 : i32
    %c0_i32_0 = arith.constant 0 : i32
    return %arg0, %c0_i32 : i32, i32
  }
}

module attributes {stable_mosaic.version = 11 : i64} {
  func.func @_ffn_kernel(%arg0: i32, %arg1: i32, %arg2: memref<16x32xf32, #tpu.memory_space<vmem>>, %arg3: memref<32x64xbf16, #tpu.memory_space<vmem>>, %arg4: memref<1x64xf32, #tpu.memory_space<vmem>>, %arg5: memref<64x32xbf16, #tpu.memory_space<vmem>>, %arg6: memref<1x32xf32, #tpu.memory_space<vmem>>, %arg7: memref<1x32xf32, #tpu.memory_space<vmem>>, %arg8: memref<1x32xf32, #tpu.memory_space<vmem>>, %arg9: memref<16x32xf32, #tpu.memory_space<vmem>>, %arg10: memref<16x32xf32, #tpu.memory_space<vmem>>) attributes {dimension_semantics = [#tpu.dimension_semantics<parallel>, #tpu.dimension_semantics<arbitrary>], iteration_bounds = array<i64: 1, 1>, scalar_prefetch = 0 : i64, scratch_operands = 1 : i64, tpu.core_type = #tpu.core_type<tc>, window_params = [{transform_indices = @transform_0, window_bounds = array<i64: 16, 32>}, {transform_indices = @transform_1, window_bounds = array<i64: 32, 64>}, {transform_indices = @transform_2, window_bounds = array<i64: 1, 64>}, {transform_indices = @transform_3, window_bounds = array<i64: 64, 32>}, {pipeline_mode = #tpu.pipeline_mode<synchronous>, transform_indices = @transform_4, window_bounds = array<i64: 1, 32>}, {pipeline_mode = #tpu.pipeline_mode<synchronous>, transform_indices = @transform_5, window_bounds = array<i64: 1, 32>}, {pipeline_mode = #tpu.pipeline_mode<synchronous>, transform_indices = @transform_6, window_bounds = array<i64: 1, 32>}, {transform_indices = @transform_7, window_bounds = array<i64: 16, 32>}]} {
    %c0_i32 = arith.constant 0 : i32
    %0 = arith.cmpi eq, %arg1, %c0_i32 : i32
    %1 = arith.extui %0 : i1 to i32
    %c0_i32_0 = arith.constant 0 : i32
    %2 = arith.cmpi ne, %1, %c0_i32_0 : i32
    scf.if %2 {
      %cst_16 = arith.constant 0.000000e+00 : f32
      %21 = vector.broadcast %cst_16 : f32 to vector<16x32xf32>
      %c0_17 = arith.constant 0 : index
      %c0_18 = arith.constant 0 : index
      %22 = vector.load %arg10[%c0_17, %c0_18] : memref<16x32xf32, #tpu.memory_space<vmem>>, vector<16x32xf32>
      tpu.vector_store %arg10[%c0_17, %c0_18], %21 {strides = array<i32>} : memref<16x32xf32, #tpu.memory_space<vmem>>, vector<16x32xf32>,
    } else {
    }
    %c0 = arith.constant 0 : index
    %c0_1 = arith.constant 0 : index
    %3 = vector.load %arg2[%c0, %c0_1] : memref<16x32xf32, #tpu.memory_space<vmem>>, vector<16x32xf32>
    %4 = arith.truncf %3 : vector<16x32xf32> to vector<16x32xbf16>
    %c0_2 = arith.constant 0 : index
    %c0_3 = arith.constant 0 : index
    %5 = vector.load %arg3[%c0_2, %c0_3] : memref<32x64xbf16, #tpu.memory_space<vmem>>, vector<32x64xbf16>
    %cst = arith.constant dense<0.000000e+00> : vector<16x64xf32>
    %6 = tpu.matmul %4, %5, %cst {dimension_numbers = #tpu.dot_dimension_numbers<[1], [0], [0], [1], [0, 0, 1, 1], [], []>} : vector<16x32xbf16>, vector<32x64xbf16>, vector<16x64xf32> -> vector<16x64xf32>
    %c0_4 = arith.constant 0 : index
    %c0_5 = arith.constant 0 : index
    %7 = vector.load %arg4[%c0_4, %c0_5] : memref<1x64xf32, #tpu.memory_space<vmem>>, vector<1x64xf32>
    %8 = vector.broadcast %7 : vector<1x64xf32> to vector<16x64xf32>
    %9 = arith.addf %6, %8 : vector<16x64xf32>
    %cst_6 = arith.constant 0.000000e+00 : f32
    %10 = vector.broadcast %cst_6 : f32 to vector<16x64xf32>
    %11 = arith.maximumf %9, %10 : vector<16x64xf32>
    %c0_7 = arith.constant 0 : index
    %c0_8 = arith.constant 0 : index
    %12 = vector.load %arg10[%c0_7, %c0_8] : memref<16x32xf32, #tpu.memory_space<vmem>>, vector<16x32xf32>
    %13 = arith.truncf %11 : vector<16x64xf32> to vector<16x64xbf16>
    %c0_9 = arith.constant 0 : index
    %c0_10 = arith.constant 0 : index
    %14 = vector.load %arg5[%c0_9, %c0_10] : memref<64x32xbf16, #tpu.memory_space<vmem>>, vector<64x32xbf16>
    %cst_11 = arith.constant dense<0.000000e+00> : vector<16x32xf32>
    %15 = tpu.matmul %13, %14, %cst_11 {dimension_numbers = #tpu.dot_dimension_numbers<[1], [0], [0], [1], [0, 0, 1, 1], [], []>} : vector<16x64xbf16>, vector<64x32xbf16>, vector<16x32xf32> -> vector<16x32xf32>
    %16 = arith.addf %12, %15 : vector<16x32xf32>
    %c0_12 = arith.constant 0 : index
    %c0_13 = arith.constant 0 : index
    %17 = vector.load %arg10[%c0_12, %c0_13] : memref<16x32xf32, #tpu.memory_space<vmem>>, vector<16x32xf32>
    tpu.vector_store %arg10[%c0_12, %c0_13], %16 {strides = array<i32>} : memref<16x32xf32, #tpu.memory_space<vmem>>, vector<16x32xf32>,
    %c0_i32_14 = arith.constant 0 : i32
    %18 = arith.cmpi eq, %arg1, %c0_i32_14 : i32
    %19 = arith.extui %18 : i1 to i32
    %c0_i32_15 = arith.constant 0 : i32
    %20 = arith.cmpi ne, %19, %c0_i32_15 : i32
    scf.if %20 {
      %c0_16 = arith.constant 0 : index
      %c0_17 = arith.constant 0 : index
      %21 = vector.load %arg10[%c0_16, %c0_17] : memref<16x32xf32, #tpu.memory_space<vmem>>, vector<16x32xf32>
      %c0_18 = arith.constant 0 : index
      %c0_19 = arith.constant 0 : index
      %22 = vector.load %arg6[%c0_18, %c0_19] : memref<1x32xf32, #tpu.memory_space<vmem>>, vector<1x32xf32>
      %23 = vector.broadcast %22 : vector<1x32xf32> to vector<16x32xf32>
      %24 = arith.addf %21, %23 : vector<16x32xf32>
      %c0_20 = arith.constant 0 : index
      %c0_21 = arith.constant 0 : index
      %25 = vector.load %arg2[%c0_20, %c0_21] : memref<16x32xf32, #tpu.memory_space<vmem>>, vector<16x32xf32>
      %26 = arith.addf %24, %25 : vector<16x32xf32>
      %cst_22 = arith.constant dense<0.000000e+00> : vector<16xf32>
      %27 = vector.multi_reduction <add>, %26, %cst_22 [1] : vector<16x32xf32> to vector<16xf32>
      %28 = vector.shape_cast %27 : vector<16xf32> to vector<16x1xf32>
      %cst_23 = arith.constant 3.200000e+01 : f32
      %29 = vector.broadcast %cst_23 : f32 to vector<16x1xf32>
      %30 = arith.divf %28, %29 : vector<16x1xf32>
      %31 = vector.broadcast %30 : vector<16x1xf32> to vector<16x32xf32>
      %32 = arith.subf %26, %31 : vector<16x32xf32>
      %33 = arith.mulf %32, %32 : vector<16x32xf32>
      %cst_24 = arith.constant dense<0.000000e+00> : vector<16xf32>
      %34 = vector.multi_reduction <add>, %33, %cst_24 [1] : vector<16x32xf32> to vector<16xf32>
      %35 = vector.shape_cast %34 : vector<16xf32> to vector<16x1xf32>
      %cst_25 = arith.constant 3.200000e+01 : f32
      %36 = vector.broadcast %cst_25 : f32 to vector<16x1xf32>
      %37 = arith.divf %35, %36 : vector<16x1xf32>
      %38 = vector.broadcast %30 : vector<16x1xf32> to vector<16x32xf32>
      %39 = arith.subf %26, %38 : vector<16x32xf32>
      %cst_26 = arith.constant 9.99999974E-6 : f32
      %40 = vector.broadcast %cst_26 : f32 to vector<16x1xf32>
      %41 = arith.addf %37, %40 : vector<16x1xf32>
      %42 = math.rsqrt %41 : vector<16x1xf32>
      %43 = vector.broadcast %42 : vector<16x1xf32> to vector<16x32xf32>
      %44 = arith.mulf %39, %43 : vector<16x32xf32>
      %c0_27 = arith.constant 0 : index
      %c0_28 = arith.constant 0 : index
      %45 = vector.load %arg7[%c0_27, %c0_28] : memref<1x32xf32, #tpu.memory_space<vmem>>, vector<1x32xf32>
      %46 = vector.broadcast %45 : vector<1x32xf32> to vector<16x32xf32>
      %47 = arith.mulf %44, %46 : vector<16x32xf32>
      %c0_29 = arith.constant 0 : index
      %c0_30 = arith.constant 0 : index
      %48 = vector.load %arg8[%c0_29, %c0_30] : memref<1x32xf32, #tpu.memory_space<vmem>>, vector<1x32xf32>
      %49 = vector.broadcast %48 : vector<1x32xf32> to vector<16x32xf32>
      %50 = arith.addf %47, %49 : vector<16x32xf32>
      %c0_31 = arith.constant 0 : index
      %c0_32 = arith.constant 0 : index
      %51 = vector.load %arg9[%c0_31, %c0_32] : memref<16x32xf32, #tpu.memory_space<vmem>>, vector<16x32xf32>
      tpu.vector_store %arg9[%c0_31, %c0_32], %50 {strides = array<i32>} : memref<16x32xf32, #tpu.memory_space<vmem>>, vector<16x32xf32>,
    } else {
    }
    return
  }
  func.func @transform_0(%arg0: i32, %arg1: i32) -> (i32, i32) {
    %c0_i32 = arith.constant 0 : i32
    %c0_i32_0 = arith.constant 0 : i32
    return %arg0, %c0_i32 : i32, i32
  }
  func.func @transform_1(%arg0: i32, %arg1: i32) -> (i32, i32) {
    %c0_i32 = arith.constant 0 : i32
    %c0_i32_0 = arith.constant 0 : i32
    return %c0_i32, %arg1 : i32, i32
  }
  func.func @transform_2(%arg0: i32, %arg1: i32) -> (i32, i32) {
    %c0_i32 = arith.constant 0 : i32
    %c0_i32_0 = arith.constant 0 : i32
    return %c0_i32, %arg1 : i32, i32
  }
  func.func @transform_3(%arg0: i32, %arg1: i32) -> (i32, i32) {
    %c0_i32 = arith.constant 0 : i32
    %c0_i32_0 = arith.constant 0 : i32
    return %arg1, %c0_i32 : i32, i32
  }
  func.func @transform_4(%arg0: i32, %arg1: i32) -> (i32, i32) {
    %c0_i32 = arith.constant 0 : i32
    %c0_i32_0 = arith.constant 0 : i32
    %c0_i32_1 = arith.constant 0 : i32
    return %c0_i32, %c0_i32_0 : i32, i32
  }
  func.func @transform_5(%arg0: i32, %arg1: i32) -> (i32, i32) {
    %c0_i32 = arith.constant 0 : i32
    %c0_i32_0 = arith.constant 0 : i32
    %c0_i32_1 = arith.constant 0 : i32
    return %c0_i32, %c0_i32_0 : i32, i32
  }
  func.func @transform_6(%arg0: i32, %arg1: i32) -> (i32, i32) {
    %c0_i32 = arith.constant 0 : i32
    %c0_i32_0 = arith.constant 0 : i32
    %c0_i32_1 = arith.constant 0 : i32
    return %c0_i32, %c0_i32_0 : i32, i32
  }
  func.func @transform_7(%arg0: i32, %arg1: i32) -> (i32, i32) {
    %c0_i32 = arith.constant 0 : i32
    %c0_i32_0 = arith.constant 0 : i32
    return %arg0, %c0_i32 : i32, i32
  }
}

</mosaic_0001>

<bundles_post_ra>
// kernel: text_encoder_forward.16
= control target key start
LH: loop header
LB: loop body
LE: loop exit
PB: predicated region body
PF: predicated region fallthrough
CT: control target
= control target key end

     0   :  { %vm19_vm0 = vcmask 785408   ;;  %v99_v1 = vmov 0.0   ;;  %vm43_vm1 = vcmask 261120   ;;  %vm79_vm2 = vcmask 781312   ;;  %s145_s1 = inlined_call_operand.vmem [shape: bf16[32,96], index: 1, kind: input, shape index: {}]   ;;  %s146_s0 = inlined_call_operand.vmem [shape: f32[16,32], index: 0, kind: input, shape index: {}]   ;;  %s147_s2 = inlined_call_operand.vmem [shape: f32[1,96], index: 2, kind: input, shape index: {}]   ;;  %s148_s3 = inlined_call_operand.vmem [shape: bf16[16,96], index: 3, kind: output, shape index: {}]  }
   0x1   :  { %v96_v0 = vld [vmem:[%s145_s1 + $0x8] sm:$0xff]  ;;  %20 = vst.msk [vmem:[#allocation2] sm:$0xff] %vm19_vm0, %v99_v1  ;;  %v95_v2 = vld [vmem:[%s145_s1] sm:$0xff] }
   0x2   :  { %21 = vst.msk [vmem:[#allocation2 + $0x8] sm:$0xff] %vm19_vm0, %v99_v1  ;;  %53 = vmatpush.bf16.msra.mxu0 %v96_v0  ;;  %v24_v3 = vld [vmem:[%s146_s0] sm:$0xff]  ;;  %v25_v4 = vld [vmem:[%s146_s0 + $0x8] sm:$0xff] }
   0x3   :  { %v26_v5 = vpack.c.bf16 %v25_v4, %v24_v3  ;;  %v98_v10 = vld [vmem:[%s147_s2] ss:$0 sm:$0xff] }
   0x6   :  { %54 = vmatpush.bf16.msra.mxu0 %v95_v2 }
   0x8   :  { %v22_v6 = vld [vmem:[#allocation2] sm:$0xff] }
   0x9   :  { %94 = vmatmul.msk.bf16.vlgmr.msra.gmra.mxu0 %vm43_vm1, %v26_v5  ;;  %v23_v9 = vld [vmem:[#allocation2 + $0x8] sm:$0xff] }
  0x86   :  { %v56_v7 = vpop.f32.mrf.mxu0 }
  0x87   :  { %v61_v8 = vadd.f32 %v56_v7, %v22_v6 }
  0x89   :  { %64 = vst.msk [vmem:[#allocation2] sm:$0xff] %vm19_vm0, %v61_v8 }
  0x8e   :  { %v58_v11 = vpop.f32.mrf.mxu0 }
  0x8f   :  { %v62_v12 = vadd.f32 %v58_v11, %v23_v9 }
  0x90   :  { %v69_v13 = vld [vmem:[#allocation2] sm:$0xff] }
  0x91   :  { %v75_v14 = vadd.f32 %v98_v10, %v69_v13  ;;  %65 = vst.msk [vmem:[#allocation2 + $0x8] sm:$0xff] %vm19_vm0, %v62_v12 }
  0x93   :  { %v77_v15 = vpack.c.bf16 %v75_v14, %v75_v14 }
  0x95   :  { %80 = vst.msk [vmem:[%s148_s3] sm:$0xf] %vm79_vm2, %v77_v15 }
  0x98   :  { %v70_v16 = vld [vmem:[#allocation2 + $0x8] sm:$0xff] }
  0x99   :  { %v76_v17 = vadd.f32 %v98_v10, %v70_v16 }
  0x9b   :  { %v78_v18 = vpack.c.bf16 %v76_v17, %v76_v17 }
  0x9d   :  { %81 = vst.msk [vmem:[%s148_s3 + $0x4] sm:$0xf] %vm79_vm2, %v78_v18 }

// kernel: text_encoder_forward.19
= control target key start
LH: loop header
LB: loop body
LE: loop exit
PB: predicated region body
PF: predicated region fallthrough
CT: control target
= control target key end

     0   :  { %vm19_vm0 = vcmask 261120   ;;  %v98_v1 = vmov 0.0   ;;  %vm78_vm1 = vcmask 257024   ;;  %s145_s1 = inlined_call_operand.vmem [shape: bf16[32,32], index: 1, kind: input, shape index: {}]   ;;  %s146_s0 = inlined_call_operand.vmem [shape: f32[16,32], index: 0, kind: input, shape index: {}]   ;;  %s147_s2 = inlined_call_operand.vmem [shape: f32[1,32], index: 2, kind: input, shape index: {}]   ;;  %s148_s3 = inlined_call_operand.vmem [shape: bf16[16,32], index: 3, kind: output, shape index: {}]  }
   0x1   :  { %v95_v0 = vld [vmem:[%s145_s1 + $0x8] sm:$0xff]  ;;  %20 = vst.msk [vmem:[#allocation2] sm:$0xff] %vm19_vm0, %v98_v1  ;;  %v94_v2 = vld [vmem:[%s145_s1] sm:$0xff] }
   0x2   :  { %21 = vst.msk [vmem:[#allocation2 + $0x8] sm:$0xff] %vm19_vm0, %v98_v1  ;;  %53 = vmatpush.bf16.msra.mxu0 %v95_v0  ;;  %v24_v3 = vld [vmem:[%s146_s0] sm:$0xff]  ;;  %v25_v4 = vld [vmem:[%s146_s0 + $0x8] sm:$0xff] }
   0x3   :  { %v26_v5 = vpack.c.bf16 %v25_v4, %v24_v3  ;;  %v97_v10 = vld [vmem:[%s147_s2] ss:$0 sm:$0xff] }
   0x6   :  { %54 = vmatpush.bf16.msra.mxu0 %v94_v2 }
   0x8   :  { %v22_v6 = vld [vmem:[#allocation2] sm:$0xff] }
   0x9   :  { %93 = vmatmul.msk.bf16.vlgmr.msra.gmra.mxu0 %vm19_vm0, %v26_v5  ;;  %v23_v9 = vld [vmem:[#allocation2 + $0x8] sm:$0xff] }
  0x86   :  { %v56_v7 = vpop.f32.mrf.mxu0 }
  0x87   :  { %v61_v8 = vadd.f32 %v56_v7, %v22_v6 }
  0x89   :  { %63 = vst.msk [vmem:[#allocation2] sm:$0xff] %vm19_vm0, %v61_v8 }
  0x8e   :  { %v58_v11 = vpop.f32.mrf.mxu0 }
  0x8f   :  { %v62_v12 = vadd.f32 %v58_v11, %v23_v9 }
  0x90   :  { %v68_v13 = vld [vmem:[#allocation2] sm:$0xff] }
  0x91   :  { %v74_v14 = vadd.f32 %v97_v10, %v68_v13  ;;  %64 = vst.msk [vmem:[#allocation2 + $0x8] sm:$0xff] %vm19_vm0, %v62_v12 }
  0x93   :  { %v76_v15 = vpack.c.bf16 %v74_v14, %v74_v14 }
  0x95   :  { %79 = vst.msk [vmem:[%s148_s3] sm:$0xf] %vm78_vm1, %v76_v15 }
  0x98   :  { %v69_v16 = vld [vmem:[#allocation2 + $0x8] sm:$0xff] }
  0x99   :  { %v75_v17 = vadd.f32 %v97_v10, %v69_v16 }
  0x9b   :  { %v77_v18 = vpack.c.bf16 %v75_v17, %v75_v17 }
  0x9d   :  { %80 = vst.msk [vmem:[%s148_s3 + $0x4] sm:$0xf] %vm78_vm1, %v77_v18 }

// kernel: text_encoder_forward.18
= control target key start
LH: loop header
LB: loop body
LE: loop exit
PB: predicated region body
PF: predicated region fallthrough
CT: control target
= control target key end

     0   :  { %vm28_vm0 = vcmask 261120   ;;  %v189_v1 = vmov 0.0   ;;  %v190_v21 = vmov 32.0   ;;  %s267_s1 = inlined_call_operand.vmem [shape: bf16[32,32], index: 1, kind: input, shape index: {}]   ;;  %s268_s0 = inlined_call_operand.vmem [shape: bf16[16,32], index: 0, kind: input, shape index: {}]   ;;  %s269_s2 = inlined_call_operand.vmem [shape: f32[1,32], index: 2, kind: input, shape index: {}]   ;;  %s270_s3 = inlined_call_operand.vmem [shape: f32[16,32], index: 3, kind: input, shape index: {}]   ;;  %s271_s4 = inlined_call_operand.vmem [shape: f32[1,32], index: 4, kind: input, shape index: {}]   ;;  %s272_s5 = inlined_call_operand.vmem [shape: f32[1,32], index: 5, kind: input, shape index: {}]   ;;  %s273_s6 = inlined_call_operand.vmem [shape: f32[16,32], index: 6, kind: output, shape index: {}]  }
   0x1   :  { %v177_v0 = vld [vmem:[%s267_s1 + $0x8] sm:$0xff]  ;;  %29 = vst.msk [vmem:[#allocation2] sm:$0xff] %vm28_vm0, %v189_v1  ;;  %v176_v2 = vld [vmem:[%s267_s1] sm:$0xff]  ;;  %183 = vrcp.f32 %v190_v21 }
   0x2   :  { %30 = vst.msk [vmem:[#allocation2 + $0x8] sm:$0xff] %vm28_vm0, %v189_v1  ;;  %66 = vmatpush.bf16.msra.mxu0 %v177_v0  ;;  %v175_v3 = vld [vmem:[%s268_s0] sm:$0xff]  ;;  %v90_v17 = vld [vmem:[%s270_s3 + $0x8] sm:$0xff] }
   0x3   :  { %v180_v8 = vld [vmem:[%s269_s2] ss:$0 sm:$0xff] }
   0x4   :  { %v89_v12 = vld [vmem:[%s270_s3] sm:$0xff] }
   0x5   :  { %v181_v52 = vld [vmem:[%s271_s4] ss:$0 sm:$0xff] }
   0x6   :  { %67 = vmatpush.bf16.msra.mxu0 %v176_v2  ;;  %v182_v55 = vld [vmem:[%s272_s5] ss:$0 sm:$0xff] }
   0x7   :  { %v184_v22 = vpop.eup %183 }
   0x8   :  { %v31_v4 = vld [vmem:[#allocation2] sm:$0xff]  ;;  %v100_v23 = vmul.f32 32.0, %v184_v22  ;;  %vm104_vm1 = vweird.f32 %v184_v22 }
   0x9   :  { %174 = vmatmul.msk.bf16.vlgmr.msra.gmra.mxu0 %vm28_vm0, %v175_v3  ;;  %v32_v7 = vld [vmem:[#allocation2 + $0x8] sm:$0xff] }
   0xa   :  { %v101_v24 = vsub.f32 1.0, %v100_v23 }
   0xc   :  { %v102_v25 = vmul.f32 %v184_v22, %v101_v24 }
   0xe   :  { %v103_v26 = vadd.f32 %v184_v22, %v102_v25 }
  0x10   :  { %v105_v27 = vsel %vm104_vm1, %v184_v22, %v103_v26 }
  0x86   :  { %v69_v5 = vpop.f32.mrf.mxu0 }
  0x87   :  { %v74_v6 = vadd.f32 %v69_v5, %v31_v4 }
  0x89   :  { %76 = vst.msk [vmem:[#allocation2] sm:$0xff] %vm28_vm0, %v74_v6 }
  0x8e   :  { %v71_v9 = vpop.f32.mrf.mxu0 }
  0x8f   :  { %v75_v10 = vadd.f32 %v71_v9, %v32_v7 }
  0x90   :  { %v81_v11 = vld [vmem:[#allocation2] sm:$0xff] }
  0x91   :  { %77 = vst.msk [vmem:[#allocation2 + $0x8] sm:$0xff] %vm28_vm0, %v75_v10  ;;  %v87_v13 = vadd.f32 %v180_v8, %v81_v11 }
  0x93   :  { %v91_v14 = vadd.f32 %v89_v12, %v87_v13 }
  0x95   :  { %v93_v15 = vsel %vm28_vm0, %v91_v14, 0.0 }
  0x96   :  { %94 = vadd.xlane.f32.xlu0 %v93_v15 }
  0x98   :  { %v82_v16 = vld [vmem:[#allocation2 + $0x8] sm:$0xff] }
  0x99   :  { %v88_v18 = vadd.f32 %v180_v8, %v82_v16 }
  0x9b   :  { %v92_v19 = vadd.f32 %v90_v17, %v88_v18 }
  0x9d   :  { %v96_v20 = vsel %vm28_vm0, %v92_v19, 0.0 }
  0x9e   :  { %97 = vadd.xlane.f32.xlu0 %v96_v20 }
 0x109   :  { %v95_v28 = vpop.xlane.xlu0 %94 }
 0x10a   :  { %v106_v29 = vmul.f32 %v105_v27, %v95_v28 }
 0x10c   :  { %v108_v30 = vsub.f32 %v91_v14, %v106_v29 }
 0x10e   :  { %v110_v31 = vmul.f32 %v108_v30, %v108_v30 }
 0x110   :  { %v112_v32 = vsel %vm28_vm0, %v110_v31, 0.0 }
 0x111   :  { %113 = vadd.xlane.f32.xlu1 %v112_v32  ;;  %v98_v33 = vpop.xlane.xlu0 %97 }
 0x112   :  { %v107_v34 = vmul.f32 %v105_v27, %v98_v33 }
 0x114   :  { %v109_v35 = vsub.f32 %v92_v19, %v107_v34 }
 0x116   :  { %v111_v36 = vmul.f32 %v109_v35, %v109_v35 }
 0x118   :  { %v115_v37 = vsel %vm28_vm0, %v111_v36, 0.0 }
 0x119   :  { %116 = vadd.xlane.f32.xlu1 %v115_v37 }
 0x184   :  { %v114_v38 = vpop.xlane.xlu1 %113 }
 0x185   :  { %v118_v39 = vmul.f32 %v114_v38, %v105_v27 }
 0x187   :  { %v120_v40 = vadd.f32 1e-05, %v118_v39 }
 0x189   :  { %185 = vrsqrt.f32 %v120_v40  ;;  %vm128_vm3 = vweird.f32 %v120_v40 }
 0x18c   :  { %v117_v41 = vpop.xlane.xlu1 %116 }
 0x18d   :  { %v119_v42 = vmul.f32 %v117_v41, %v105_v27 }
 0x18f   :  { %v186_v43 = vpop.eup %185  ;;  %v121_v44 = vadd.f32 1e-05, %v119_v42 }
 0x190   :  { %v123_v45 = vmul.f32 %v186_v43, %v120_v40  ;;  %vm129_vm2 = vweird.f32 %v186_v43 }
 0x191   :  { %187 = vrsqrt.f32 %v121_v44  ;;  %vm130_vm4 = vmor %vm128_vm3, %vm129_vm2  ;;  %vm138_vm6 = vweird.f32 %v121_v44 }
 0x192   :  { %v124_v46 = vmul.f32 %v186_v43, %v123_v45 }
 0x194   :  { %v125_v47 = vmul.f32 0.5, %v124_v46 }
 0x196   :  { %v126_v48 = vsub.f32 1.5, %v125_v47 }
 0x197   :  { %v188_v49 = vpop.eup %187 }
 0x198   :  { %v127_v50 = vmul.f32 %v186_v43, %v126_v48  ;;  %v133_v51 = vmul.f32 %v188_v49, %v121_v44  ;;  %vm139_vm5 = vweird.f32 %v188_v49 }
 0x199   :  { %vm140_vm7 = vmor %vm138_vm6, %vm139_vm5 }
 0x19a   :  { %v131_v53 = vsel %vm130_vm4, %v186_v43, %v127_v50  ;;  %v134_v54 = vmul.f32 %v188_v49, %v133_v51 }
 0x19b   :  { %v142_v56 = vmul.f32 %v131_v53, %v108_v30 }
 0x19c   :  { %v135_v57 = vmul.f32 0.5, %v134_v54 }
 0x19d   :  { %v148_v58 = vmul.f32 %v181_v52, %v142_v56 }
 0x19e   :  { %v136_v59 = vsub.f32 1.5, %v135_v57 }
 0x19f   :  { %v154_v60 = vadd.f32 %v182_v55, %v148_v58 }
 0x1a0   :  { %v137_v61 = vmul.f32 %v188_v49, %v136_v59 }
 0x1a1   :  { %156 = vst.msk [vmem:[%s273_s6] sm:$0xff] %vm28_vm0, %v154_v60 }
 0x1a2   :  { %v141_v62 = vsel %vm140_vm7, %v188_v49, %v137_v61 }
 0x1a3   :  { %v143_v63 = vmul.f32 %v141_v62, %v109_v35 }
 0x1a5   :  { %v149_v0 = vmul.f32 %v181_v52, %v143_v63 }
 0x1a7   :  { %v155_v1 = vadd.f32 %v182_v55, %v149_v0 }
 0x1a9   :  { %157 = vst.msk [vmem:[%s273_s6 + $0x8] sm:$0xff] %vm28_vm0, %v155_v1 }

// kernel: text_encoder_forward.17
= control target key start
LH: loop header
LB: loop body
LE: loop exit
PB: predicated region body
PF: predicated region fallthrough
CT: control target
= control target key end

     0   :  { %s1014_s15 = smov 0   ;;  %s1016_s16 = smov 0   ;;  %s1193_s0 = inlined_call_operand.vmem [shape: bf16[2,8,32], index: 0, kind: input, shape index: {}]   ;;  %s1194_s1 = inlined_call_operand.vmem [shape: bf16[2,8,32], index: 1, kind: input, shape index: {}]   ;;  %s1195_s2 = inlined_call_operand.vmem [shape: bf16[2,8,32], index: 2, kind: input, shape index: {}]   ;;  %s1196_s3 = inlined_call_operand.vmem [shape: f32[2,1,8], index: 3, kind: input, shape index: {}]   ;;  %s1197_s4 = inlined_call_operand.vmem [shape: bf16[2,8,32], index: 4, kind: output, shape index: {}]  }
   0x1   :  { %s1018_s17 = smov 0  }
   0x2 LB: > { %s33_s18 = sadd.s32 1, %s974_s16  ;;  %p881_p0 = scmp.ge.s32.totalorder %s978_s17, 1  ;;  %s978_s17 = sphi %s1018_s17, %s14_s17   ;;  %s974_s16 = sphi %s1016_s16, %s1199_s16   ;;  %s970_s15 = sphi %s1014_s15, %s1198_s15  }
   0x3   : > { %p35_p1 = scmp.ge.s32.totalorder %s33_s18, 2  ;;  %p228_p2 = scmp.lt.s32.totalorder %s978_s17, 3 }
   0x5   : > { %s1201_s18 = smov (%p35_p1, %s33_s18), 0  ;;  %p229_p3 = pnand %p881_p0, %p228_p2 }
   0x6   : > { %p278_p4 = scmp.lt.s32.totalorder (!%p229_p3), %s970_s15, 1  ;;  %s983_s29 = smov (!%p229_p3), 120  }
   0x7   : > { %232 = sbr.rel (%p229_p3) target bundleno = 1199 (0x4af), region = 36  ;;  %s984_s30 = smov (!%p229_p3), 112  }
   0x8   : > { %s985_s5 = smov (!%p229_p3), 104   ;;  %s986_s9 = smov (!%p229_p3), 8  }
   0x9   : > { %s987_s10 = smov (!%p229_p3), 16   ;;  %s988_s11 = smov (!%p229_p3), 24  }
   0xc   : > { %s1203_s15 = smov (!%p278_p4, %s970_s15), 1  ;;  %vm334_vm0 = vcmask 64512   ;;  %vm317_vm1 = vcmask 7168   ;;  %v980_v3 = vmov -inf   ;;  %v981_v4 = vmov 0.0  }
   0xd   : > { %s1032_s19 = sshll.u32 %s1203_s15, 2  ;;  %318 = vst.msk [vmem:[#allocation2] sm:$0xff] %vm317_vm1, %v980_v3  ;;  %s304_s28 = scalar_lea.vmem %s1196_s3, %s1203_s15  ;;  %v982_v16 = vmov 0   ;;  %vm388_vm3 = vcmask 1043456   ;;  %vm326_vm4 = vcmask 261120   ;;  %vm511_vm5 = vcmask 130112  }
   0xe   : > { %s1038_s22 = scalar_lea.vmem %s1194_s1, %s1032_s19  ;;  %s1046_s25 = scalar_lea.vmem %s1193_s0, %s1032_s19  ;;  %319 = vst.msk [vmem:[#allocation2 + $0x8] sm:$0xff] %vm317_vm1, %v980_v3  ;;  %v328_v5 = vld [vmem:[%s304_s28] sm:$0x1]  ;;  %929 = vset.pattern.permute.xlu1 %v982_v16  ;;  %930 = vset.pattern.permute.xlu2 %v982_v16  ;;  %vm610_vm6 = vcmask 195712   ;;  %vm709_vm7 = vcmask 261312   ;;  %vm756_vm8 = vcmask 257024  }
   0xf   : > { %v332_v0 = vld [vmem:[%s1038_s22] sm:$0xf]  ;;  %320 = vst.msk [vmem:[#allocation2 + $0x10] sm:$0xff] %vm317_vm1, %v980_v3  ;;  %vm329_vm2 = vcmp.gt.f32.partialorder %v328_v5, 0.5  ;;  %931 = vset.pattern.permute.xlu0 %v982_v16  ;;  %s1097_s8 = scalar_lea.vmem %s1195_s2, %s1032_s19  ;;  %s311_s14 = scalar_lea.vmem %s1197_s4, %s1032_s19 }
  0x10   : > { %v339_v1 = vsel %vm334_vm0, %v332_v0, 0  ;;  %v331_v2 = vld [vmem:[%s1046_s25] sm:$0xf]  ;;  %321 = vst.msk [vmem:[#allocation2 + $0x18] sm:$0xff] %vm317_vm1, %v980_v3  ;;  %v330_v6 = vsel %vm329_vm2, -1e+09, %v981_v4 }
  0x11   : > { %348 = vmatpush.bf16.xpose.msra.mxu0 %v339_v1  ;;  %322 = vst.msk [vmem:[#allocation3] sm:$0xff] %vm317_vm1, %v981_v4  ;;  %v1066_v7 = vperm.slane %v330_v6, 0  ;;  %v415_v13 = vld [vmem:[%s1038_s22] sm:$0xf] }
  0x12   : > { %323 = vst.msk [vmem:[#allocation3 + $0x8] sm:$0xff] %vm317_vm1, %v981_v4  ;;  %v423_v14 = vunpack.c.l.b16 %v415_v13  ;;  %v514_v17 = vld [vmem:[%s1038_s22] sm:$0xf] }
  0x13   : > { %324 = vst.msk [vmem:[#allocation3 + $0x10] sm:$0xff] %vm317_vm1, %v981_v4  ;;  %v522_v18 = vunpack.c.l.b16 %v514_v17  ;;  %v513_v19 = vld [vmem:[%s1046_s25] sm:$0xf] }
  0x14   : > { %325 = vst.msk [vmem:[#allocation3 + $0x18] sm:$0xff] %vm317_vm1, %v981_v4  ;;  %v424_v15 = vpack.c.b16 %v423_v14, %v423_v14  ;;  %v517_v21 = vunpack.c.l.b16 %v513_v19  ;;  %v612_v23 = vld [vmem:[%s1046_s25] sm:$0xf] }
  0x15   : > { %v523_v20 = vpack.c.b16 %v522_v18, %v522_v18  ;;  %v1076_v24 = vld [vmem:[#allocation2] sm:$0xff]  ;;  %v616_v27 = vunpack.c.l.b16 %v612_v23  ;;  %327 = vst.msk [vmem:[#allocation4] sm:$0xff] %vm326_vm4, %v981_v4 }
  0x16   : > { %v518_v22 = vpack.c.b16 %v517_v21, %v517_v21  ;;  %v414_v26 = vld [vmem:[%s1046_s25] sm:$0xf]  ;;  %v548_v21 = vld [vmem:[#allocation2 + $0x10] sm:$0xff] }
  0x17   : > { %524 = vrot.lane.b32.xlu2 %v523_v20, %s984_s30  ;;  %v418_v30 = vunpack.c.l.b16 %v414_v26  ;;  %v617_v31 = vpack.c.b16 %v616_v27, %v616_v27  ;;  %v613_v33 = vld [vmem:[%s1038_s22] sm:$0xf] }
  0x18   : > { %886 = vmatmul.msk.bf16.vlgmr.msra.gmra.mxu0 %vm334_vm0, %v331_v2  ;;  %v621_v34 = vunpack.c.l.b16 %v613_v33  ;;  %v333_v38 = vld [vmem:[%s1097_s8] sm:$0xf] }
  0x19   : > { %v419_v32 = vpack.c.b16 %v418_v30, %v418_v30  ;;  %v390_v39 = vsel %vm388_vm3, %v333_v38, 0  ;;  %v416_v5 = vld [vmem:[%s1097_s8] sm:$0xf] }
  0x1a   : > { %v622_v35 = vpack.c.b16 %v621_v34, %v621_v34  ;;  %399 = vmatpush.bf16.msra.mxu1 %v390_v39  ;;  %v614_v16 = vld [vmem:[%s1097_s8] sm:$0xf] }
  0x1b   : > { %v674_v19 = vunpack.c.l.b16 %v614_v16 }
  0x1c   : > { %v405_v4 = vld [vmem:[#allocation4] sm:$0xff] }
  0x1d   : > { %v675_v23 = vpack.c.b16 %v674_v19, %v674_v19 }
  0x1f   : > { %519 = vrot.lane.b32.xlu2 %v518_v22, %s984_s30 }
  0x27   : > { %618 = vrot.lane.b32.xlu2 %v617_v31, %s985_s5 }
  0x71   : > { %v525_v40 = vpop.permute.xlu2 %524 }
  0x72   : > { %v530_v41 = vsel %vm334_vm0, %v525_v40, 0 }
  0x73   : > { %539 = vmatpush.bf16.xpose.msrb.mxu1 %v530_v41 }
  0x79   : > { %v520_v48 = vpop.permute.xlu2 %519 }
  0x81   : > { %v619_v51 = vpop.permute.xlu2 %618 }
  0x95   : > { %v350_v8 = vpop.f32.mrf.mxu0 }
  0x96   : > { %v354_v9 = vmul.f32 0.35355338, %v350_v8  ;;  %v476_v8 = vunpack.c.l.b16 %v416_v5 }
  0x98   : > { %v358_v10 = vadd.f32 %v1066_v7, %v354_v9  ;;  %v477_v9 = vpack.c.b16 %v476_v8, %v476_v8 }
  0x9a   : > { %v360_v11 = vsel %vm334_vm0, %v358_v10, -inf }
  0x9b   : > { %361 = vmax.xlane.f32.xlu0 %v360_v11 }
  0x9d   : > { %v352_v12 = vpop.f32.mrf.mxu0 }
  0x9e   : > { %v515_v12 = vld [vmem:[%s1097_s8] sm:$0xf] }
  0xaf   : > { %425 = vrot.lane.b32.xlu0 %v424_v15, %s983_s29  ;;  %v1132_v15 = vld [vmem:[#allocation2 + $0x18] sm:$0xff] }
 0x10e   : > { %v362_v25 = vpop.xlane.xlu0 %361 }
 0x10f   : > { %v1081_v28 = vmax.f32 %v1076_v24, %v362_v25 }
 0x111   : > { %v364_v29 = vsub.f32 %v1076_v24, %v1081_v28  ;;  %383 = vst.msk [vmem:[#allocation2] sm:$0xff] %vm317_vm1, %v1081_v28  ;;  %369 = vperm.xlu1 %929, %v1081_v28  }
 0x113   : > { %v365_v25 = vmul.f32 1.442695, %v364_v29 }
 0x119   : > { %420 = vrot.lane.b32.xlu1 %v419_v32, %s983_s29 }
 0x121   : > { %623 = vrot.lane.b32.xlu1 %v622_v35, %s985_s5  ;;  %v426_v36 = vpop.permute.xlu0 %425 }
 0x122   : > { %v431_v37 = vsel %vm334_vm0, %v426_v36, 0 }
 0x123   : > { %440 = vmatpush.bf16.xpose.msra.mxu2 %v431_v37 }
 0x183   : > { %v370_v42 = vpop.permute.xlu1 %369 }
 0x184   : > { %v372_v43 = vsub.f32 %v358_v10, %v370_v42  ;;  %v449_v10 = vld [vmem:[#allocation2 + $0x8] sm:$0xff] }
 0x186   : > { %v373_v44 = vmul.f32 1.442695, %v372_v43 }
 0x188   : > { %932 = vpow2.f32 %v373_v44 }
 0x189   : > { %934 = vpow2.f32 %v365_v25 }
 0x18b   : > { %v421_v45 = vpop.permute.xlu1 %420 }
 0x18c   : > { %888 = vmatmul.msk.bf16.vlgmr.msra.gmra.mxu2 %vm334_vm0, %v421_v45 }
 0x18e   : > { %v1103_v46 = vpop.eup %932 }
 0x18f   : > { %v384_v47 = vpack.c.bf16 %v1103_v46, %v1103_v46  ;;  %v935_v32 = vpop.eup %934  ;;  %v377_v34 = vsel %vm334_vm0, %v1103_v46, 0.0 }
 0x191   : > { %887 = vmatmul.msk.bf16.vlgmr.msra.gmra.mxu1 %vm334_vm0, %v384_v47 }
 0x193   : > { %v624_v49 = vpop.permute.xlu1 %623 }
 0x194   : > { %v629_v50 = vsel %vm334_vm0, %v624_v49, 0 }
 0x195   : > { %638 = vmatpush.bf16.xpose.msrb.mxu0 %v629_v50 }
 0x19c   : > { %892 = vmatmul.msk.bf16.vlgmr.msrb.gmra.mxu0 %vm334_vm0, %v619_v51 }
 0x1a1   : > { %890 = vmatmul.msk.bf16.vlgmr.msrb.gmra.mxu1 %vm334_vm0, %v520_v48 }
 0x20e   : > { %v1111_v52 = vpop.f32.mrf.mxu1 }
 0x20f   : > { %v442_v53 = vpop.f32.mrf.mxu2 }
 0x210   : > { %v446_v54 = vmul.f32 0.35355338, %v442_v53 }
 0x212   : > { %v1114_v55 = vadd.f32 %v446_v54, %v1066_v7 }
 0x214   : > { %v450_v56 = vsel %vm334_vm0, %v1114_v55, -inf }
 0x215   : > { %451 = vmax.xlane.f32.xlu1 %v450_v56 }
 0x216   : > { %v403_v57 = vpop.f32.mrf.mxu1 }
 0x217   : > { %v444_v58 = vpop.f32.mrf.mxu2 }
 0x219   : > { %v640_v59 = vpop.f32.mrf.mxu0 }
 0x21a   : > { %v644_v60 = vmul.f32 0.35355338, %v640_v59 }
 0x21c   : > { %v1119_v61 = vadd.f32 %v644_v60, %v1066_v7  ;;  %v375_v60 = vld [vmem:[#allocation3] sm:$0xff] }
 0x21e   : > { %v541_v62 = vpop.f32.mrf.mxu1  ;;  %v648_v63 = vsel %vm334_vm0, %v1119_v61, -inf }
 0x21f   : > { %v545_v0 = vmul.f32 0.35355338, %v541_v62  ;;  %649 = vmax.xlane.f32.xlu0 %v648_v63 }
 0x221   : > { %v1124_v1 = vadd.f32 %v545_v0, %v1066_v7  ;;  %v642_v2 = vpop.f32.mrf.mxu0  ;;  %v575_v7 = vunpack.c.l.b16 %v515_v12  ;;  %v664_v12 = vld [vmem:[#allocation3 + $0x18] sm:$0xff] }
 0x222   : > { %v466_v2 = vld [vmem:[#allocation3 + $0x8] sm:$0xff] }
 0x223   : > { %v549_v3 = vsel %vm334_vm0, %v1124_v1, -inf  ;;  %v576_v14 = vpack.c.b16 %v575_v7, %v575_v7 }
 0x224   : > { %550 = vmax.xlane.f32.xlu2 %v549_v3 }
 0x226   : > { %v543_v6 = vpop.f32.mrf.mxu1 }
 0x22e   : > { %478 = vrot.lane.b32.xlu1 %v477_v9, %s983_s29 }
 0x288   : > { %v452_v11 = vpop.xlane.xlu1 %451 }
 0x289   : > { %v453_v13 = vmax.f32 %v449_v10, %v452_v11 }
 0x28b   : > { %473 = vst.msk [vmem:[#allocation2 + $0x8] sm:$0xff] %vm317_vm1, %v453_v13  ;;  %459 = vperm.xlu2 %930, %v453_v13   ;;  %v454_v30 = vsub.f32 %v449_v10, %v453_v13 }
 0x28d   : > { %v455_v31 = vmul.f32 1.442695, %v454_v30 }
 0x28f   : > { %936 = vpow2.f32 %v455_v31 }
 0x292   : > { %v650_v17 = vpop.xlane.xlu0 %649 }
 0x293   : > { %v1136_v18 = vmax.f32 %v1132_v15, %v650_v17  ;;  %577 = vrot.lane.b32.xlu2 %v576_v14, %s984_s30 }
 0x295   : > { %v652_v20 = vsub.f32 %v1132_v15, %v1136_v18  ;;  %671 = vst.msk [vmem:[#allocation2 + $0x18] sm:$0xff] %vm317_vm1, %v1136_v18  ;;  %657 = vperm.xlu1 %929, %v1136_v18   ;;  %v937_v33 = vpop.eup %936 }
 0x296   : > { %v467_v3 = vmul.f32 %v937_v33, %v466_v2 }
 0x297   : > { %v551_v22 = vpop.xlane.xlu2 %550  ;;  %v653_v9 = vmul.f32 1.442695, %v652_v20 }
 0x298   : > { %v552_v26 = vmax.f32 %v548_v21, %v551_v22 }
 0x29a   : > { %v553_v27 = vsub.f32 %v548_v21, %v552_v26  ;;  %572 = vst.msk [vmem:[#allocation2 + $0x10] sm:$0xff] %vm317_vm1, %v552_v26  ;;  %558 = vperm.xlu0 %931, %v552_v26  }
 0x29b   : > { %676 = vrot.lane.b32.xlu2 %v675_v23, %s985_s5 }
 0x29c   : > { %v554_v58 = vmul.f32 1.442695, %v553_v27 }
 0x2a0   : > { %v479_v24 = vpop.permute.xlu1 %478 }
 0x2a1   : > { %v484_v28 = vsel %vm388_vm3, %v479_v24, 0  ;;  %v565_v24 = vld [vmem:[#allocation3 + $0x10] sm:$0xff] }
 0x2a2   : > { %493 = vmatpush.bf16.msra.mxu3 %v484_v28 }
 0x2a3   : > { %408 = vperm.xlu2 %930, %v935_v32  }
 0x2ab   : > { %502 = vperm.xlu2 %930, %v937_v33  }
 0x2bf   : > { %378 = vadd.xlane.f32.xlu1 %v377_v34 }
 0x2e5   : > { %v460_v29 = vpop.permute.xlu2 %459 }
 0x2e6   : > { %v462_v35 = vsub.f32 %v1114_v55, %v460_v29 }
 0x2e8   : > { %v463_v36 = vmul.f32 1.442695, %v462_v35 }
 0x2ea   : > { %938 = vpow2.f32 %v463_v36 }
 0x2ed   : > { %v578_v37 = vpop.permute.xlu2 %577 }
 0x2ee   : > { %v583_v42 = vsel %vm388_vm3, %v578_v37, 0 }
 0x2ef   : > { %592 = vmatpush.bf16.msrb.mxu3 %v583_v42 }
 0x2f0   : > { %v939_v38 = vpop.eup %938 }
 0x2f1   : > { %v468_v39 = vsel %vm334_vm0, %v939_v38, 0.0  ;;  %v474_v40 = vpack.c.bf16 %v939_v38, %v939_v38 }
 0x2f2   : > { %469 = vadd.xlane.f32.xlu0 %v468_v39 }
 0x2f3   : > { %889 = vmatmul.msk.bf16.vlgmr.msra.gmra.mxu3 %vm334_vm0, %v474_v40 }
 0x2f5   : > { %v677_v41 = vpop.permute.xlu2 %676 }
 0x2f6   : > { %v682_v43 = vsel %vm388_vm3, %v677_v41, 0 }
 0x2f7   : > { %691 = vmatpush.bf16.msrb.mxu2 %v682_v43 }
 0x2fd   : > { %v409_v44 = vpop.permute.xlu2 %408 }
 0x2fe   : > { %v411_v45 = vmul.f32 %v409_v44, %v405_v4 }
 0x300   : > { %v412_v46 = vadd.f32 %v411_v45, %v1111_v52 }
 0x302   : > { %413 = vst.msk [vmem:[#allocation4] sm:$0xff] %vm334_vm0, %v412_v46 }
 0x305   : > { %v503_v25 = vpop.permute.xlu2 %502 }
 0x307   : > { %v658_v47 = vpop.permute.xlu1 %657 }
 0x308   : > { %v660_v48 = vsub.f32 %v1119_v61, %v658_v47  ;;  %v376_v61 = vmul.f32 %v935_v32, %v375_v60 }
 0x309   : > { %v499_v26 = vld [vmem:[#allocation4] sm:$0xff] }
 0x30a   : > { %v661_v49 = vmul.f32 1.442695, %v660_v48  ;;  %v505_v27 = vmul.f32 %v503_v25, %v499_v26 }
 0x30c   : > { %940 = vpow2.f32 %v661_v49  ;;  %v559_v50 = vpop.permute.xlu0 %558 }
 0x30d   : > { %v561_v51 = vsub.f32 %v1124_v1, %v559_v50 }
 0x30f   : > { %v562_v53 = vmul.f32 1.442695, %v561_v51 }
 0x311   : > { %942 = vpow2.f32 %v562_v53 }
 0x312   : > { %v941_v54 = vpop.eup %940  ;;  %944 = vpow2.f32 %v554_v58 }
 0x313   : > { %v666_v55 = vsel %vm334_vm0, %v941_v54, 0.0  ;;  %v672_v56 = vpack.c.bf16 %v941_v54, %v941_v54 }
 0x314   : > { %667 = vadd.xlane.f32.xlu1 %v666_v55 }
 0x315   : > { %893 = vmatmul.msk.bf16.vlgmr.msrb.gmra.mxu2 %vm334_vm0, %v672_v56 }
 0x317   : > { %v943_v52 = vpop.eup %942 }
 0x318   : > { %v573_v57 = vpack.c.bf16 %v943_v52, %v943_v52  ;;  %v945_v59 = vpop.eup %944  ;;  %v567_v19 = vsel %vm334_vm0, %v943_v52, 0.0 }
 0x319   : > { %v566_v35 = vmul.f32 %v945_v59, %v565_v24 }
 0x31a   : > { %891 = vmatmul.msk.bf16.vlgmr.msrb.gmra.mxu3 %vm334_vm0, %v573_v57 }
 0x32d   : > { %601 = vperm.xlu1 %929, %v945_v59  }
 0x332   : > { %v379_v62 = vpop.xlane.xlu1 %378 }
 0x333   : > { %v380_v63 = vadd.f32 %v379_v62, %v376_v61 }
 0x335   : > { %382 = vst.msk [vmem:[#allocation3] sm:$0xff] %vm317_vm1, %v380_v63 }
 0x33c   : > { %v715_v0 = vld [vmem:[#allocation3] sm:$0xff] }
 0x33d   : > { %946 = vrcp.f32 %v715_v0 }
 0x33e   : > { %948 = vpow2.f32 %v653_v9 }
 0x343   : > { %v947_v1 = vpop.eup %946 }
 0x344   : > { %719 = vperm.xlu1 %929, %v947_v1   ;;  %v949_v11 = vpop.eup %948 }
 0x345   : > { %v665_v13 = vmul.f32 %v949_v11, %v664_v12 }
 0x365   : > { %v470_v5 = vpop.xlane.xlu0 %469 }
 0x366   : > { %v471_v6 = vadd.f32 %v470_v5, %v467_v3 }
 0x368   : > { %472 = vst.msk [vmem:[#allocation3 + $0x8] sm:$0xff] %vm317_vm1, %v471_v6 }
 0x36f   : > { %v725_v22 = vld [vmem:[#allocation3 + $0x8] sm:$0xff] }
 0x370   : > { %950 = vrcp.f32 %v725_v22 }
 0x376   : > { %v495_v8 = vpop.f32.mrf.mxu3  ;;  %v951_v20 = vpop.eup %950 }
 0x377   : > { %507 = vrot.lane.b32.xlu2 %v495_v8, %s986_s9 }
 0x37e   : > { %v497_v10 = vpop.f32.mrf.mxu3 }
 0x387   : > { %v668_v7 = vpop.xlane.xlu1 %667 }
 0x388   : > { %v669_v14 = vadd.f32 %v668_v7, %v665_v13 }
 0x38a   : > { %670 = vst.msk [vmem:[#allocation3 + $0x18] sm:$0xff] %vm317_vm1, %v669_v14 }
 0x391   : > { %v745_v18 = vld [vmem:[#allocation3 + $0x18] sm:$0xff] }
 0x392   : > { %952 = vrcp.f32 %v745_v18 }
 0x398   : > { %v693_v16 = vpop.f32.mrf.mxu2  ;;  %v953_v23 = vpop.eup %952 }
 0x39d   : > { %v594_v17 = vpop.f32.mrf.mxu3 }
 0x39e   : > { %606 = vrot.lane.b32.xlu0 %v594_v17, %s987_s10 }
 0x39f   : > { %v602_v33 = vpop.permute.xlu1 %601 }
 0x3a0   : > { %v695_v21 = vpop.f32.mrf.mxu2  ;;  %568 = vadd.xlane.f32.xlu2 %v567_v19 }
 0x3a5   : > { %v596_v15 = vpop.f32.mrf.mxu3 }
 0x3a6   : > { %705 = vrot.lane.b32.xlu0 %v693_v16, %s988_s11 }
 0x3ae   : > { %729 = vperm.xlu0 %931, %v951_v20  }
 0x3b6   : > { %749 = vperm.xlu0 %931, %v953_v23   ;;  %v720_v44 = vpop.permute.xlu1 %719 }
 0x3b8   : > { %700 = vperm.xlu2 %930, %v949_v11  }
 0x3d1   : > { %v508_v30 = vpop.permute.xlu2 %507 }
 0x3d2   : > { %v510_v31 = vadd.f32 %v508_v30, %v505_v27 }
 0x3d4   : > { %512 = vst.msk [vmem:[#allocation4] sm:$0xff] %vm511_vm5, %v510_v31 }
 0x3db   : > { %v598_v32 = vld [vmem:[#allocation4] sm:$0xff] }
 0x3dc   : > { %v604_v34 = vmul.f32 %v602_v33, %v598_v32 }
 0x410   : > { %v607_v28 = vpop.permute.xlu0 %606 }
 0x411   : > { %v609_v29 = vadd.f32 %v607_v28, %v604_v34 }
 0x413   : > { %611 = vst.msk [vmem:[#allocation4] sm:$0xff] %vm610_vm6, %v609_v29  ;;  %v569_v36 = vpop.xlane.xlu2 %568 }
 0x414   : > { %v570_v37 = vadd.f32 %v569_v36, %v566_v35 }
 0x416   : > { %571 = vst.msk [vmem:[#allocation3 + $0x10] sm:$0xff] %vm317_vm1, %v570_v37 }
 0x418   : > { %v706_v41 = vpop.permute.xlu0 %705 }
 0x41a   : > { %v697_v38 = vld [vmem:[#allocation4] sm:$0xff] }
 0x41b   : > { %v701_v39 = vpop.permute.xlu2 %700 }
 0x41c   : > { %v703_v40 = vmul.f32 %v701_v39, %v697_v38 }
 0x41d   : > { %v735_v42 = vld [vmem:[#allocation3 + $0x10] sm:$0xff] }
 0x41e   : > { %v708_v43 = vadd.f32 %v706_v41, %v703_v40  ;;  %954 = vrcp.f32 %v735_v42 }
 0x420   : > { %710 = vst.msk [vmem:[#allocation4] sm:$0xff] %vm709_vm7, %v708_v43  ;;  %v730_v48 = vpop.permute.xlu0 %729 }
 0x424   : > { %v955_v4 = vpop.eup %954 }
 0x425   : > { %739 = vperm.xlu1 %929, %v955_v4  }
 0x427   : > { %v714_v45 = vld [vmem:[#allocation4] sm:$0xff] }
 0x428   : > { %v722_v46 = vmul.f32 %v720_v44, %v714_v45  ;;  %v750_v54 = vpop.permute.xlu0 %749 }
 0x42a   : > { %723 = vst.msk [vmem:[#allocation4] sm:$0xff] %vm334_vm0, %v722_v46 }
 0x431   : > { %v724_v47 = vld [vmem:[#allocation4] sm:$0xff] }
 0x432   : > { %v732_v49 = vmul.f32 %v730_v48, %v724_v47 }
 0x434   : > { %733 = vst.msk [vmem:[#allocation4] sm:$0xff] %vm511_vm5, %v732_v49 }
 0x43b   : > { %v734_v51 = vld [vmem:[#allocation4] sm:$0xff] }
 0x497   : > { %v740_v50 = vpop.permute.xlu1 %739 }
 0x498   : > { %v742_v53 = vmul.f32 %v740_v50, %v734_v51 }
 0x49a   : > { %743 = vst.msk [vmem:[#allocation4] sm:$0xff] %vm610_vm6, %v742_v53 }
 0x4a1   : > { %v744_v55 = vld [vmem:[#allocation4] sm:$0xff] }
 0x4a2   : > { %v752_v56 = vmul.f32 %v750_v54, %v744_v55 }
 0x4a4   : > { %753 = vst.msk [vmem:[#allocation4] sm:$0xff] %vm709_vm7, %v752_v56 }
 0x4ab   : > { %v754_v52 = vld [vmem:[#allocation4] sm:$0xff] }
 0x4ac   : > { %v755_v57 = vpack.c.bf16 %v754_v52, %v754_v52 }
 0x4ae   : > { %757 = vst.msk [vmem:[%s311_s14] sm:$0xf] %vm756_vm8, %v755_v57 }
 0x4af PF: > { %s14_s17 = sadd.s32 1, %s978_s17   ;;  %s1198_s15 = smov %s974_s16 }
 0x4b0   : > { %p11_p5 = scmp.ge.s32.totalorder %s14_s17, 4   ;;  %s1199_s16 = smov %s1201_s18 }
 0x4b2   :  { %13 = sbr.rel (!%p11_p5) target bundleno = 2 (0x2), region = 89 }

// kernel: text_encoder_forward.20
= control target key start
LH: loop header
LB: loop body
LE: loop exit
PB: predicated region body
PF: predicated region fallthrough
CT: control target
= control target key end

     0   :  { %vm19_vm0 = vcmask 523264   ;;  %v129_v1 = vmov 0.0   ;;  %vm50_vm1 = vcmask 261120   ;;  %vm104_vm2 = vcmask 519168   ;;  %s191_s1 = inlined_call_operand.vmem [shape: bf16[32,64], index: 1, kind: input, shape index: {}]   ;;  %s192_s0 = inlined_call_operand.vmem [shape: f32[32,32], index: 0, kind: input, shape index: {}]   ;;  %s193_s2 = inlined_call_operand.vmem [shape: f32[1,64], index: 2, kind: input, shape index: {}]   ;;  %s194_s3 = inlined_call_operand.vmem [shape: bf16[32,64], index: 3, kind: output, shape index: {}]  }
   0x1   :  { %v124_v0 = vld [vmem:[%s191_s1 + $0x8] sm:$0xff]  ;;  %20 = vst.msk [vmem:[#allocation2] sm:$0xff] %vm19_vm0, %v129_v1  ;;  %v123_v2 = vld [vmem:[%s191_s1] sm:$0xff]  ;;  %v30_v5 = vld [vmem:[%s192_s0 + $0x10] sm:$0xff] }
   0x2   :  { %v28_v3 = vld [vmem:[%s192_s0] sm:$0xff]  ;;  %v29_v4 = vld [vmem:[%s192_s0 + $0x8] sm:$0xff]  ;;  %21 = vst.msk [vmem:[#allocation2 + $0x8] sm:$0xff] %vm19_vm0, %v129_v1  ;;  %63 = vmatpush.bf16.msra.mxu0 %v124_v0  ;;  %125 = vmatpush.bf16.msra.mxu1 %v124_v0  ;;  %v31_v6 = vld [vmem:[%s192_s0 + $0x18] sm:$0xff] }
   0x3   :  { %22 = vst.msk [vmem:[#allocation2 + $0x10] sm:$0xff] %vm19_vm0, %v129_v1  ;;  %v32_v7 = vpack.c.bf16 %v29_v4, %v28_v3  ;;  %v33_v8 = vpack.c.bf16 %v31_v6, %v30_v5  ;;  %v128_v17 = vld [vmem:[%s193_s2] ss:$0 sm:$0xff] }
   0x4   :  { %23 = vst.msk [vmem:[#allocation2 + $0x18] sm:$0xff] %vm19_vm0, %v129_v1 }
   0x6   :  { %64 = vmatpush.bf16.msra.mxu0 %v123_v2  ;;  %126 = vmatpush.bf16.msra.mxu1 %v123_v2 }
   0x8   :  { %v24_v9 = vld [vmem:[#allocation2] sm:$0xff] }
   0x9   :  { %121 = vmatmul.msk.bf16.vlgmr.msra.gmra.mxu0 %vm50_vm1, %v32_v7  ;;  %122 = vmatmul.msk.bf16.vlgmr.msra.gmra.mxu1 %vm50_vm1, %v33_v8  ;;  %v25_v15 = vld [vmem:[#allocation2 + $0x8] sm:$0xff] }
   0xa   :  { %v26_v10 = vld [vmem:[#allocation2 + $0x10] sm:$0xff] }
   0xb   :  { %v27_v16 = vld [vmem:[#allocation2 + $0x18] sm:$0xff] }
  0x86   :  { %v66_v11 = vpop.f32.mrf.mxu0  ;;  %v71_v12 = vpop.f32.mrf.mxu1 }
  0x87   :  { %v76_v13 = vadd.f32 %v66_v11, %v24_v9  ;;  %v78_v14 = vadd.f32 %v71_v12, %v26_v10 }
  0x89   :  { %81 = vst.msk [vmem:[#allocation2] sm:$0xff] %vm19_vm0, %v76_v13 }
  0x8a   :  { %83 = vst.msk [vmem:[#allocation2 + $0x10] sm:$0xff] %vm19_vm0, %v78_v14 }
  0x8e   :  { %v68_v18 = vpop.f32.mrf.mxu0  ;;  %v73_v19 = vpop.f32.mrf.mxu1 }
  0x8f   :  { %v77_v20 = vadd.f32 %v68_v18, %v25_v15  ;;  %v79_v21 = vadd.f32 %v73_v19, %v27_v16 }
  0x90   :  { %v88_v22 = vld [vmem:[#allocation2] sm:$0xff] }
  0x91   :  { %v96_v23 = vadd.f32 %v128_v17, %v88_v22  ;;  %v90_v24 = vld [vmem:[#allocation2 + $0x10] sm:$0xff]  ;;  %82 = vst.msk [vmem:[#allocation2 + $0x8] sm:$0xff] %vm19_vm0, %v77_v20 }
  0x92   :  { %v98_v25 = vadd.f32 %v128_v17, %v90_v24  ;;  %84 = vst.msk [vmem:[#allocation2 + $0x18] sm:$0xff] %vm19_vm0, %v79_v21 }
  0x93   :  { %v100_v26 = vpack.c.bf16 %v96_v23, %v96_v23 }
  0x94   :  { %v102_v27 = vpack.c.bf16 %v98_v25, %v98_v25 }
  0x95   :  { %105 = vst.msk [vmem:[%s194_s3] sm:$0xf] %vm104_vm2, %v100_v26 }
  0x96   :  { %107 = vst.msk [vmem:[%s194_s3 + $0x8] sm:$0xf] %vm104_vm2, %v102_v27 }
  0x98   :  { %v89_v28 = vld [vmem:[#allocation2 + $0x8] sm:$0xff] }
  0x99   :  { %v97_v29 = vadd.f32 %v128_v17, %v89_v28  ;;  %v91_v30 = vld [vmem:[#allocation2 + $0x18] sm:$0xff] }
  0x9a   :  { %v99_v31 = vadd.f32 %v128_v17, %v91_v30 }
  0x9b   :  { %v101_v32 = vpack.c.bf16 %v97_v29, %v97_v29 }
  0x9c   :  { %v103_v33 = vpack.c.bf16 %v99_v31, %v99_v31 }
  0x9d   :  { %106 = vst.msk [vmem:[%s194_s3 + $0x4] sm:$0xf] %vm104_vm2, %v101_v32 }
  0x9e   :  { %108 = vst.msk [vmem:[%s194_s3 + $0xc] sm:$0xf] %vm104_vm2, %v103_v33 }

// kernel: text_encoder_forward.21
= control target key start
LH: loop header
LB: loop body
LE: loop exit
PB: predicated region body
PF: predicated region fallthrough
CT: control target
= control target key end

     0   :  { %s1023_s12 = smov 0   ;;  %s1025_s13 = smov 0   ;;  %s1185_s0 = inlined_call_operand.vmem [shape: bf16[2,8,32], index: 0, kind: input, shape index: {}]   ;;  %s1186_s1 = inlined_call_operand.vmem [shape: bf16[2,16,32], index: 1, kind: input, shape index: {}]   ;;  %s1187_s2 = inlined_call_operand.vmem [shape: bf16[2,16,32], index: 2, kind: input, shape index: {}]   ;;  %s1188_s3 = inlined_call_operand.vmem [shape: bf16[2,8,32], index: 3, kind: output, shape index: {}]  }
   0x1   :  { %s1027_s14 = smov 0  }
   0x2 LB: > { %s32_s15 = sadd.s32 1, %s988_s13  ;;  %p851_p0 = scmp.ge.s32.totalorder %s992_s14, 1  ;;  %s992_s14 = sphi %s1027_s14, %s13_s14   ;;  %s988_s13 = sphi %s1025_s13, %s1190_s13   ;;  %s984_s12 = sphi %s1023_s12, %s1189_s12  }
   0x3   : > { %p34_p1 = scmp.ge.s32.totalorder %s32_s15, 2  ;;  %p196_p2 = scmp.lt.s32.totalorder %s992_s14, 3 }
   0x5   : > { %s1192_s15 = smov (%p34_p1, %s32_s15), 0  ;;  %p197_p3 = pnand %p851_p0, %p196_p2 }
   0x6   : > { %p242_p4 = scmp.lt.s32.totalorder (!%p197_p3), %s984_s12, 1  ;;  %s996_s24 = smov (!%p197_p3), 120  }
   0x7   : > { %200 = sbr.rel (%p197_p3) target bundleno = 1195 (0x4ab), region = 32  ;;  %s998_s25 = smov (!%p197_p3), 112  }
   0x8   : > { %s999_s26 = smov (!%p197_p3), 104   ;;  %s1000_s30 = smov (!%p197_p3), 8  }
   0x9   : > { %s1001_s4 = smov (!%p197_p3), 16   ;;  %s1002_s5 = smov (!%p197_p3), 24  }
   0xc   : > { %s1194_s12 = smov (!%p242_p4, %s984_s12), 1  ;;  %vm302_vm0 = vcmask 64512   ;;  %vm281_vm1 = vcmask 7168   ;;  %v994_v3 = vmov -inf   ;;  %vm324_vm2 = vcmask 130048  }
   0xd   : > { %s900_s16 = sshll.u32 %s1194_s12, 3  ;;  %s852_s20 = sshll.u32 %s1194_s12, 2  ;;  %282 = vst.msk [vmem:[#allocation2] sm:$0xff] %vm281_vm1, %v994_v3  ;;  %v995_v9 = vmov 0   ;;  %v997_v10 = vmov 0.0   ;;  %vm290_vm3 = vcmask 261120  }
   0xe   : > { %s1049_s19 = scalar_lea.vmem %s1186_s1, %s900_s16  ;;  %s1059_s23 = scalar_lea.vmem %s1185_s0, %s852_s20  ;;  %283 = vst.msk [vmem:[#allocation2 + $0x8] sm:$0xff] %vm281_vm1, %v994_v3  ;;  %943 = vset.pattern.permute.xlu1 %v995_v9  ;;  %944 = vset.pattern.permute.xlu2 %v995_v9  ;;  %vm481_vm4 = vcmask 130112   ;;  %vm583_vm5 = vcmask 195712   ;;  %vm685_vm6 = vcmask 261312   ;;  %vm732_vm7 = vcmask 257024  }
   0xf   : > { %v902_v0 = vld [vmem:[%s1049_s19] sm:$0xff]  ;;  %284 = vst.msk [vmem:[#allocation2 + $0x10] sm:$0xff] %vm281_vm1, %v994_v3  ;;  %945 = vset.pattern.permute.xlu0 %v995_v9  ;;  %s1104_s29 = scalar_lea.vmem %s1187_s2, %s900_s16  ;;  %s275_s8 = scalar_lea.vmem %s1188_s3, %s852_s20 }
  0x10   : > { %v307_v1 = vsel %vm302_vm0, %v902_v0, 0  ;;  %v292_v2 = vld [vmem:[%s1059_s23] sm:$0xf]  ;;  %285 = vst.msk [vmem:[#allocation2 + $0x18] sm:$0xff] %vm281_vm1, %v994_v3 }
  0x11   : > { %316 = vmatpush.bf16.xpose.msra.mxu0 %v307_v1  ;;  %v904_v8 = vld [vmem:[%s1049_s19] sm:$0xff]  ;;  %286 = vst.msk [vmem:[#allocation3] sm:$0xff] %vm281_vm1, %v997_v10 }
  0x12   : > { %287 = vst.msk [vmem:[#allocation3 + $0x8] sm:$0xff] %vm281_vm1, %v997_v10  ;;  %v906_v11 = vld [vmem:[%s1049_s19] sm:$0xff] }
  0x13   : > { %288 = vst.msk [vmem:[#allocation3 + $0x10] sm:$0xff] %vm281_vm1, %v997_v10  ;;  %v483_v12 = vld [vmem:[%s1059_s23] sm:$0xf]  ;;  %498 = vrot.lane.b32.xlu2 %v906_v11, %s998_s25 }
  0x14   : > { %289 = vst.msk [vmem:[#allocation3 + $0x18] sm:$0xff] %vm281_vm1, %v997_v10  ;;  %v489_v13 = vunpack.c.l.b16 %v483_v12  ;;  %v585_v15 = vld [vmem:[%s1059_s23] sm:$0xf] }
  0x15   : > { %v591_v16 = vunpack.c.l.b16 %v585_v15  ;;  %v1083_v17 = vld [vmem:[#allocation2] sm:$0xff]  ;;  %v419_v56 = vld [vmem:[#allocation2 + $0x8] sm:$0xff]  ;;  %291 = vst.msk [vmem:[#allocation4] sm:$0xff] %vm290_vm3, %v997_v10 }
  0x16   : > { %v490_v14 = vpack.c.b16 %v489_v13, %v489_v13  ;;  %v381_v19 = vld [vmem:[%s1059_s23] sm:$0xf]  ;;  %v521_v0 = vld [vmem:[#allocation2 + $0x10] sm:$0xff] }
  0x17   : > { %v592_v21 = vpack.c.b16 %v591_v16, %v591_v16  ;;  %v387_v23 = vunpack.c.l.b16 %v381_v19  ;;  %v908_v25 = vld [vmem:[%s1049_s19] sm:$0xff]  ;;  %v1128_v60 = vld [vmem:[#allocation2 + $0x18] sm:$0xff] }
  0x18   : > { %862 = vmatmul.msk.bf16.vlgmr.msra.gmra.mxu0 %vm302_vm0, %v292_v2  ;;  %v903_v28 = vld [vmem:[%s1104_s29] sm:$0xff] }
  0x19   : > { %v388_v24 = vpack.c.b16 %v387_v23, %v387_v23  ;;  %366 = vmatpush.bf16.msra.mxu1 %v903_v28  ;;  %v905_v55 = vld [vmem:[%s1104_s29] sm:$0xff] }
  0x1a   : > { %v907_v59 = vld [vmem:[%s1104_s29] sm:$0xff] }
  0x1b   : > { %491 = vrot.lane.b32.xlu2 %v490_v14, %s998_s25  ;;  %v909_v2 = vld [vmem:[%s1104_s29] sm:$0xff] }
  0x23   : > { %593 = vrot.lane.b32.xlu2 %v592_v21, %s999_s26  ;;  %v372_v21 = vld [vmem:[#allocation4] sm:$0xff] }
  0x6d   : > { %v499_v29 = vpop.permute.xlu2 %498 }
  0x6e   : > { %v504_v30 = vsel %vm302_vm0, %v499_v29, 0 }
  0x6f   : > { %513 = vmatpush.bf16.xpose.msrb.mxu1 %v504_v30 }
  0x75   : > { %v492_v37 = vpop.permute.xlu2 %491 }
  0x7d   : > { %v594_v40 = vpop.permute.xlu2 %593 }
  0x95   : > { %v318_v4 = vpop.f32.mrf.mxu0 }
  0x96   : > { %v322_v5 = vmul.f32 0.35355338, %v318_v4 }
  0x98   : > { %v325_v6 = vsel %vm324_vm2, %v322_v5, -inf }
  0x99   : > { %326 = vmax.xlane.f32.xlu0 %v325_v6 }
  0x9d   : > { %v320_v7 = vpop.f32.mrf.mxu0 }
  0xad   : > { %396 = vrot.lane.b32.xlu0 %v904_v8, %s996_s24 }
 0x10c   : > { %v327_v18 = vpop.xlane.xlu0 %326 }
 0x10d   : > { %v1087_v20 = vmax.f32 %v1083_v17, %v327_v18 }
 0x10f   : > { %v329_v22 = vsub.f32 %v1083_v17, %v1087_v20  ;;  %348 = vst.msk [vmem:[#allocation2] sm:$0xff] %vm281_vm1, %v1087_v20  ;;  %334 = vperm.xlu1 %943, %v1087_v20  }
 0x111   : > { %v330_v3 = vmul.f32 1.442695, %v329_v22 }
 0x117   : > { %389 = vrot.lane.b32.xlu1 %v388_v24, %s996_s24 }
 0x11f   : > { %600 = vrot.lane.b32.xlu1 %v908_v25, %s999_s26  ;;  %v397_v26 = vpop.permute.xlu0 %396 }
 0x120   : > { %v402_v27 = vsel %vm302_vm0, %v397_v26, 0 }
 0x121   : > { %411 = vmatpush.bf16.xpose.msra.mxu2 %v402_v27 }
 0x181   : > { %v335_v31 = vpop.permute.xlu1 %334 }
 0x182   : > { %v337_v32 = vsub.f32 %v322_v5, %v335_v31 }
 0x184   : > { %v338_v33 = vmul.f32 1.442695, %v337_v32 }
 0x186   : > { %946 = vpow2.f32 %v338_v33 }
 0x187   : > { %948 = vpow2.f32 %v330_v3 }
 0x189   : > { %v390_v34 = vpop.permute.xlu1 %389 }
 0x18a   : > { %872 = vmatmul.msk.bf16.vlgmr.msra.gmra.mxu2 %vm302_vm0, %v390_v34 }
 0x18c   : > { %v947_v35 = vpop.eup %946 }
 0x18d   : > { %v349_v36 = vpack.c.bf16 %v947_v35, %v947_v35  ;;  %v949_v8 = vpop.eup %948  ;;  %v342_v11 = vsel %vm324_vm2, %v947_v35, 0.0 }
 0x18f   : > { %867 = vmatmul.msk.bf16.vlgmr.msra.gmra.mxu1 %vm324_vm2, %v349_v36 }
 0x191   : > { %v601_v38 = vpop.permute.xlu1 %600 }
 0x192   : > { %v606_v39 = vsel %vm302_vm0, %v601_v38, 0 }
 0x193   : > { %615 = vmatpush.bf16.xpose.msrb.mxu0 %v606_v39 }
 0x19a   : > { %892 = vmatmul.msk.bf16.vlgmr.msrb.gmra.mxu0 %vm302_vm0, %v594_v40 }
 0x19f   : > { %882 = vmatmul.msk.bf16.vlgmr.msrb.gmra.mxu1 %vm302_vm0, %v492_v37  ;;  %v340_v37 = vld [vmem:[#allocation3] sm:$0xff] }
 0x1a0   : > { %v341_v38 = vmul.f32 %v949_v8, %v340_v37 }
 0x20c   : > { %v1113_v41 = vpop.f32.mrf.mxu1 }
 0x20d   : > { %v413_v42 = vpop.f32.mrf.mxu2 }
 0x20e   : > { %v417_v43 = vmul.f32 0.35355338, %v413_v42 }
 0x210   : > { %v420_v44 = vsel %vm324_vm2, %v417_v43, -inf }
 0x211   : > { %421 = vmax.xlane.f32.xlu1 %v420_v44 }
 0x214   : > { %v370_v45 = vpop.f32.mrf.mxu1 }
 0x215   : > { %v415_v46 = vpop.f32.mrf.mxu2 }
 0x217   : > { %v617_v47 = vpop.f32.mrf.mxu0 }
 0x218   : > { %v1116_v48 = vmul.f32 0.35355338, %v617_v47 }
 0x21a   : > { %v624_v49 = vsel %vm324_vm2, %v1116_v48, -inf }
 0x21b   : > { %625 = vmax.xlane.f32.xlu0 %v624_v49 }
 0x21c   : > { %v515_v50 = vpop.f32.mrf.mxu1 }
 0x21d   : > { %v1120_v51 = vmul.f32 0.35355338, %v515_v50 }
 0x21f   : > { %v522_v52 = vsel %vm324_vm2, %v1120_v51, -inf  ;;  %v619_v53 = vpop.f32.mrf.mxu0 }
 0x220   : > { %523 = vmax.xlane.f32.xlu2 %v522_v52 }
 0x224   : > { %v517_v54 = vpop.f32.mrf.mxu1 }
 0x22a   : > { %450 = vrot.lane.b32.xlu1 %v905_v55, %s996_s24 }
 0x284   : > { %v422_v57 = vpop.xlane.xlu1 %421 }
 0x285   : > { %v423_v58 = vmax.f32 %v419_v56, %v422_v57 }
 0x287   : > { %443 = vst.msk [vmem:[#allocation2 + $0x8] sm:$0xff] %vm281_vm1, %v423_v58  ;;  %429 = vperm.xlu2 %944, %v423_v58   ;;  %v424_v6 = vsub.f32 %v419_v56, %v423_v58 }
 0x289   : > { %v425_v7 = vmul.f32 1.442695, %v424_v6 }
 0x28b   : > { %950 = vpow2.f32 %v425_v7 }
 0x28e   : > { %v626_v61 = vpop.xlane.xlu0 %625 }
 0x28f   : > { %v1131_v62 = vmax.f32 %v1128_v60, %v626_v61  ;;  %552 = vrot.lane.b32.xlu2 %v907_v59, %s998_s25 }
 0x291   : > { %v628_v63 = vsub.f32 %v1128_v60, %v1131_v62  ;;  %647 = vst.msk [vmem:[#allocation2 + $0x18] sm:$0xff] %vm281_vm1, %v1131_v62  ;;  %633 = vperm.xlu1 %943, %v1131_v62   ;;  %v951_v9 = vpop.eup %950 }
 0x293   : > { %v524_v1 = vpop.xlane.xlu2 %523 }
 0x294   : > { %v525_v4 = vmax.f32 %v521_v0, %v524_v1 }
 0x296   : > { %v526_v5 = vsub.f32 %v521_v0, %v525_v4  ;;  %545 = vst.msk [vmem:[#allocation2 + $0x10] sm:$0xff] %vm281_vm1, %v525_v4  ;;  %531 = vperm.xlu0 %945, %v525_v4  }
 0x297   : > { %654 = vrot.lane.b32.xlu2 %v909_v2, %s999_s26 }
 0x298   : > { %v527_v35 = vmul.f32 1.442695, %v526_v5 }
 0x29c   : > { %v451_v12 = vpop.permute.xlu1 %450 }
 0x29d   : > { %463 = vmatpush.bf16.msra.mxu3 %v451_v12 }
 0x29f   : > { %375 = vperm.xlu2 %944, %v949_v8   ;;  %v538_v8 = vld [vmem:[#allocation3 + $0x10] sm:$0xff] }
 0x2a7   : > { %472 = vperm.xlu2 %944, %v951_v9  }
 0x2bb   : > { %343 = vadd.xlane.f32.xlu1 %v342_v11 }
 0x2e1   : > { %v430_v13 = vpop.permute.xlu2 %429 }
 0x2e2   : > { %v432_v14 = vsub.f32 %v417_v43, %v430_v13  ;;  %v436_v43 = vld [vmem:[#allocation3 + $0x8] sm:$0xff] }
 0x2e3   : > { %v437_v44 = vmul.f32 %v951_v9, %v436_v43 }
 0x2e4   : > { %v433_v15 = vmul.f32 1.442695, %v432_v14 }
 0x2e6   : > { %952 = vpow2.f32 %v433_v15 }
 0x2e9   : > { %v553_v16 = vpop.permute.xlu2 %552 }
 0x2ea   : > { %565 = vmatpush.bf16.msrb.mxu3 %v553_v16 }
 0x2ec   : > { %v953_v17 = vpop.eup %952 }
 0x2ed   : > { %v438_v18 = vsel %vm324_vm2, %v953_v17, 0.0  ;;  %v444_v19 = vpack.c.bf16 %v953_v17, %v953_v17 }
 0x2ee   : > { %439 = vadd.xlane.f32.xlu0 %v438_v18 }
 0x2ef   : > { %877 = vmatmul.msk.bf16.vlgmr.msra.gmra.mxu3 %vm324_vm2, %v444_v19 }
 0x2f1   : > { %v655_v20 = vpop.permute.xlu2 %654 }
 0x2f2   : > { %667 = vmatpush.bf16.msrb.mxu2 %v655_v20 }
 0x2f9   : > { %v376_v22 = vpop.permute.xlu2 %375 }
 0x2fa   : > { %v378_v23 = vmul.f32 %v376_v22, %v372_v21 }
 0x2fc   : > { %v379_v10 = vadd.f32 %v378_v23, %v1113_v41 }
 0x2fe   : > { %380 = vst.msk [vmem:[#allocation4] sm:$0xff] %vm302_vm0, %v379_v10 }
 0x301   : > { %v473_v0 = vpop.permute.xlu2 %472 }
 0x303   : > { %v634_v24 = vpop.permute.xlu1 %633 }
 0x304   : > { %v636_v25 = vsub.f32 %v1116_v48, %v634_v24  ;;  %v629_v48 = vmul.f32 1.442695, %v628_v63 }
 0x305   : > { %v469_v1 = vld [vmem:[#allocation4] sm:$0xff] }
 0x306   : > { %v637_v26 = vmul.f32 1.442695, %v636_v25  ;;  %v475_v2 = vmul.f32 %v473_v0, %v469_v1 }
 0x308   : > { %954 = vpow2.f32 %v637_v26  ;;  %v532_v27 = vpop.permute.xlu0 %531 }
 0x309   : > { %v534_v28 = vsub.f32 %v1120_v51, %v532_v27  ;;  %v640_v51 = vld [vmem:[#allocation3 + $0x18] sm:$0xff] }
 0x30b   : > { %v535_v29 = vmul.f32 1.442695, %v534_v28 }
 0x30d   : > { %956 = vpow2.f32 %v535_v29 }
 0x30e   : > { %v955_v30 = vpop.eup %954  ;;  %958 = vpow2.f32 %v527_v35 }
 0x30f   : > { %v642_v31 = vsel %vm324_vm2, %v955_v30, 0.0  ;;  %v648_v32 = vpack.c.bf16 %v955_v30, %v955_v30 }
 0x310   : > { %643 = vadd.xlane.f32.xlu1 %v642_v31 }
 0x311   : > { %897 = vmatmul.msk.bf16.vlgmr.msrb.gmra.mxu2 %vm324_vm2, %v648_v32 }
 0x313   : > { %v957_v33 = vpop.eup %956 }
 0x314   : > { %v546_v34 = vpack.c.bf16 %v957_v33, %v957_v33  ;;  %v959_v36 = vpop.eup %958  ;;  %v540_v57 = vsel %vm324_vm2, %v957_v33, 0.0 }
 0x315   : > { %v539_v12 = vmul.f32 %v959_v36, %v538_v8 }
 0x316   : > { %887 = vmatmul.msk.bf16.vlgmr.msrb.gmra.mxu3 %vm324_vm2, %v546_v34 }
 0x329   : > { %574 = vperm.xlu1 %943, %v959_v36  }
 0x32e   : > { %v344_v39 = vpop.xlane.xlu1 %343 }
 0x32f   : > { %v345_v40 = vadd.f32 %v344_v39, %v341_v38 }
 0x331   : > { %347 = vst.msk [vmem:[#allocation3] sm:$0xff] %vm281_vm1, %v345_v40 }
 0x338   : > { %v691_v41 = vld [vmem:[#allocation3] sm:$0xff] }
 0x339   : > { %960 = vrcp.f32 %v691_v41 }
 0x33a   : > { %962 = vpow2.f32 %v629_v48 }
 0x33f   : > { %v961_v42 = vpop.eup %960 }
 0x340   : > { %695 = vperm.xlu1 %943, %v961_v42   ;;  %v963_v50 = vpop.eup %962 }
 0x341   : > { %v641_v52 = vmul.f32 %v963_v50, %v640_v51 }
 0x361   : > { %v440_v45 = vpop.xlane.xlu0 %439 }
 0x362   : > { %v441_v46 = vadd.f32 %v440_v45, %v437_v44 }
 0x364   : > { %442 = vst.msk [vmem:[#allocation3 + $0x8] sm:$0xff] %vm281_vm1, %v441_v46 }
 0x36b   : > { %v701_v59 = vld [vmem:[#allocation3 + $0x8] sm:$0xff] }
 0x36c   : > { %964 = vrcp.f32 %v701_v59 }
 0x372   : > { %v465_v47 = vpop.f32.mrf.mxu3  ;;  %v965_v62 = vpop.eup %964 }
 0x373   : > { %477 = vrot.lane.b32.xlu2 %v465_v47, %s1000_s30 }
 0x37a   : > { %v467_v49 = vpop.f32.mrf.mxu3 }
 0x383   : > { %v644_v53 = vpop.xlane.xlu1 %643 }
 0x384   : > { %v645_v54 = vadd.f32 %v644_v53, %v641_v52 }
 0x386   : > { %646 = vst.msk [vmem:[#allocation3 + $0x18] sm:$0xff] %vm281_vm1, %v645_v54 }
 0x38d   : > { %v721_v61 = vld [vmem:[#allocation3 + $0x18] sm:$0xff] }
 0x38e   : > { %966 = vrcp.f32 %v721_v61 }
 0x394   : > { %v669_v55 = vpop.f32.mrf.mxu2  ;;  %v967_v63 = vpop.eup %966 }
 0x399   : > { %v567_v56 = vpop.f32.mrf.mxu3 }
 0x39a   : > { %579 = vrot.lane.b32.xlu0 %v567_v56, %s1001_s4 }
 0x39b   : > { %v575_v6 = vpop.permute.xlu1 %574 }
 0x39c   : > { %v671_v58 = vpop.f32.mrf.mxu2  ;;  %541 = vadd.xlane.f32.xlu2 %v540_v57 }
 0x3a1   : > { %v569_v60 = vpop.f32.mrf.mxu3 }
 0x3a2   : > { %681 = vrot.lane.b32.xlu0 %v669_v55, %s1002_s5 }
 0x3aa   : > { %705 = vperm.xlu0 %945, %v965_v62  }
 0x3b2   : > { %725 = vperm.xlu0 %945, %v967_v63   ;;  %v696_v22 = vpop.permute.xlu1 %695 }
 0x3b4   : > { %676 = vperm.xlu2 %944, %v963_v50  }
 0x3cd   : > { %v478_v3 = vpop.permute.xlu2 %477 }
 0x3ce   : > { %v480_v4 = vadd.f32 %v478_v3, %v475_v2 }
 0x3d0   : > { %482 = vst.msk [vmem:[#allocation4] sm:$0xff] %vm481_vm4, %v480_v4 }
 0x3d7   : > { %v571_v5 = vld [vmem:[#allocation4] sm:$0xff] }
 0x3d8   : > { %v577_v7 = vmul.f32 %v575_v6, %v571_v5 }
 0x40c   : > { %v580_v9 = vpop.permute.xlu0 %579 }
 0x40d   : > { %v582_v11 = vadd.f32 %v580_v9, %v577_v7 }
 0x40f   : > { %584 = vst.msk [vmem:[#allocation4] sm:$0xff] %vm583_vm5, %v582_v11  ;;  %v542_v13 = vpop.xlane.xlu2 %541 }
 0x410   : > { %v543_v14 = vadd.f32 %v542_v13, %v539_v12 }
 0x412   : > { %544 = vst.msk [vmem:[#allocation3 + $0x10] sm:$0xff] %vm281_vm1, %v543_v14 }
 0x414   : > { %v682_v18 = vpop.permute.xlu0 %681 }
 0x416   : > { %v673_v15 = vld [vmem:[#allocation4] sm:$0xff] }
 0x417   : > { %v677_v16 = vpop.permute.xlu2 %676 }
 0x418   : > { %v679_v17 = vmul.f32 %v677_v16, %v673_v15 }
 0x419   : > { %v711_v19 = vld [vmem:[#allocation3 + $0x10] sm:$0xff] }
 0x41a   : > { %v684_v20 = vadd.f32 %v682_v18, %v679_v17  ;;  %968 = vrcp.f32 %v711_v19 }
 0x41c   : > { %686 = vst.msk [vmem:[#allocation4] sm:$0xff] %vm685_vm6, %v684_v20  ;;  %v706_v25 = vpop.permute.xlu0 %705 }
 0x420   : > { %v969_v21 = vpop.eup %968 }
 0x421   : > { %715 = vperm.xlu1 %943, %v969_v21  }
 0x423   : > { %v690_v23 = vld [vmem:[#allocation4] sm:$0xff] }
 0x424   : > { %v698_v10 = vmul.f32 %v696_v22, %v690_v23  ;;  %v726_v30 = vpop.permute.xlu0 %725 }
 0x426   : > { %699 = vst.msk [vmem:[#allocation4] sm:$0xff] %vm302_vm0, %v698_v10 }
 0x42d   : > { %v700_v24 = vld [vmem:[#allocation4] sm:$0xff] }
 0x42e   : > { %v708_v26 = vmul.f32 %v706_v25, %v700_v24 }
 0x430   : > { %709 = vst.msk [vmem:[#allocation4] sm:$0xff] %vm481_vm4, %v708_v26 }
 0x437   : > { %v710_v28 = vld [vmem:[#allocation4] sm:$0xff] }
 0x493   : > { %v716_v27 = vpop.permute.xlu1 %715 }
 0x494   : > { %v718_v29 = vmul.f32 %v716_v27, %v710_v28 }
 0x496   : > { %719 = vst.msk [vmem:[#allocation4] sm:$0xff] %vm583_vm5, %v718_v29 }
 0x49d   : > { %v720_v31 = vld [vmem:[#allocation4] sm:$0xff] }
 0x49e   : > { %v728_v32 = vmul.f32 %v726_v30, %v720_v31 }
 0x4a0   : > { %729 = vst.msk [vmem:[#allocation4] sm:$0xff] %vm685_vm6, %v728_v32 }
 0x4a7   : > { %v730_v33 = vld [vmem:[#allocation4] sm:$0xff] }
 0x4a8   : > { %v731_v34 = vpack.c.bf16 %v730_v33, %v730_v33 }
 0x4aa   : > { %733 = vst.msk [vmem:[%s275_s8] sm:$0xf] %vm732_vm7, %v731_v34 }
 0x4ab PF: > { %s13_s14 = sadd.s32 1, %s992_s14   ;;  %s1189_s12 = smov %s988_s13 }
 0x4ac   : > { %p10_p5 = scmp.ge.s32.totalorder %s13_s14, 4   ;;  %s1190_s13 = smov %s1192_s15 }
 0x4ae   :  { %12 = sbr.rel (!%p10_p5) target bundleno = 2 (0x2), region = 82 }

// kernel: text_encoder_forward.23
= control target key start
LH: loop header
LB: loop body
LE: loop exit
PB: predicated region body
PF: predicated region fallthrough
CT: control target
= control target key end

     0   :  { %vm31_vm0 = vcmask 261120   ;;  %v262_v9 = vmov 0.0   ;;  %vm112_vm1 = vcmask 523264   ;;  %v263_v33 = vmov 32.0   ;;  %s357_s1 = inlined_call_operand.vmem [shape: bf16[32,64], index: 1, kind: input, shape index: {}]   ;;  %s358_s0 = inlined_call_operand.vmem [shape: f32[16,32], index: 0, kind: input, shape index: {}]   ;;  %s359_s2 = inlined_call_operand.vmem [shape: f32[1,64], index: 2, kind: input, shape index: {}]   ;;  %s360_s3 = inlined_call_operand.vmem [shape: bf16[64,32], index: 3, kind: input, shape index: {}]   ;;  %s361_s4 = inlined_call_operand.vmem [shape: f32[1,32], index: 4, kind: input, shape index: {}]   ;;  %s362_s5 = inlined_call_operand.vmem [shape: f32[1,32], index: 5, kind: input, shape index: {}]   ;;  %s363_s6 = inlined_call_operand.vmem [shape: f32[1,32], index: 6, kind: input, shape index: {}]   ;;  %s364_s7 = inlined_call_operand.vmem [shape: f32[16,32], index: 7, kind: output, shape index: {}]  }
   0x1   :  { %v245_v0 = vld [vmem:[%s357_s1 + $0x8] sm:$0xff]  ;;  %v244_v1 = vld [vmem:[%s357_s1] sm:$0xff]  ;;  %v249_v5 = vld [vmem:[%s360_s3 + $0x18] sm:$0xff]  ;;  %32 = vst.msk [vmem:[#allocation2] sm:$0xff] %vm31_vm0, %v262_v9  ;;  %256 = vrcp.f32 %v263_v33 }
   0x2   :  { %67 = vmatpush.bf16.msra.mxu0 %v245_v0  ;;  %v34_v2 = vld [vmem:[%s358_s0] sm:$0xff]  ;;  %v35_v3 = vld [vmem:[%s358_s0 + $0x8] sm:$0xff]  ;;  %120 = vmatpush.bf16.msra.mxu1 %v249_v5  ;;  %v248_v6 = vld [vmem:[%s360_s3 + $0x10] sm:$0xff]  ;;  %33 = vst.msk [vmem:[#allocation2 + $0x8] sm:$0xff] %vm31_vm0, %v262_v9 }
   0x3   :  { %v36_v4 = vpack.c.bf16 %v35_v3, %v34_v2  ;;  %v247_v7 = vld [vmem:[%s360_s3 + $0x8] sm:$0xff]  ;;  %v246_v8 = vld [vmem:[%s360_s3] sm:$0xff] }
   0x4   :  { %v252_v11 = vld [vmem:[%s359_s2] ss:$0 sm:$0xff] }
   0x5   :  { %v253_v22 = vld [vmem:[%s361_s4] ss:$0 sm:$0xff] }
   0x6   :  { %68 = vmatpush.bf16.msra.mxu0 %v244_v1  ;;  %121 = vmatpush.bf16.msra.mxu1 %v248_v6  ;;  %v254_v0 = vld [vmem:[%s362_s5] ss:$0 sm:$0xff] }
   0x7   :  { %v257_v34 = vpop.eup %256 }
   0x8   :  { %v77_v18 = vld [vmem:[#allocation2] sm:$0xff]  ;;  %v156_v35 = vmul.f32 32.0, %v257_v34  ;;  %vm160_vm2 = vweird.f32 %v257_v34 }
   0x9   :  { %226 = vmatmul.msk.bf16.vlgmr.msra.gmra.mxu0 %vm31_vm0, %v36_v4  ;;  %v78_v21 = vld [vmem:[#allocation2 + $0x8] sm:$0xff] }
   0xa   :  { %122 = vmatpush.bf16.msra.mxu1 %v247_v7  ;;  %v157_v36 = vsub.f32 1.0, %v156_v35 }
   0xc   :  { %v158_v37 = vmul.f32 %v257_v34, %v157_v36 }
   0xe   :  { %123 = vmatpush.bf16.msra.mxu1 %v246_v8  ;;  %v159_v38 = vadd.f32 %v257_v34, %v158_v37 }
  0x10   :  { %v161_v39 = vsel %vm160_vm2, %v257_v34, %v159_v38 }
  0x86   :  { %v70_v10 = vpop.f32.mrf.mxu0 }
  0x87   :  { %v71_v12 = vadd.f32 %v252_v11, %v70_v10 }
  0x89   :  { %v75_v15 = vmax.f32 %v71_v12, 0.0 }
  0x8e   :  { %v72_v13 = vpop.f32.mrf.mxu0 }
  0x8f   :  { %v73_v14 = vadd.f32 %v252_v11, %v72_v13 }
  0x91   :  { %v76_v16 = vmax.f32 %v73_v14, 0.0 }
  0x93   :  { %v79_v17 = vpack.c.bf16 %v76_v16, %v75_v15 }
  0x95   :  { %243 = vmatmul.msk.bf16.vlgmr.msra.gmra.mxu1 %vm112_vm1, %v79_v17 }
 0x112   :  { %v125_v19 = vpop.f32.mrf.mxu1 }
 0x113   :  { %v130_v20 = vadd.f32 %v125_v19, %v77_v18 }
 0x115   :  { %132 = vst.msk [vmem:[#allocation2] sm:$0xff] %vm31_vm0, %v130_v20 }
 0x11a   :  { %v127_v23 = vpop.f32.mrf.mxu1 }
 0x11b   :  { %v131_v24 = vadd.f32 %v127_v23, %v78_v21 }
 0x11c   :  { %v137_v25 = vld [vmem:[#allocation2] sm:$0xff] }
 0x11d   :  { %133 = vst.msk [vmem:[#allocation2 + $0x8] sm:$0xff] %vm31_vm0, %v131_v24  ;;  %v143_v26 = vadd.f32 %v253_v22, %v137_v25 }
 0x11f   :  { %v147_v27 = vadd.f32 %v143_v26, %v34_v2 }
 0x121   :  { %v149_v28 = vsel %vm31_vm0, %v147_v27, 0.0 }
 0x122   :  { %150 = vadd.xlane.f32.xlu0 %v149_v28 }
 0x124   :  { %v138_v29 = vld [vmem:[#allocation2 + $0x8] sm:$0xff] }
 0x125   :  { %v144_v30 = vadd.f32 %v253_v22, %v138_v29 }
 0x127   :  { %v148_v31 = vadd.f32 %v144_v30, %v35_v3  ;;  %v255_v3 = vld [vmem:[%s363_s6] ss:$0 sm:$0xff] }
 0x129   :  { %v152_v32 = vsel %vm31_vm0, %v148_v31, 0.0 }
 0x12a   :  { %153 = vadd.xlane.f32.xlu0 %v152_v32 }
 0x195   :  { %v151_v40 = vpop.xlane.xlu0 %150 }
 0x196   :  { %v162_v41 = vmul.f32 %v161_v39, %v151_v40 }
 0x198   :  { %v164_v42 = vsub.f32 %v147_v27, %v162_v41 }
 0x19a   :  { %v166_v43 = vmul.f32 %v164_v42, %v164_v42 }
 0x19c   :  { %v168_v44 = vsel %vm31_vm0, %v166_v43, 0.0 }
 0x19d   :  { %169 = vadd.xlane.f32.xlu1 %v168_v44  ;;  %v154_v45 = vpop.xlane.xlu0 %153 }
 0x19e   :  { %v163_v46 = vmul.f32 %v161_v39, %v154_v45 }
 0x1a0   :  { %v165_v47 = vsub.f32 %v148_v31, %v163_v46 }
 0x1a2   :  { %v167_v48 = vmul.f32 %v165_v47, %v165_v47 }
 0x1a4   :  { %v171_v49 = vsel %vm31_vm0, %v167_v48, 0.0 }
 0x1a5   :  { %172 = vadd.xlane.f32.xlu1 %v171_v49 }
 0x210   :  { %v170_v50 = vpop.xlane.xlu1 %169 }
 0x211   :  { %v174_v51 = vmul.f32 %v170_v50, %v161_v39 }
 0x213   :  { %v176_v52 = vadd.f32 1e-05, %v174_v51 }
 0x215   :  { %258 = vrsqrt.f32 %v176_v52  ;;  %vm184_vm4 = vweird.f32 %v176_v52 }
 0x218   :  { %v173_v53 = vpop.xlane.xlu1 %172 }
 0x219   :  { %v175_v54 = vmul.f32 %v173_v53, %v161_v39 }
 0x21b   :  { %v259_v55 = vpop.eup %258  ;;  %v177_v56 = vadd.f32 1e-05, %v175_v54 }
 0x21c   :  { %v179_v57 = vmul.f32 %v259_v55, %v176_v52  ;;  %vm185_vm3 = vweird.f32 %v259_v55 }
 0x21d   :  { %260 = vrsqrt.f32 %v177_v56  ;;  %vm186_vm5 = vmor %vm184_vm4, %vm185_vm3  ;;  %vm194_vm7 = vweird.f32 %v177_v56 }
 0x21e   :  { %v180_v58 = vmul.f32 %v259_v55, %v179_v57 }
 0x220   :  { %v181_v59 = vmul.f32 0.5, %v180_v58 }
 0x222   :  { %v182_v60 = vsub.f32 1.5, %v181_v59 }
 0x223   :  { %v261_v61 = vpop.eup %260 }
 0x224   :  { %v183_v62 = vmul.f32 %v259_v55, %v182_v60  ;;  %v189_v63 = vmul.f32 %v261_v61, %v177_v56  ;;  %vm195_vm6 = vweird.f32 %v261_v61 }
 0x225   :  { %vm196_vm8 = vmor %vm194_vm7, %vm195_vm6 }
 0x226   :  { %v187_v1 = vsel %vm186_vm5, %v259_v55, %v183_v62  ;;  %v190_v2 = vmul.f32 %v261_v61, %v189_v63 }
 0x227   :  { %v198_v4 = vmul.f32 %v187_v1, %v164_v42 }
 0x228   :  { %v191_v5 = vmul.f32 0.5, %v190_v2 }
 0x229   :  { %v204_v6 = vmul.f32 %v254_v0, %v198_v4 }
 0x22a   :  { %v192_v7 = vsub.f32 1.5, %v191_v5 }
 0x22b   :  { %v210_v8 = vadd.f32 %v255_v3, %v204_v6 }
 0x22c   :  { %v193_v9 = vmul.f32 %v261_v61, %v192_v7 }
 0x22d   :  { %212 = vst.msk [vmem:[%s364_s7] sm:$0xff] %vm31_vm0, %v210_v8 }
 0x22e   :  { %v197_v10 = vsel %vm196_vm8, %v261_v61, %v193_v9 }
 0x22f   :  { %v199_v11 = vmul.f32 %v197_v10, %v165_v47 }
 0x231   :  { %v205_v12 = vmul.f32 %v254_v0, %v199_v11 }
 0x233   :  { %v211_v13 = vadd.f32 %v255_v3, %v205_v12 }
 0x235   :  { %213 = vst.msk [vmem:[%s364_s7 + $0x8] sm:$0xff] %vm31_vm0, %v211_v13 }

// kernel: text_encoder_forward.31
= control target key start
LH: loop header
LB: loop body
LE: loop exit
PB: predicated region body
PF: predicated region fallthrough
CT: control target
= control target key end

     0   :  { %s401_s0 = inlined_call_operand.vmem [shape: f32[16,32], index: 0, kind: input, shape index: {}]   ;;  %s402_s1 = inlined_call_operand.vmem [shape: bf16[32,64], index: 1, kind: input, shape index: {}]   ;;  %s403_s2 = inlined_call_operand.vmem [shape: f32[1,64], index: 2, kind: input, shape index: {}]   ;;  %s404_s3 = inlined_call_operand.vmem [shape: bf16[64,32], index: 3, kind: input, shape index: {}]   ;;  %s405_s4 = inlined_call_operand.vmem [shape: f32[1,32], index: 4, kind: input, shape index: {}]   ;;  %s406_s5 = inlined_call_operand.vmem [shape: f32[1,32], index: 5, kind: input, shape index: {}]   ;;  %s407_s6 = inlined_call_operand.vmem [shape: f32[1,32], index: 6, kind: input, shape index: {}]   ;;  %s408_s7 = inlined_call_operand.hbm [shape: f32[16,32], index: 7, kind: output, shape index: {}]  }
   0x1   :  { %v260_v0 = vld [vmem:[%s402_s1 + $0x8] sm:$0xff]  ;;  %v259_v1 = vld [vmem:[%s402_s1] sm:$0xff] }
   0x2   :  { %v35_v2 = vld [vmem:[%s401_s0] sm:$0xff]  ;;  %v36_v3 = vld [vmem:[%s401_s0 + $0x8] sm:$0xff]  ;;  %68 = vmatpush.bf16.msra.mxu0 %v260_v0 }
   0x3   :  { %12 = vsyncpa [#allocation4], 0  ;;  %v37_v4 = vpack.c.bf16 %v36_v3, %v35_v2  ;;  %vm32_vm0 = vcmask 261120   ;;  %v264_v5 = vld [vmem:[%s404_s3 + $0x18] sm:$0xff]  ;;  %v263_v6 = vld [vmem:[%s404_s3 + $0x10] sm:$0xff]  ;;  %v306_v9 = vmov 0.0  }
   0x4   :  { %121 = vmatpush.bf16.msra.mxu1 %v264_v5  ;;  %v262_v7 = vld [vmem:[%s404_s3 + $0x8] sm:$0xff]  ;;  %v261_v8 = vld [vmem:[%s404_s3] sm:$0xff]  ;;  %33 = vst.msk [vmem:[#allocation2] sm:$0xff] %vm32_vm0, %v306_v9  ;;  %vm113_vm1 = vcmask 523264   ;;  %v307_v33 = vmov 32.0   ;;  %s221_s23 = sshll.u32 %s408_s7, 4  ;;  %s222_s23 = int_to_ptr.hbm [resolvable:$true] %s221_s23 }
   0x5   :  { %34 = vst.msk [vmem:[#allocation2 + $0x8] sm:$0xff] %vm32_vm0, %v306_v9  ;;  %v270_v11 = vld [vmem:[%s403_s2] ss:$0 sm:$0xff]  ;;  %274 = vrcp.f32 %v307_v33  ;;  %s310_s24 = smov 8  }
   0x6   :  { %69 = vmatpush.bf16.msra.mxu0 %v259_v1  ;;  %v271_v22 = vld [vmem:[%s405_s4] ss:$0 sm:$0xff] }
   0x7   :  { %v272_v0 = vld [vmem:[%s406_s5] ss:$0 sm:$0xff]  ;;  %s308_s5 = smov [#allocation3]  }
   0x8   :  { %122 = vmatpush.bf16.msra.mxu1 %v263_v6  ;;  %s219_s20 = sshll.u32 %s308_s5, 4  ;;  %s220_s20 = int_to_ptr.vmem [resolvable:$true] %s219_s20 }
   0x9   :  { %241 = vmatmul.msk.bf16.vlgmr.msra.gmra.mxu0 %vm32_vm0, %v37_v4  ;;  %v273_v4 = vld [vmem:[%s407_s6] ss:$0 sm:$0xff]  ;;  %s309_s6 = smov 128  }
   0xb   :  { %v78_v18 = vld [vmem:[#allocation2] sm:$0xff]  ;;  %v275_v34 = vpop.eup %274 }
   0xc   :  { %123 = vmatpush.bf16.msra.mxu1 %v262_v7  ;;  %v79_v21 = vld [vmem:[#allocation2 + $0x8] sm:$0xff]  ;;  %v157_v35 = vmul.f32 32.0, %v275_v34  ;;  %vm161_vm2 = vweird.f32 %v275_v34 }
   0xe   :  { %v158_v36 = vsub.f32 1.0, %v157_v35 }
  0x10   :  { %124 = vmatpush.bf16.msra.mxu1 %v261_v8  ;;  %v159_v37 = vmul.f32 %v275_v34, %v158_v36 }
  0x12   :  { %v160_v38 = vadd.f32 %v275_v34, %v159_v37 }
  0x14   :  { %v162_v39 = vsel %vm161_vm2, %v275_v34, %v160_v38 }
  0x86   :  { %v71_v10 = vpop.f32.mrf.mxu0 }
  0x87   :  { %v72_v12 = vadd.f32 %v270_v11, %v71_v10 }
  0x89   :  { %v76_v15 = vmax.f32 %v72_v12, 0.0 }
  0x8e   :  { %v73_v13 = vpop.f32.mrf.mxu0 }
  0x8f   :  { %v74_v14 = vadd.f32 %v270_v11, %v73_v13 }
  0x91   :  { %v77_v16 = vmax.f32 %v74_v14, 0.0 }
  0x93   :  { %v80_v17 = vpack.c.bf16 %v77_v16, %v76_v15 }
  0x95   :  { %258 = vmatmul.msk.bf16.vlgmr.msra.gmra.mxu1 %vm113_vm1, %v80_v17 }
 0x112   :  { %v126_v19 = vpop.f32.mrf.mxu1 }
 0x113   :  { %v131_v20 = vadd.f32 %v126_v19, %v78_v18 }
 0x115   :  { %133 = vst.msk [vmem:[#allocation2] sm:$0xff] %vm32_vm0, %v131_v20 }
 0x11a   :  { %v128_v23 = vpop.f32.mrf.mxu1 }
 0x11b   :  { %v132_v24 = vadd.f32 %v128_v23, %v79_v21 }
 0x11c   :  { %v138_v25 = vld [vmem:[#allocation2] sm:$0xff] }
 0x11d   :  { %134 = vst.msk [vmem:[#allocation2 + $0x8] sm:$0xff] %vm32_vm0, %v132_v24  ;;  %v144_v26 = vadd.f32 %v271_v22, %v138_v25 }
 0x11f   :  { %v148_v27 = vadd.f32 %v144_v26, %v35_v2 }
 0x121   :  { %v150_v28 = vsel %vm32_vm0, %v148_v27, 0.0 }
 0x122   :  { %151 = vadd.xlane.f32.xlu0 %v150_v28 }
 0x124   :  { %v139_v29 = vld [vmem:[#allocation2 + $0x8] sm:$0xff] }
 0x125   :  { %v145_v30 = vadd.f32 %v271_v22, %v139_v29 }
 0x127   :  { %v149_v31 = vadd.f32 %v145_v30, %v36_v3 }
 0x129   :  { %v153_v32 = vsel %vm32_vm0, %v149_v31, 0.0 }
 0x12a   :  { %154 = vadd.xlane.f32.xlu0 %v153_v32 }
 0x195   :  { %v152_v40 = vpop.xlane.xlu0 %151 }
 0x196   :  { %v163_v41 = vmul.f32 %v162_v39, %v152_v40 }
 0x198   :  { %v165_v42 = vsub.f32 %v148_v27, %v163_v41 }
 0x19a   :  { %v167_v43 = vmul.f32 %v165_v42, %v165_v42 }
 0x19c   :  { %v169_v44 = vsel %vm32_vm0, %v167_v43, 0.0 }
 0x19d   :  { %170 = vadd.xlane.f32.xlu1 %v169_v44  ;;  %v155_v45 = vpop.xlane.xlu0 %154 }
 0x19e   :  { %v164_v46 = vmul.f32 %v162_v39, %v155_v45 }
 0x1a0   :  { %v166_v47 = vsub.f32 %v149_v31, %v164_v46 }
 0x1a2   :  { %v168_v48 = vmul.f32 %v166_v47, %v166_v47 }
 0x1a4   :  { %v172_v49 = vsel %vm32_vm0, %v168_v48, 0.0 }
 0x1a5   :  { %173 = vadd.xlane.f32.xlu1 %v172_v49 }
 0x210   :  { %v171_v50 = vpop.xlane.xlu1 %170 }
 0x211   :  { %v175_v51 = vmul.f32 %v171_v50, %v162_v39 }
 0x213   :  { %v177_v52 = vadd.f32 1e-05, %v175_v51 }
 0x215   :  { %276 = vrsqrt.f32 %v177_v52  ;;  %vm185_vm4 = vweird.f32 %v177_v52 }
 0x218   :  { %v174_v53 = vpop.xlane.xlu1 %173 }
 0x219   :  { %v176_v54 = vmul.f32 %v174_v53, %v162_v39 }
 0x21b   :  { %v277_v55 = vpop.eup %276  ;;  %v178_v56 = vadd.f32 1e-05, %v176_v54 }
 0x21c   :  { %v180_v57 = vmul.f32 %v277_v55, %v177_v52  ;;  %vm186_vm3 = vweird.f32 %v277_v55 }
 0x21d   :  { %278 = vrsqrt.f32 %v178_v56  ;;  %vm187_vm5 = vmor %vm185_vm4, %vm186_vm3  ;;  %vm195_vm7 = vweird.f32 %v178_v56 }
 0x21e   :  { %v181_v58 = vmul.f32 %v277_v55, %v180_v57 }
 0x220   :  { %v182_v59 = vmul.f32 0.5, %v181_v58 }
 0x222   :  { %v183_v60 = vsub.f32 1.5, %v182_v59 }
 0x223   :  { %v279_v61 = vpop.eup %278 }
 0x224   :  { %v184_v62 = vmul.f32 %v277_v55, %v183_v60  ;;  %v190_v63 = vmul.f32 %v279_v61, %v178_v56  ;;  %vm196_vm6 = vweird.f32 %v279_v61 }
 0x225   :  { %vm197_vm8 = vmor %vm195_vm7, %vm196_vm6 }
 0x226   :  { %v188_v1 = vsel %vm187_vm5, %v277_v55, %v184_v62  ;;  %v191_v2 = vmul.f32 %v279_v61, %v190_v63 }
 0x227   :  { %v199_v3 = vmul.f32 %v188_v1, %v165_v42 }
 0x228   :  { %v192_v5 = vmul.f32 0.5, %v191_v2 }
 0x229   :  { %v205_v6 = vmul.f32 %v272_v0, %v199_v3 }
 0x22a   :  { %v193_v7 = vsub.f32 1.5, %v192_v5 }
 0x22b   :  { %v211_v8 = vadd.f32 %v273_v4, %v205_v6 }
 0x22c   :  { %v194_v9 = vmul.f32 %v279_v61, %v193_v7 }
 0x22d   :  { %213 = vst.msk [vmem:[#allocation3] sm:$0xff] %vm32_vm0, %v211_v8 }
 0x22e   :  { %v198_v10 = vsel %vm197_vm8, %v279_v61, %v194_v9 }
 0x22f   :  { %v200_v11 = vmul.f32 %v198_v10, %v166_v47 }
 0x231   :  { %v206_v12 = vmul.f32 %v272_v0, %v200_v11 }
 0x233   :  { %v212_v13 = vadd.f32 %v273_v4, %v206_v12 }
 0x235   :  { %214 = vst.msk [vmem:[#allocation3 + $0x8] sm:$0xff] %vm32_vm0, %v212_v13 }
 0x236   :  { %227 = dma.vmem_to_hbm [thread:$0]  %s220_s20, 256, %s222_s23, [#allocation4], %s309_s6, %s309_s6, %s310_s24  }
 0x237   :  { %304 = dma.done.wait [#allocation4], 256  }
 0x238   :  { %305 = vsyncadd [#allocation4], 4294967040 }
 0x239   :  { %232 = vsyncpa [#allocation4], 1 }

</bundles_post_ra>
